<compile_context>
chip_gen: v7x
topology: tpu7x:2x2x1
jax: 0.10.0
libtpu: 0.0.40
codegen_flags: <defaults>
</compile_context>

<pallas_src>
import functools
import math

import jax
import jax.numpy as jnp
from jax.experimental import pallas as pl
from jax.experimental.pallas import tpu as pltpu


# ------------------------------ in-kernel helpers -----------------------------

def _layernorm(x, w, b, eps=1e-5):
    """LayerNorm over the last dim (f32 statistics), affine. x: (T, D) f32."""
    mean = jnp.mean(x, axis=-1, keepdims=True)
    xc = x - mean
    var = jnp.mean(xc * xc, axis=-1, keepdims=True)
    return xc * jax.lax.rsqrt(var + eps) * w + b


def _bf16_dot(a, b):
    """MXU matmul: bf16 operands, f32 accumulation."""
    return jnp.dot(a.astype(jnp.bfloat16), b.astype(jnp.bfloat16),
                   preferred_element_type=jnp.float32)


# --------------------------------- the kernel ---------------------------------

def _mega_layer_kernel(xq_ref, cq_ref, xk_ref, ck_ref, bias_ref,
                       omega_ref,
                       vw_ref, vb_ref,
                       uw_ref, ub_ref, zw_ref, zb_ref, rw_ref, rb_ref,
                       hxw_ref, hxb_ref,
                       gq_ref, bq_ref, gk_ref, bk_ref,
                       hw_ref, hb_ref, ln1w_ref, ln1b_ref,
                       f1w_ref, f1b_ref, f2w_ref, f2b_ref,
                       ln2w_ref, ln2b_ref,
                       o_ref,
                       q_sc, m_sc, l_sc, acc_sc):
    """One Mega layer, one (batch, q-tile) per outer step, kv tiles innermost."""
    ki = pl.program_id(2)

    # ---- init per (batch, q-tile): query projection + online-softmax state ----
    @pl.when(ki == 0)
    def _():
        xq = xq_ref[0].astype(jnp.float32)
        mxq = jax.nn.silu(cq_ref[0].astype(jnp.float32) + xq * omega_ref[...])
        zq = jax.nn.silu(_bf16_dot(mxq, zw_ref[...]) + zb_ref[...])
        q_sc[...] = zq * gq_ref[...] + bq_ref[...]            # softmax scaling folded in
        m_sc[...] = jnp.full(m_sc.shape, -jnp.inf, jnp.float32)
        l_sc[...] = jnp.zeros(l_sc.shape, jnp.float32)
        acc_sc[...] = jnp.zeros(acc_sc.shape, jnp.float32)

    # ---- per kv tile: k / v projections + online softmax accumulation ----
    xk = xk_ref[0].astype(jnp.float32)
    mxk = jax.nn.silu(ck_ref[0].astype(jnp.float32) + xk * omega_ref[...])
    zk = jax.nn.silu(_bf16_dot(mxk, zw_ref[...]) + zb_ref[...])
    k = zk * gk_ref[...] + bk_ref[...]
    v = jax.nn.silu(_bf16_dot(xk, vw_ref[...]) + vb_ref[...])

    s = jax.lax.dot_general(
        q_sc[...].astype(jnp.bfloat16), k.astype(jnp.bfloat16),
        (((1,), (1,)), ((), ())), preferred_element_type=jnp.float32)
    s = s + bias_ref[...]                                     # simple rel-pos bias tile
    m_new = jnp.maximum(m_sc[...], jnp.max(s, axis=-1, keepdims=True))
    alpha = jnp.exp(m_sc[...] - m_new)
    p = jnp.exp(s - m_new)
    l_sc[...] = alpha * l_sc[...] + jnp.sum(p, axis=-1, keepdims=True)
    acc_sc[...] = alpha * acc_sc[...] + _bf16_dot(p, v)
    m_sc[...] = m_new

    # ---- finalize: gates, addcmul residual, postnorm, NFFN, postnorm ----
    @pl.when(ki == pl.num_programs(2) - 1)
    def _():
        xq = xq_ref[0].astype(jnp.float32)
        mxq = jax.nn.silu(cq_ref[0].astype(jnp.float32) + xq * omega_ref[...])
        u = jax.nn.sigmoid(_bf16_dot(mxq, uw_ref[...]) + ub_ref[...])
        r = jax.nn.silu(_bf16_dot(mxq, rw_ref[...]) + rb_ref[...])
        hx = _bf16_dot(mxq, hxw_ref[...]) + hxb_ref[...]
        h = acc_sc[...] * pl.reciprocal(l_sc[...], approx=True)   # EUP reciprocal
        hp = _bf16_dot(h * r, hw_ref[...]) + hb_ref[...]
        h2 = jax.nn.silu(hx + hp)
        y = xq + u * (h2 - xq)                                 # torch.addcmul
        y = _layernorm(y, ln1w_ref[...], ln1b_ref[...])
        f = jax.nn.silu(_bf16_dot(y, f1w_ref[...]) + f1b_ref[...])
        f2 = _bf16_dot(f, f2w_ref[...]) + f2b_ref[...]
        y2 = _layernorm(f2 + y, ln2w_ref[...], ln2b_ref[...])
        o_ref[0] = y2.astype(o_ref.dtype)


# ------------------------- XLA (non-Pallas) preprocessing ----------------------

def _ema_kernels(lp, L):
    """Bidirectional MultiHeadEMA decay kernels k1 (fwd), k2 (bwd): each (D, L)."""
    two_d, n_dim, _ = lp["ema_delta"].shape
    d = two_d // 2
    scale = math.sqrt(1.0 / n_dim)
    p = jax.nn.sigmoid(lp["ema_delta"])                       # (2D, N, 1)
    alpha = jax.nn.sigmoid(lp["ema_alpha"])                   # (2D, N, 1)
    q = 1.0 - p * alpha                                       # (2D, N, 1)
    vander = jnp.arange(L, dtype=jnp.float32).reshape(1, 1, L) * jnp.log(q)
    kern = (p * lp["ema_beta"]) * jnp.exp(vander)             # (2D, N, L)
    k = jnp.einsum("dnl,dn->dl", kern, lp["ema_gamma"] * scale)   # (2D, L)
    return k[:d], k[d:]


def _ema_fft_conv(x, k1, k2):
    """Bidirectional EMA convolution via FFT (matches fairseq rfft/irfft form).

    out[t, d] = sum_{j<=t} k1[d, t-j] x[j, d] + sum_{j>=t} k2[d, j-t] x[j, d]
    x: (B, L, D) -> (B, L, D), f32.
    """
    B, L, D = x.shape
    if L == 1:
        return x.astype(jnp.float32) * (k1[:, 0] + k2[:, 0])[None, None, :]
    n = 1 << int(math.ceil(math.log2(4 * L - 3)))             # linear conv, pow2 FFT
    kc = (jnp.concatenate([jnp.zeros((D, L - 1), jnp.float32), k1], axis=-1) +
          jnp.concatenate([jnp.flip(k2, axis=-1),
                           jnp.zeros((D, L - 1), jnp.float32)], axis=-1))   # (D, 2L-1)
    kf = jnp.fft.rfft(kc.T, n=n, axis=0)                      # (n//2+1, D)
    xp = jnp.pad(x.astype(jnp.float32), ((0, 0), (L - 1, 0), (0, 0)))
    xf = jnp.fft.rfft(xp, n=n, axis=1)                        # (B, n//2+1, D)
    out = jnp.fft.irfft(xf * kf[None], n=n, axis=1)           # (B, n, D)
    return out[:, 2 * L - 2: 3 * L - 2, :]


def _rel_pos_bias_matrix(rel, L, max_positions):
    """SimpleRelativePositionalBias: bias[i, j] = rel[max_pos - 1 + (j - i)]."""
    idx = (max_positions - 1) + (jnp.arange(L)[None, :] - jnp.arange(L)[:, None])
    return rel[idx].astype(jnp.float32)                       # (L, L)


def _seq_tile(L):
    """Largest convenient sequence tile dividing L (else full sequence)."""
    for t in (256, 128):
        if L % t == 0:
            return t
    return L


def _vmem_limit_bytes():
    """Generation-aware VMEM budget: ~85% of physical, capped at 112 MiB."""
    cap = 128 * 1024 * 1024
    try:
        cap = int(pltpu.get_tpu_info().vmem_capacity_bytes)
    except Exception:
        pass
    return int(max(32 * 1024 * 1024, min(cap * 0.85, 112 * 1024 * 1024)))


# -------------------------------- layer wrapper --------------------------------

def mega_layer(x, lp, max_positions):
    """One fused Mega encoder layer.  x: (B, L, D) bf16 -> (B, L, D) bf16."""
    B, L, D = x.shape
    Z = lp["attn_gamma"].shape[1]
    H = lp["v_w"].shape[1]
    F = lp["fc1_w"].shape[1]
    bf = jnp.bfloat16
    scaling = float(Z) ** -0.5

    # ---- cheap XLA preprocessing (EMA FFT conv + parameter-only tensors) ----
    k1, k2 = _ema_kernels(lp, L)
    conv = _ema_fft_conv(x, k1, k2).astype(bf)                               # (B, L, D)
    bias = _rel_pos_bias_matrix(lp["rel_pos_bias"], L, max_positions)        # (L, L)

    # split the fused mx projection into lane-aligned per-output matmuls
    W, bmx = lp["mx_w"], lp["mx_b"]
    uw, zw, rw, hxw = W[:, :D], W[:, D:D + Z], W[:, D + Z:D + Z + H], W[:, D + Z + H:]
    ub, zb, rb, hxb = bmx[:D], bmx[D:D + Z], bmx[D + Z:D + Z + H], bmx[D + Z + H:]
    # fold softmax scaling into the query affine
    gq = lp["attn_gamma"][0:1] * scaling
    bq = lp["attn_beta"][0:1] * scaling
    gk = lp["attn_gamma"][1:2]
    bk = lp["attn_beta"][1:2]

    tq = tk = _seq_tile(L)
    nq, nk = L // tq, L // tk
    grid = (B, nq, nk)

    def _rep(shape):
        zero = (0,) * len(shape)
        return pl.BlockSpec(shape, lambda b, qi, ki: zero)

    q_spec = pl.BlockSpec((1, tq, D), lambda b, qi, ki: (b, qi, 0))
    kv_spec = pl.BlockSpec((1, tk, D), lambda b, qi, ki: (b, ki, 0))
    bias_spec = pl.BlockSpec((tq, tk), lambda b, qi, ki: (qi, ki))

    in_specs = [
        q_spec, q_spec, kv_spec, kv_spec, bias_spec,
        _rep((1, D)),                                           # omega
        _rep((D, H)), _rep((1, H)),                             # v proj
        _rep((D, D)), _rep((1, D)),                             # u proj
        _rep((D, Z)), _rep((1, Z)),                             # z proj
        _rep((D, H)), _rep((1, H)),                             # r proj
        _rep((D, D)), _rep((1, D)),                             # hx proj
        _rep((1, Z)), _rep((1, Z)), _rep((1, Z)), _rep((1, Z)), # gamma/beta (q, k)
        _rep((H, D)), _rep((1, D)),                             # h proj
        _rep((1, D)), _rep((1, D)),                             # attn LayerNorm
        _rep((D, F)), _rep((1, F)),                             # fc1
        _rep((F, D)), _rep((1, D)),                             # fc2
        _rep((1, D)), _rep((1, D)),                             # ffn LayerNorm
    ]

    return pl.pallas_call(
        _mega_layer_kernel,
        out_shape=jax.ShapeDtypeStruct((B, L, D), bf),
        grid=grid,
        in_specs=in_specs,
        out_specs=pl.BlockSpec((1, tq, D), lambda b, qi, ki: (b, qi, 0)),
        scratch_shapes=[
            pltpu.VMEM((tq, Z), jnp.float32),                   # q tile
            pltpu.VMEM((tq, 1), jnp.float32),                   # running max
            pltpu.VMEM((tq, 1), jnp.float32),                   # running denominator
            pltpu.VMEM((tq, H), jnp.float32),                   # output accumulator
        ],
        compiler_params=pltpu.CompilerParams(
            dimension_semantics=("parallel", "parallel", "arbitrary"),
            vmem_limit_bytes=_vmem_limit_bytes()),
    )(
        x, conv, x, conv, bias,
        lp["ema_omega"].reshape(1, D),
        lp["v_w"].astype(bf), lp["v_b"].reshape(1, H),
        uw.astype(bf), ub.reshape(1, D),
        zw.astype(bf), zb.reshape(1, Z),
        rw.astype(bf), rb.reshape(1, H),
        hxw.astype(bf), hxb.reshape(1, D),
        gq, bq, gk, bk,
        lp["h_w"].astype(bf), lp["h_b"].reshape(1, D),
        lp["attn_norm_w"].reshape(1, D), lp["attn_norm_b"].reshape(1, D),
        lp["fc1_w"].astype(bf), lp["fc1_b"].reshape(1, F),
        lp["fc2_w"].astype(bf), lp["fc2_b"].reshape(1, D),
        lp["ffn_norm_w"].reshape(1, D), lp["ffn_norm_b"].reshape(1, D),
    )


# ----------------------------------- forward -----------------------------------

def mega_scraw_encoder_forward(params, tokens, src_lengths,
                               max_positions, sen_rep_type="cls"):
    """Returns (inner_states tuple of (T, B, D) f32, sentence_rep (B, D) f32)."""
    B, T = tokens.shape
    D = params["embed_weight"].shape[0]

    # RealNumberEmbedding stays in XLA (trivial scale * outer product, fused).
    emb = (float(D) ** -0.5) * tokens.astype(jnp.float32)[:, :, None] \
        * params["embed_weight"]                               # (B, T, D)
    x = emb.astype(jnp.bfloat16)                               # bf16 inter-layer activations

    collected = [x]                                            # keep batch-major, bf16
    for lp in params["layers"]:
        x = mega_layer(x, lp, max_positions)
        collected.append(x)

    # Single stacked transpose at the end (no per-layer HBM transpose passes).
    stacked = jnp.transpose(jnp.stack(collected, axis=0), (0, 2, 1, 3)).astype(jnp.float32)
    inner_states = tuple(stacked[i] for i in range(len(collected)))

    # normalize_before=False => final_norm is None
    xf = x.astype(jnp.float32)
    if sen_rep_type == "mp":
        rep = jnp.sum(xf, axis=1) / src_lengths[:, None].astype(jnp.float32)
    else:  # 'cls'
        rep = xf[:, 0, :]
    return inner_states, rep


# ----------------------------- deterministic params ----------------------------

def init_params(key, num_layers, D, H, F, Z, N, max_seq_len):
    keys = jax.random.split(key, num_layers + 1)

    def normal(k, shape, std=0.1):
        return std * jax.random.normal(k, shape, dtype=jnp.float32)

    params = {"embed_weight": normal(keys[0], (D,), 1.0)}
    layers = []
    for i in range(num_layers):
        ks = jax.random.split(keys[i + 1], 13)
        layers.append({
            # MultiHeadEMA (bidirectional => 2*D channels)
            "ema_delta": normal(ks[0], (2 * D, N, 1)),
            "ema_alpha": normal(ks[1], (2 * D, N, 1)),
            "ema_beta": normal(ks[2], (2 * D, N, 1)),
            "ema_gamma": normal(ks[3], (2 * D, N)),
            "ema_omega": normal(ks[4], (D,)),
            # projections stored as (in, out), i.e. already transposed for x @ W
            "v_w": normal(ks[5], (D, H), 0.02), "v_b": jnp.zeros((H,), jnp.float32),
            "mx_w": normal(ks[6], (D, Z + H + 2 * D), 0.02),
            "mx_b": jnp.zeros((Z + H + 2 * D,), jnp.float32),
            "h_w": normal(ks[7], (H, D), 0.02), "h_b": jnp.zeros((D,), jnp.float32),
            "attn_gamma": normal(ks[8], (2, Z)),
            "attn_beta": normal(ks[9], (2, Z)),
            "rel_pos_bias": normal(ks[10], (2 * max_seq_len - 1,), 0.02),
            "attn_norm_w": jnp.ones((D,), jnp.float32),
            "attn_norm_b": jnp.zeros((D,), jnp.float32),
            # NormalizedFeedForwardNetwork
            "fc1_w": normal(ks[11], (D, F), 0.02), "fc1_b": jnp.zeros((F,), jnp.float32),
            "fc2_w": normal(ks[12], (F, D), 0.02), "fc2_b": jnp.zeros((D,), jnp.float32),
            "ffn_norm_w": jnp.ones((D,), jnp.float32),
            "ffn_norm_b": jnp.zeros((D,), jnp.float32),
        })
    params["layers"] = layers
    return params


if __name__ == "__main__":
    num_layers = 2
    D, H, F, Z, N = 32, 64, 64, 16, 4      # embedding, hidden, ffn_hidden, z_dim, n_dim
    B, T = 2, 8                            # batch, raw-waveform length
    max_seq_len = 64

    key = jax.random.PRNGKey(0)
    kp, kt = jax.random.split(key)
    params = init_params(kp, num_layers, D, H, F, Z, N, max_seq_len)
    tokens = jax.random.normal(kt, (B, T), dtype=jnp.float32)   # real-valued "tokens"
    src_lengths = jnp.full((B,), T, dtype=jnp.int32)

    fwd = jax.jit(functools.partial(mega_scraw_encoder_forward,
                                    max_positions=max_seq_len,
                                    sen_rep_type="cls"))
    inner_states, sentence_rep = fwd(params, tokens, src_lengths)
    jax.block_until_ready(sentence_rep)
    jax.block_until_ready(inner_states)

    assert sentence_rep.shape == (B, D)
    assert len(inner_states) == num_layers + 1
    assert all(s.shape == (T, B, D) for s in inner_states)
    assert all(bool(jnp.all(jnp.isfinite(s))) for s in inner_states)
    assert bool(jnp.all(jnp.isfinite(sentence_rep)))
    print("KERNEL_OK")
</pallas_src>

<mosaic_0001>
module attributes {stable_mosaic.version = 11 : i64} {
  func.func @_mega_layer_kernel(%arg0: i32, %arg1: i32, %arg2: i32, %arg3: memref<1x8x32xbf16, #tpu.memory_space<vmem>>, %arg4: memref<1x8x32xbf16, #tpu.memory_space<vmem>>, %arg5: memref<1x8x32xbf16, #tpu.memory_space<vmem>>, %arg6: memref<1x8x32xbf16, #tpu.memory_space<vmem>>, %arg7: memref<8x8xf32, #tpu.memory_space<vmem>>, %arg8: memref<1x32xf32, #tpu.memory_space<vmem>>, %arg9: memref<32x64xbf16, #tpu.memory_space<vmem>>, %arg10: memref<1x64xf32, #tpu.memory_space<vmem>>, %arg11: memref<32x32xbf16, #tpu.memory_space<vmem>>, %arg12: memref<1x32xf32, #tpu.memory_space<vmem>>, %arg13: memref<32x16xbf16, #tpu.memory_space<vmem>>, %arg14: memref<1x16xf32, #tpu.memory_space<vmem>>, %arg15: memref<32x64xbf16, #tpu.memory_space<vmem>>, %arg16: memref<1x64xf32, #tpu.memory_space<vmem>>, %arg17: memref<32x32xbf16, #tpu.memory_space<vmem>>, %arg18: memref<1x32xf32, #tpu.memory_space<vmem>>, %arg19: memref<1x16xf32, #tpu.memory_space<vmem>>, %arg20: memref<1x16xf32, #tpu.memory_space<vmem>>, %arg21: memref<1x16xf32, #tpu.memory_space<vmem>>, %arg22: memref<1x16xf32, #tpu.memory_space<vmem>>, %arg23: memref<64x32xbf16, #tpu.memory_space<vmem>>, %arg24: memref<1x32xf32, #tpu.memory_space<vmem>>, %arg25: memref<1x32xf32, #tpu.memory_space<vmem>>, %arg26: memref<1x32xf32, #tpu.memory_space<vmem>>, %arg27: memref<32x64xbf16, #tpu.memory_space<vmem>>, %arg28: memref<1x64xf32, #tpu.memory_space<vmem>>, %arg29: memref<64x32xbf16, #tpu.memory_space<vmem>>, %arg30: memref<1x32xf32, #tpu.memory_space<vmem>>, %arg31: memref<1x32xf32, #tpu.memory_space<vmem>>, %arg32: memref<1x32xf32, #tpu.memory_space<vmem>>, %arg33: memref<1x8x32xbf16, #tpu.memory_space<vmem>>, %arg34: memref<8x16xf32, #tpu.memory_space<vmem>>, %arg35: memref<8x1xf32, #tpu.memory_space<vmem>>, %arg36: memref<8x1xf32, #tpu.memory_space<vmem>>, %arg37: memref<8x64xf32, #tpu.memory_space<vmem>>) attributes {dimension_semantics = [#tpu.dimension_semantics<parallel>, #tpu.dimension_semantics<parallel>, #tpu.dimension_semantics<arbitrary>], iteration_bounds = array<i64: 2, 1, 1>, scalar_prefetch = 0 : i64, scratch_operands = 4 : i64, tpu.core_type = #tpu.core_type<tc>, window_params = [{transform_indices = @transform_0, window_bounds = array<i64: 1, 8, 32>}, {transform_indices = @transform_1, window_bounds = array<i64: 1, 8, 32>}, {transform_indices = @transform_2, window_bounds = array<i64: 1, 8, 32>}, {transform_indices = @transform_3, window_bounds = array<i64: 1, 8, 32>}, {transform_indices = @transform_4, window_bounds = array<i64: 8, 8>}, {pipeline_mode = #tpu.pipeline_mode<synchronous>, transform_indices = @transform_5, window_bounds = array<i64: 1, 32>}, {pipeline_mode = #tpu.pipeline_mode<synchronous>, transform_indices = @transform_6, window_bounds = array<i64: 32, 64>}, {pipeline_mode = #tpu.pipeline_mode<synchronous>, transform_indices = @transform_7, window_bounds = array<i64: 1, 64>}, {pipeline_mode = #tpu.pipeline_mode<synchronous>, transform_indices = @transform_8, window_bounds = array<i64: 32, 32>}, {pipeline_mode = #tpu.pipeline_mode<synchronous>, transform_indices = @transform_9, window_bounds = array<i64: 1, 32>}, {pipeline_mode = #tpu.pipeline_mode<synchronous>, transform_indices = @transform_10, window_bounds = array<i64: 32, 16>}, {pipeline_mode = #tpu.pipeline_mode<synchronous>, transform_indices = @transform_11, window_bounds = array<i64: 1, 16>}, {pipeline_mode = #tpu.pipeline_mode<synchronous>, transform_indices = @transform_12, window_bounds = array<i64: 32, 64>}, {pipeline_mode = #tpu.pipeline_mode<synchronous>, transform_indices = @transform_13, window_bounds = array<i64: 1, 64>}, {pipeline_mode = #tpu.pipeline_mode<synchronous>, transform_indices = @transform_14, window_bounds = array<i64: 32, 32>}, {pipeline_mode = #tpu.pipeline_mode<synchronous>, transform_indices = @transform_15, window_bounds = array<i64: 1, 32>}, {pipeline_mode = #tpu.pipeline_mode<synchronous>, transform_indices = @transform_16, window_bounds = array<i64: 1, 16>}, {pipeline_mode = #tpu.pipeline_mode<synchronous>, transform_indices = @transform_17, window_bounds = array<i64: 1, 16>}, {pipeline_mode = #tpu.pipeline_mode<synchronous>, transform_indices = @transform_18, window_bounds = array<i64: 1, 16>}, {pipeline_mode = #tpu.pipeline_mode<synchronous>, transform_indices = @transform_19, window_bounds = array<i64: 1, 16>}, {pipeline_mode = #tpu.pipeline_mode<synchronous>, transform_indices = @transform_20, window_bounds = array<i64: 64, 32>}, {pipeline_mode = #tpu.pipeline_mode<synchronous>, transform_indices = @transform_21, window_bounds = array<i64: 1, 32>}, {pipeline_mode = #tpu.pipeline_mode<synchronous>, transform_indices = @transform_22, window_bounds = array<i64: 1, 32>}, {pipeline_mode = #tpu.pipeline_mode<synchronous>, transform_indices = @transform_23, window_bounds = array<i64: 1, 32>}, {pipeline_mode = #tpu.pipeline_mode<synchronous>, transform_indices = @transform_24, window_bounds = array<i64: 32, 64>}, {pipeline_mode = #tpu.pipeline_mode<synchronous>, transform_indices = @transform_25, window_bounds = array<i64: 1, 64>}, {pipeline_mode = #tpu.pipeline_mode<synchronous>, transform_indices = @transform_26, window_bounds = array<i64: 64, 32>}, {pipeline_mode = #tpu.pipeline_mode<synchronous>, transform_indices = @transform_27, window_bounds = array<i64: 1, 32>}, {pipeline_mode = #tpu.pipeline_mode<synchronous>, transform_indices = @transform_28, window_bounds = array<i64: 1, 32>}, {pipeline_mode = #tpu.pipeline_mode<synchronous>, transform_indices = @transform_29, window_bounds = array<i64: 1, 32>}, {transform_indices = @transform_30, window_bounds = array<i64: 1, 8, 32>}]} {
    %c0_i32 = arith.constant 0 : i32
    %0 = arith.cmpi eq, %arg2, %c0_i32 : i32
    %1 = arith.extui %0 : i1 to i32
    %c0_i32_0 = arith.constant 0 : i32
    %2 = arith.cmpi ne, %1, %c0_i32_0 : i32
    scf.if %2 {
      %c0_48 = arith.constant 0 : index
      %c0_49 = arith.constant 0 : index
      %c0_50 = arith.constant 0 : index
      %83 = vector.load %arg3[%c0_48, %c0_49, %c0_50] : memref<1x8x32xbf16, #tpu.memory_space<vmem>>, vector<1x8x32xbf16>
      %84 = vector.shape_cast %83 : vector<1x8x32xbf16> to vector<8x32xbf16>
      %85 = arith.extf %84 : vector<8x32xbf16> to vector<8x32xf32>
      %c0_51 = arith.constant 0 : index
      %c0_52 = arith.constant 0 : index
      %c0_53 = arith.constant 0 : index
      %86 = vector.load %arg4[%c0_51, %c0_52, %c0_53] : memref<1x8x32xbf16, #tpu.memory_space<vmem>>, vector<1x8x32xbf16>
      %87 = vector.shape_cast %86 : vector<1x8x32xbf16> to vector<8x32xbf16>
      %88 = arith.extf %87 : vector<8x32xbf16> to vector<8x32xf32>
      %c0_54 = arith.constant 0 : index
      %c0_55 = arith.constant 0 : index
      %89 = vector.load %arg8[%c0_54, %c0_55] : memref<1x32xf32, #tpu.memory_space<vmem>>, vector<1x32xf32>
      %90 = vector.broadcast %89 : vector<1x32xf32> to vector<8x32xf32>
      %91 = arith.mulf %85, %90 : vector<8x32xf32>
      %92 = arith.addf %88, %91 : vector<8x32xf32>
      %93 = arith.negf %92 : vector<8x32xf32>
      %94 = math.exp %93 : vector<8x32xf32>
      %cst_56 = arith.constant 1.000000e+00 : f32
      %95 = vector.broadcast %cst_56 : f32 to vector<8x32xf32>
      %96 = arith.addf %95, %94 : vector<8x32xf32>
      %97 = arith.divf %95, %96 : vector<8x32xf32>
      %98 = arith.mulf %92, %97 : vector<8x32xf32>
      %c0_57 = arith.constant 0 : index
      %c0_58 = arith.constant 0 : index
      %99 = vector.load %arg13[%c0_57, %c0_58] : memref<32x16xbf16, #tpu.memory_space<vmem>>, vector<32x16xbf16>
      %100 = arith.truncf %98 : vector<8x32xf32> to vector<8x32xbf16>
      %cst_59 = arith.constant dense<0.000000e+00> : vector<8x16xf32>
      %101 = tpu.matmul %100, %99, %cst_59 {dimension_numbers = #tpu.dot_dimension_numbers<[1], [0], [0], [1], [0, 0, 1, 1], [], []>} : vector<8x32xbf16>, vector<32x16xbf16>, vector<8x16xf32> -> vector<8x16xf32>
      %c0_60 = arith.constant 0 : index
      %c0_61 = arith.constant 0 : index
      %102 = vector.load %arg14[%c0_60, %c0_61] : memref<1x16xf32, #tpu.memory_space<vmem>>, vector<1x16xf32>
      %103 = vector.broadcast %102 : vector<1x16xf32> to vector<8x16xf32>
      %104 = arith.addf %101, %103 : vector<8x16xf32>
      %105 = arith.negf %104 : vector<8x16xf32>
      %106 = math.exp %105 : vector<8x16xf32>
      %cst_62 = arith.constant 1.000000e+00 : f32
      %107 = vector.broadcast %cst_62 : f32 to vector<8x16xf32>
      %108 = arith.addf %107, %106 : vector<8x16xf32>
      %109 = arith.divf %107, %108 : vector<8x16xf32>
      %110 = arith.mulf %104, %109 : vector<8x16xf32>
      %c0_63 = arith.constant 0 : index
      %c0_64 = arith.constant 0 : index
      %111 = vector.load %arg19[%c0_63, %c0_64] : memref<1x16xf32, #tpu.memory_space<vmem>>, vector<1x16xf32>
      %112 = vector.broadcast %111 : vector<1x16xf32> to vector<8x16xf32>
      %113 = arith.mulf %110, %112 : vector<8x16xf32>
      %c0_65 = arith.constant 0 : index
      %c0_66 = arith.constant 0 : index
      %114 = vector.load %arg20[%c0_65, %c0_66] : memref<1x16xf32, #tpu.memory_space<vmem>>, vector<1x16xf32>
      %115 = vector.broadcast %114 : vector<1x16xf32> to vector<8x16xf32>
      %116 = arith.addf %113, %115 : vector<8x16xf32>
      %c0_67 = arith.constant 0 : index
      %c0_68 = arith.constant 0 : index
      %117 = vector.load %arg34[%c0_67, %c0_68] : memref<8x16xf32, #tpu.memory_space<vmem>>, vector<8x16xf32>
      tpu.vector_store %arg34[%c0_67, %c0_68], %116 {strides = array<i32>} : memref<8x16xf32, #tpu.memory_space<vmem>>, vector<8x16xf32>,
      %cst_69 = arith.constant 0xFF800000 : f32
      %118 = vector.broadcast %cst_69 : f32 to vector<8x1xf32>
      %c0_70 = arith.constant 0 : index
      %c0_71 = arith.constant 0 : index
      %119 = vector.load %arg35[%c0_70, %c0_71] : memref<8x1xf32, #tpu.memory_space<vmem>>, vector<8x1xf32>
      tpu.vector_store %arg35[%c0_70, %c0_71], %118 {strides = array<i32>} : memref<8x1xf32, #tpu.memory_space<vmem>>, vector<8x1xf32>,
      %cst_72 = arith.constant 0.000000e+00 : f32
      %120 = vector.broadcast %cst_72 : f32 to vector<8x1xf32>
      %c0_73 = arith.constant 0 : index
      %c0_74 = arith.constant 0 : index
      %121 = vector.load %arg36[%c0_73, %c0_74] : memref<8x1xf32, #tpu.memory_space<vmem>>, vector<8x1xf32>
      tpu.vector_store %arg36[%c0_73, %c0_74], %120 {strides = array<i32>} : memref<8x1xf32, #tpu.memory_space<vmem>>, vector<8x1xf32>,
      %cst_75 = arith.constant 0.000000e+00 : f32
      %122 = vector.broadcast %cst_75 : f32 to vector<8x64xf32>
      %c0_76 = arith.constant 0 : index
      %c0_77 = arith.constant 0 : index
      %123 = vector.load %arg37[%c0_76, %c0_77] : memref<8x64xf32, #tpu.memory_space<vmem>>, vector<8x64xf32>
      tpu.vector_store %arg37[%c0_76, %c0_77], %122 {strides = array<i32>} : memref<8x64xf32, #tpu.memory_space<vmem>>, vector<8x64xf32>,
    } else {
    }
    %c0 = arith.constant 0 : index
    %c0_1 = arith.constant 0 : index
    %c0_2 = arith.constant 0 : index
    %3 = vector.load %arg5[%c0, %c0_1, %c0_2] : memref<1x8x32xbf16, #tpu.memory_space<vmem>>, vector<1x8x32xbf16>
    %4 = vector.shape_cast %3 : vector<1x8x32xbf16> to vector<8x32xbf16>
    %5 = arith.extf %4 : vector<8x32xbf16> to vector<8x32xf32>
    %c0_3 = arith.constant 0 : index
    %c0_4 = arith.constant 0 : index
    %c0_5 = arith.constant 0 : index
    %6 = vector.load %arg6[%c0_3, %c0_4, %c0_5] : memref<1x8x32xbf16, #tpu.memory_space<vmem>>, vector<1x8x32xbf16>
    %7 = vector.shape_cast %6 : vector<1x8x32xbf16> to vector<8x32xbf16>
    %8 = arith.extf %7 : vector<8x32xbf16> to vector<8x32xf32>
    %c0_6 = arith.constant 0 : index
    %c0_7 = arith.constant 0 : index
    %9 = vector.load %arg8[%c0_6, %c0_7] : memref<1x32xf32, #tpu.memory_space<vmem>>, vector<1x32xf32>
    %10 = vector.broadcast %9 : vector<1x32xf32> to vector<8x32xf32>
    %11 = arith.mulf %5, %10 : vector<8x32xf32>
    %12 = arith.addf %8, %11 : vector<8x32xf32>
    %13 = arith.negf %12 : vector<8x32xf32>
    %14 = math.exp %13 : vector<8x32xf32>
    %cst = arith.constant 1.000000e+00 : f32
    %15 = vector.broadcast %cst : f32 to vector<8x32xf32>
    %16 = arith.addf %15, %14 : vector<8x32xf32>
    %17 = arith.divf %15, %16 : vector<8x32xf32>
    %18 = arith.mulf %12, %17 : vector<8x32xf32>
    %c0_8 = arith.constant 0 : index
    %c0_9 = arith.constant 0 : index
    %19 = vector.load %arg13[%c0_8, %c0_9] : memref<32x16xbf16, #tpu.memory_space<vmem>>, vector<32x16xbf16>
    %20 = arith.truncf %18 : vector<8x32xf32> to vector<8x32xbf16>
    %cst_10 = arith.constant dense<0.000000e+00> : vector<8x16xf32>
    %21 = tpu.matmul %20, %19, %cst_10 {dimension_numbers = #tpu.dot_dimension_numbers<[1], [0], [0], [1], [0, 0, 1, 1], [], []>} : vector<8x32xbf16>, vector<32x16xbf16>, vector<8x16xf32> -> vector<8x16xf32>
    %c0_11 = arith.constant 0 : index
    %c0_12 = arith.constant 0 : index
    %22 = vector.load %arg14[%c0_11, %c0_12] : memref<1x16xf32, #tpu.memory_space<vmem>>, vector<1x16xf32>
    %23 = vector.broadcast %22 : vector<1x16xf32> to vector<8x16xf32>
    %24 = arith.addf %21, %23 : vector<8x16xf32>
    %25 = arith.negf %24 : vector<8x16xf32>
    %26 = math.exp %25 : vector<8x16xf32>
    %cst_13 = arith.constant 1.000000e+00 : f32
    %27 = vector.broadcast %cst_13 : f32 to vector<8x16xf32>
    %28 = arith.addf %27, %26 : vector<8x16xf32>
    %29 = arith.divf %27, %28 : vector<8x16xf32>
    %30 = arith.mulf %24, %29 : vector<8x16xf32>
    %c0_14 = arith.constant 0 : index
    %c0_15 = arith.constant 0 : index
    %31 = vector.load %arg21[%c0_14, %c0_15] : memref<1x16xf32, #tpu.memory_space<vmem>>, vector<1x16xf32>
    %32 = vector.broadcast %31 : vector<1x16xf32> to vector<8x16xf32>
    %33 = arith.mulf %30, %32 : vector<8x16xf32>
    %c0_16 = arith.constant 0 : index
    %c0_17 = arith.constant 0 : index
    %34 = vector.load %arg22[%c0_16, %c0_17] : memref<1x16xf32, #tpu.memory_space<vmem>>, vector<1x16xf32>
    %35 = vector.broadcast %34 : vector<1x16xf32> to vector<8x16xf32>
    %36 = arith.addf %33, %35 : vector<8x16xf32>
    %c0_18 = arith.constant 0 : index
    %c0_19 = arith.constant 0 : index
    %37 = vector.load %arg9[%c0_18, %c0_19] : memref<32x64xbf16, #tpu.memory_space<vmem>>, vector<32x64xbf16>
    %38 = arith.truncf %5 : vector<8x32xf32> to vector<8x32xbf16>
    %cst_20 = arith.constant dense<0.000000e+00> : vector<8x64xf32>
    %39 = tpu.matmul %38, %37, %cst_20 {dimension_numbers = #tpu.dot_dimension_numbers<[1], [0], [0], [1], [0, 0, 1, 1], [], []>} : vector<8x32xbf16>, vector<32x64xbf16>, vector<8x64xf32> -> vector<8x64xf32>
    %c0_21 = arith.constant 0 : index
    %c0_22 = arith.constant 0 : index
    %40 = vector.load %arg10[%c0_21, %c0_22] : memref<1x64xf32, #tpu.memory_space<vmem>>, vector<1x64xf32>
    %41 = vector.broadcast %40 : vector<1x64xf32> to vector<8x64xf32>
    %42 = arith.addf %39, %41 : vector<8x64xf32>
    %43 = arith.negf %42 : vector<8x64xf32>
    %44 = math.exp %43 : vector<8x64xf32>
    %cst_23 = arith.constant 1.000000e+00 : f32
    %45 = vector.broadcast %cst_23 : f32 to vector<8x64xf32>
    %46 = arith.addf %45, %44 : vector<8x64xf32>
    %47 = arith.divf %45, %46 : vector<8x64xf32>
    %48 = arith.mulf %42, %47 : vector<8x64xf32>
    %c0_24 = arith.constant 0 : index
    %c0_25 = arith.constant 0 : index
    %49 = vector.load %arg34[%c0_24, %c0_25] : memref<8x16xf32, #tpu.memory_space<vmem>>, vector<8x16xf32>
    %50 = arith.truncf %49 : vector<8x16xf32> to vector<8x16xbf16>
    %51 = arith.truncf %36 : vector<8x16xf32> to vector<8x16xbf16>
    %cst_26 = arith.constant dense<0.000000e+00> : vector<8x8xf32>
    %52 = tpu.matmul %50, %51, %cst_26 {dimension_numbers = #tpu.dot_dimension_numbers<[1], [1], [0], [0], [0, 0, 1, 0], [], []>} : vector<8x16xbf16>, vector<8x16xbf16>, vector<8x8xf32> -> vector<8x8xf32>
    %c0_27 = arith.constant 0 : index
    %c0_28 = arith.constant 0 : index
    %53 = vector.load %arg7[%c0_27, %c0_28] : memref<8x8xf32, #tpu.memory_space<vmem>>, vector<8x8xf32>
    %54 = arith.addf %52, %53 : vector<8x8xf32>
    %c0_29 = arith.constant 0 : index
    %c0_30 = arith.constant 0 : index
    %55 = vector.load %arg35[%c0_29, %c0_30] : memref<8x1xf32, #tpu.memory_space<vmem>>, vector<8x1xf32>
    %cst_31 = arith.constant dense<0xFF800000> : vector<8xf32>
    %56 = vector.multi_reduction <maximumf>, %54, %cst_31 [1] : vector<8x8xf32> to vector<8xf32>
    %57 = vector.shape_cast %56 : vector<8xf32> to vector<8x1xf32>
    %58 = arith.maximumf %55, %57 : vector<8x1xf32>
    %c0_32 = arith.constant 0 : index
    %c0_33 = arith.constant 0 : index
    %59 = vector.load %arg35[%c0_32, %c0_33] : memref<8x1xf32, #tpu.memory_space<vmem>>, vector<8x1xf32>
    %60 = arith.subf %59, %58 : vector<8x1xf32>
    %61 = math.exp %60 : vector<8x1xf32>
    %62 = vector.broadcast %58 : vector<8x1xf32> to vector<8x8xf32>
    %63 = arith.subf %54, %62 : vector<8x8xf32>
    %64 = math.exp %63 : vector<8x8xf32>
    %c0_34 = arith.constant 0 : index
    %c0_35 = arith.constant 0 : index
    %65 = vector.load %arg36[%c0_34, %c0_35] : memref<8x1xf32, #tpu.memory_space<vmem>>, vector<8x1xf32>
    %66 = arith.mulf %61, %65 : vector<8x1xf32>
    %cst_36 = arith.constant dense<0.000000e+00> : vector<8xf32>
    %67 = vector.multi_reduction <add>, %64, %cst_36 [1] : vector<8x8xf32> to vector<8xf32>
    %68 = vector.shape_cast %67 : vector<8xf32> to vector<8x1xf32>
    %69 = arith.addf %66, %68 : vector<8x1xf32>
    %c0_37 = arith.constant 0 : index
    %c0_38 = arith.constant 0 : index
    %70 = vector.load %arg36[%c0_37, %c0_38] : memref<8x1xf32, #tpu.memory_space<vmem>>, vector<8x1xf32>
    tpu.vector_store %arg36[%c0_37, %c0_38], %69 {strides = array<i32>} : memref<8x1xf32, #tpu.memory_space<vmem>>, vector<8x1xf32>,
    %c0_39 = arith.constant 0 : index
    %c0_40 = arith.constant 0 : index
    %71 = vector.load %arg37[%c0_39, %c0_40] : memref<8x64xf32, #tpu.memory_space<vmem>>, vector<8x64xf32>
    %72 = vector.broadcast %61 : vector<8x1xf32> to vector<8x64xf32>
    %73 = arith.mulf %72, %71 : vector<8x64xf32>
    %74 = arith.truncf %64 : vector<8x8xf32> to vector<8x8xbf16>
    %75 = arith.truncf %48 : vector<8x64xf32> to vector<8x64xbf16>
    %cst_41 = arith.constant dense<0.000000e+00> : vector<8x64xf32>
    %76 = tpu.matmul %74, %75, %cst_41 {dimension_numbers = #tpu.dot_dimension_numbers<[1], [0], [0], [1], [0, 0, 1, 1], [], []>} : vector<8x8xbf16>, vector<8x64xbf16>, vector<8x64xf32> -> vector<8x64xf32>
    %77 = arith.addf %73, %76 : vector<8x64xf32>
    %c0_42 = arith.constant 0 : index
    %c0_43 = arith.constant 0 : index
    %78 = vector.load %arg37[%c0_42, %c0_43] : memref<8x64xf32, #tpu.memory_space<vmem>>, vector<8x64xf32>
    tpu.vector_store %arg37[%c0_42, %c0_43], %77 {strides = array<i32>} : memref<8x64xf32, #tpu.memory_space<vmem>>, vector<8x64xf32>,
    %c0_44 = arith.constant 0 : index
    %c0_45 = arith.constant 0 : index
    %79 = vector.load %arg35[%c0_44, %c0_45] : memref<8x1xf32, #tpu.memory_space<vmem>>, vector<8x1xf32>
    tpu.vector_store %arg35[%c0_44, %c0_45], %58 {strides = array<i32>} : memref<8x1xf32, #tpu.memory_space<vmem>>, vector<8x1xf32>,
    %c0_i32_46 = arith.constant 0 : i32
    %80 = arith.cmpi eq, %arg2, %c0_i32_46 : i32
    %81 = arith.extui %80 : i1 to i32
    %c0_i32_47 = arith.constant 0 : i32
    %82 = arith.cmpi ne, %81, %c0_i32_47 : i32
    scf.if %82 {
      %c0_48 = arith.constant 0 : index
      %c0_49 = arith.constant 0 : index
      %c0_50 = arith.constant 0 : index
      %83 = vector.load %arg3[%c0_48, %c0_49, %c0_50] : memref<1x8x32xbf16, #tpu.memory_space<vmem>>, vector<1x8x32xbf16>
      %84 = vector.shape_cast %83 : vector<1x8x32xbf16> to vector<8x32xbf16>
      %85 = arith.extf %84 : vector<8x32xbf16> to vector<8x32xf32>
      %c0_51 = arith.constant 0 : index
      %c0_52 = arith.constant 0 : index
      %c0_53 = arith.constant 0 : index
      %86 = vector.load %arg4[%c0_51, %c0_52, %c0_53] : memref<1x8x32xbf16, #tpu.memory_space<vmem>>, vector<1x8x32xbf16>
      %87 = vector.shape_cast %86 : vector<1x8x32xbf16> to vector<8x32xbf16>
      %88 = arith.extf %87 : vector<8x32xbf16> to vector<8x32xf32>
      %c0_54 = arith.constant 0 : index
      %c0_55 = arith.constant 0 : index
      %89 = vector.load %arg8[%c0_54, %c0_55] : memref<1x32xf32, #tpu.memory_space<vmem>>, vector<1x32xf32>
      %90 = vector.broadcast %89 : vector<1x32xf32> to vector<8x32xf32>
      %91 = arith.mulf %85, %90 : vector<8x32xf32>
      %92 = arith.addf %88, %91 : vector<8x32xf32>
      %93 = arith.negf %92 : vector<8x32xf32>
      %94 = math.exp %93 : vector<8x32xf32>
      %cst_56 = arith.constant 1.000000e+00 : f32
      %95 = vector.broadcast %cst_56 : f32 to vector<8x32xf32>
      %96 = arith.addf %95, %94 : vector<8x32xf32>
      %97 = arith.divf %95, %96 : vector<8x32xf32>
      %98 = arith.mulf %92, %97 : vector<8x32xf32>
      %c0_57 = arith.constant 0 : index
      %c0_58 = arith.constant 0 : index
      %99 = vector.load %arg11[%c0_57, %c0_58] : memref<32x32xbf16, #tpu.memory_space<vmem>>, vector<32x32xbf16>
      %100 = arith.truncf %98 : vector<8x32xf32> to vector<8x32xbf16>
      %cst_59 = arith.constant dense<0.000000e+00> : vector<8x32xf32>
      %101 = tpu.matmul %100, %99, %cst_59 {dimension_numbers = #tpu.dot_dimension_numbers<[1], [0], [0], [1], [0, 0, 1, 1], [], []>} : vector<8x32xbf16>, vector<32x32xbf16>, vector<8x32xf32> -> vector<8x32xf32>
      %c0_60 = arith.constant 0 : index
      %c0_61 = arith.constant 0 : index
      %102 = vector.load %arg12[%c0_60, %c0_61] : memref<1x32xf32, #tpu.memory_space<vmem>>, vector<1x32xf32>
      %103 = vector.broadcast %102 : vector<1x32xf32> to vector<8x32xf32>
      %104 = arith.addf %101, %103 : vector<8x32xf32>
      %105 = arith.negf %104 : vector<8x32xf32>
      %106 = math.exp %105 : vector<8x32xf32>
      %cst_62 = arith.constant 1.000000e+00 : f32
      %107 = vector.broadcast %cst_62 : f32 to vector<8x32xf32>
      %108 = arith.addf %107, %106 : vector<8x32xf32>
      %109 = arith.divf %107, %108 : vector<8x32xf32>
      %c0_63 = arith.constant 0 : index
      %c0_64 = arith.constant 0 : index
      %110 = vector.load %arg15[%c0_63, %c0_64] : memref<32x64xbf16, #tpu.memory_space<vmem>>, vector<32x64xbf16>
      %111 = arith.truncf %98 : vector<8x32xf32> to vector<8x32xbf16>
      %cst_65 = arith.constant dense<0.000000e+00> : vector<8x64xf32>
      %112 = tpu.matmul %111, %110, %cst_65 {dimension_numbers = #tpu.dot_dimension_numbers<[1], [0], [0], [1], [0, 0, 1, 1], [], []>} : vector<8x32xbf16>, vector<32x64xbf16>, vector<8x64xf32> -> vector<8x64xf32>
      %c0_66 = arith.constant 0 : index
      %c0_67 = arith.constant 0 : index
      %113 = vector.load %arg16[%c0_66, %c0_67] : memref<1x64xf32, #tpu.memory_space<vmem>>, vector<1x64xf32>
      %114 = vector.broadcast %113 : vector<1x64xf32> to vector<8x64xf32>
      %115 = arith.addf %112, %114 : vector<8x64xf32>
      %116 = arith.negf %115 : vector<8x64xf32>
      %117 = math.exp %116 : vector<8x64xf32>
      %cst_68 = arith.constant 1.000000e+00 : f32
      %118 = vector.broadcast %cst_68 : f32 to vector<8x64xf32>
      %119 = arith.addf %118, %117 : vector<8x64xf32>
      %120 = arith.divf %118, %119 : vector<8x64xf32>
      %121 = arith.mulf %115, %120 : vector<8x64xf32>
      %c0_69 = arith.constant 0 : index
      %c0_70 = arith.constant 0 : index
      %122 = vector.load %arg17[%c0_69, %c0_70] : memref<32x32xbf16, #tpu.memory_space<vmem>>, vector<32x32xbf16>
      %123 = arith.truncf %98 : vector<8x32xf32> to vector<8x32xbf16>
      %cst_71 = arith.constant dense<0.000000e+00> : vector<8x32xf32>
      %124 = tpu.matmul %123, %122, %cst_71 {dimension_numbers = #tpu.dot_dimension_numbers<[1], [0], [0], [1], [0, 0, 1, 1], [], []>} : vector<8x32xbf16>, vector<32x32xbf16>, vector<8x32xf32> -> vector<8x32xf32>
      %c0_72 = arith.constant 0 : index
      %c0_73 = arith.constant 0 : index
      %125 = vector.load %arg18[%c0_72, %c0_73] : memref<1x32xf32, #tpu.memory_space<vmem>>, vector<1x32xf32>
      %126 = vector.broadcast %125 : vector<1x32xf32> to vector<8x32xf32>
      %127 = arith.addf %124, %126 : vector<8x32xf32>
      %c0_74 = arith.constant 0 : index
      %c0_75 = arith.constant 0 : index
      %128 = vector.load %arg37[%c0_74, %c0_75] : memref<8x64xf32, #tpu.memory_space<vmem>>, vector<8x64xf32>
      %c0_76 = arith.constant 0 : index
      %c0_77 = arith.constant 0 : index
      %129 = vector.load %arg36[%c0_76, %c0_77] : memref<8x1xf32, #tpu.memory_space<vmem>>, vector<8x1xf32>
      %130 = tpu.reciprocal %129 {approx = true} : vector<8x1xf32> -> vector<8x1xf32>
      %131 = vector.broadcast %130 : vector<8x1xf32> to vector<8x64xf32>
      %132 = arith.mulf %128, %131 : vector<8x64xf32>
      %133 = arith.mulf %132, %121 : vector<8x64xf32>
      %c0_78 = arith.constant 0 : index
      %c0_79 = arith.constant 0 : index
      %134 = vector.load %arg23[%c0_78, %c0_79] : memref<64x32xbf16, #tpu.memory_space<vmem>>, vector<64x32xbf16>
      %135 = arith.truncf %133 : vector<8x64xf32> to vector<8x64xbf16>
      %cst_80 = arith.constant dense<0.000000e+00> : vector<8x32xf32>
      %136 = tpu.matmul %135, %134, %cst_80 {dimension_numbers = #tpu.dot_dimension_numbers<[1], [0], [0], [1], [0, 0, 1, 1], [], []>} : vector<8x64xbf16>, vector<64x32xbf16>, vector<8x32xf32> -> vector<8x32xf32>
      %c0_81 = arith.constant 0 : index
      %c0_82 = arith.constant 0 : index
      %137 = vector.load %arg24[%c0_81, %c0_82] : memref<1x32xf32, #tpu.memory_space<vmem>>, vector<1x32xf32>
      %138 = vector.broadcast %137 : vector<1x32xf32> to vector<8x32xf32>
      %139 = arith.addf %136, %138 : vector<8x32xf32>
      %140 = arith.addf %127, %139 : vector<8x32xf32>
      %141 = arith.negf %140 : vector<8x32xf32>
      %142 = math.exp %141 : vector<8x32xf32>
      %cst_83 = arith.constant 1.000000e+00 : f32
      %143 = vector.broadcast %cst_83 : f32 to vector<8x32xf32>
      %144 = arith.addf %143, %142 : vector<8x32xf32>
      %145 = arith.divf %143, %144 : vector<8x32xf32>
      %146 = arith.mulf %140, %145 : vector<8x32xf32>
      %147 = arith.subf %146, %85 : vector<8x32xf32>
      %148 = arith.mulf %109, %147 : vector<8x32xf32>
      %149 = arith.addf %85, %148 : vector<8x32xf32>
      %c0_84 = arith.constant 0 : index
      %c0_85 = arith.constant 0 : index
      %150 = vector.load %arg25[%c0_84, %c0_85] : memref<1x32xf32, #tpu.memory_space<vmem>>, vector<1x32xf32>
      %c0_86 = arith.constant 0 : index
      %c0_87 = arith.constant 0 : index
      %151 = vector.load %arg26[%c0_86, %c0_87] : memref<1x32xf32, #tpu.memory_space<vmem>>, vector<1x32xf32>
      %cst_88 = arith.constant dense<0.000000e+00> : vector<8xf32>
      %152 = vector.multi_reduction <add>, %149, %cst_88 [1] : vector<8x32xf32> to vector<8xf32>
      %153 = vector.shape_cast %152 : vector<8xf32> to vector<8x1xf32>
      %cst_89 = arith.constant 3.200000e+01 : f32
      %154 = vector.broadcast %cst_89 : f32 to vector<8x1xf32>
      %155 = arith.divf %153, %154 : vector<8x1xf32>
      %156 = vector.broadcast %155 : vector<8x1xf32> to vector<8x32xf32>
      %157 = arith.subf %149, %156 : vector<8x32xf32>
      %158 = arith.mulf %157, %157 : vector<8x32xf32>
      %cst_90 = arith.constant dense<0.000000e+00> : vector<8xf32>
      %159 = vector.multi_reduction <add>, %158, %cst_90 [1] : vector<8x32xf32> to vector<8xf32>
      %160 = vector.shape_cast %159 : vector<8xf32> to vector<8x1xf32>
      %cst_91 = arith.constant 3.200000e+01 : f32
      %161 = vector.broadcast %cst_91 : f32 to vector<8x1xf32>
      %162 = arith.divf %160, %161 : vector<8x1xf32>
      %cst_92 = arith.constant 9.99999974E-6 : f32
      %163 = vector.broadcast %cst_92 : f32 to vector<8x1xf32>
      %164 = arith.addf %162, %163 : vector<8x1xf32>
      %165 = math.rsqrt %164 : vector<8x1xf32>
      %166 = vector.broadcast %165 : vector<8x1xf32> to vector<8x32xf32>
      %167 = arith.mulf %157, %166 : vector<8x32xf32>
      %168 = vector.broadcast %150 : vector<1x32xf32> to vector<8x32xf32>
      %169 = arith.mulf %167, %168 : vector<8x32xf32>
      %170 = vector.broadcast %151 : vector<1x32xf32> to vector<8x32xf32>
      %171 = arith.addf %169, %170 : vector<8x32xf32>
      %c0_93 = arith.constant 0 : index
      %c0_94 = arith.constant 0 : index
      %172 = vector.load %arg27[%c0_93, %c0_94] : memref<32x64xbf16, #tpu.memory_space<vmem>>, vector<32x64xbf16>
      %173 = arith.truncf %171 : vector<8x32xf32> to vector<8x32xbf16>
      %cst_95 = arith.constant dense<0.000000e+00> : vector<8x64xf32>
      %174 = tpu.matmul %173, %172, %cst_95 {dimension_numbers = #tpu.dot_dimension_numbers<[1], [0], [0], [1], [0, 0, 1, 1], [], []>} : vector<8x32xbf16>, vector<32x64xbf16>, vector<8x64xf32> -> vector<8x64xf32>
      %c0_96 = arith.constant 0 : index
      %c0_97 = arith.constant 0 : index
      %175 = vector.load %arg28[%c0_96, %c0_97] : memref<1x64xf32, #tpu.memory_space<vmem>>, vector<1x64xf32>
      %176 = vector.broadcast %175 : vector<1x64xf32> to vector<8x64xf32>
      %177 = arith.addf %174, %176 : vector<8x64xf32>
      %178 = arith.negf %177 : vector<8x64xf32>
      %179 = math.exp %178 : vector<8x64xf32>
      %cst_98 = arith.constant 1.000000e+00 : f32
      %180 = vector.broadcast %cst_98 : f32 to vector<8x64xf32>
      %181 = arith.addf %180, %179 : vector<8x64xf32>
      %182 = arith.divf %180, %181 : vector<8x64xf32>
      %183 = arith.mulf %177, %182 : vector<8x64xf32>
      %c0_99 = arith.constant 0 : index
      %c0_100 = arith.constant 0 : index
      %184 = vector.load %arg29[%c0_99, %c0_100] : memref<64x32xbf16, #tpu.memory_space<vmem>>, vector<64x32xbf16>
      %185 = arith.truncf %183 : vector<8x64xf32> to vector<8x64xbf16>
      %cst_101 = arith.constant dense<0.000000e+00> : vector<8x32xf32>
      %186 = tpu.matmul %185, %184, %cst_101 {dimension_numbers = #tpu.dot_dimension_numbers<[1], [0], [0], [1], [0, 0, 1, 1], [], []>} : vector<8x64xbf16>, vector<64x32xbf16>, vector<8x32xf32> -> vector<8x32xf32>
      %c0_102 = arith.constant 0 : index
      %c0_103 = arith.constant 0 : index
      %187 = vector.load %arg30[%c0_102, %c0_103] : memref<1x32xf32, #tpu.memory_space<vmem>>, vector<1x32xf32>
      %188 = vector.broadcast %187 : vector<1x32xf32> to vector<8x32xf32>
      %189 = arith.addf %186, %188 : vector<8x32xf32>
      %190 = arith.addf %189, %171 : vector<8x32xf32>
      %c0_104 = arith.constant 0 : index
      %c0_105 = arith.constant 0 : index
      %191 = vector.load %arg31[%c0_104, %c0_105] : memref<1x32xf32, #tpu.memory_space<vmem>>, vector<1x32xf32>
      %c0_106 = arith.constant 0 : index
      %c0_107 = arith.constant 0 : index
      %192 = vector.load %arg32[%c0_106, %c0_107] : memref<1x32xf32, #tpu.memory_space<vmem>>, vector<1x32xf32>
      %cst_108 = arith.constant dense<0.000000e+00> : vector<8xf32>
      %193 = vector.multi_reduction <add>, %190, %cst_108 [1] : vector<8x32xf32> to vector<8xf32>
      %194 = vector.shape_cast %193 : vector<8xf32> to vector<8x1xf32>
      %cst_109 = arith.constant 3.200000e+01 : f32
      %195 = vector.broadcast %cst_109 : f32 to vector<8x1xf32>
      %196 = arith.divf %194, %195 : vector<8x1xf32>
      %197 = vector.broadcast %196 : vector<8x1xf32> to vector<8x32xf32>
      %198 = arith.subf %190, %197 : vector<8x32xf32>
      %199 = arith.mulf %198, %198 : vector<8x32xf32>
      %cst_110 = arith.constant dense<0.000000e+00> : vector<8xf32>
      %200 = vector.multi_reduction <add>, %199, %cst_110 [1] : vector<8x32xf32> to vector<8xf32>
      %201 = vector.shape_cast %200 : vector<8xf32> to vector<8x1xf32>
      %cst_111 = arith.constant 3.200000e+01 : f32
      %202 = vector.broadcast %cst_111 : f32 to vector<8x1xf32>
      %203 = arith.divf %201, %202 : vector<8x1xf32>
      %cst_112 = arith.constant 9.99999974E-6 : f32
      %204 = vector.broadcast %cst_112 : f32 to vector<8x1xf32>
      %205 = arith.addf %203, %204 : vector<8x1xf32>
      %206 = math.rsqrt %205 : vector<8x1xf32>
      %207 = vector.broadcast %206 : vector<8x1xf32> to vector<8x32xf32>
      %208 = arith.mulf %198, %207 : vector<8x32xf32>
      %209 = vector.broadcast %191 : vector<1x32xf32> to vector<8x32xf32>
      %210 = arith.mulf %208, %209 : vector<8x32xf32>
      %211 = vector.broadcast %192 : vector<1x32xf32> to vector<8x32xf32>
      %212 = arith.addf %210, %211 : vector<8x32xf32>
      %213 = arith.truncf %212 : vector<8x32xf32> to vector<8x32xbf16>
      %c0_113 = arith.constant 0 : index
      %c0_114 = arith.constant 0 : index
      %c0_115 = arith.constant 0 : index
      %214 = vector.load %arg33[%c0_113, %c0_114, %c0_115] : memref<1x8x32xbf16, #tpu.memory_space<vmem>>, vector<1x8x32xbf16>
      %215 = vector.shape_cast %214 : vector<1x8x32xbf16> to vector<8x32xbf16>
      %216 = vector.shape_cast %213 : vector<8x32xbf16> to vector<1x8x32xbf16>
      tpu.vector_store %arg33[%c0_113, %c0_114, %c0_115], %216 {strides = array<i32>} : memref<1x8x32xbf16, #tpu.memory_space<vmem>>, vector<1x8x32xbf16>,
    } else {
    }
    return
  }
  func.func @transform_0(%arg0: i32, %arg1: i32, %arg2: i32) -> (i32, i32, i32) {
    %c0_i32 = arith.constant 0 : i32
    %c0_i32_0 = arith.constant 0 : i32
    return %arg0, %arg1, %c0_i32 : i32, i32, i32
  }
  func.func @transform_1(%arg0: i32, %arg1: i32, %arg2: i32) -> (i32, i32, i32) {
    %c0_i32 = arith.constant 0 : i32
    %c0_i32_0 = arith.constant 0 : i32
    return %arg0, %arg1, %c0_i32 : i32, i32, i32
  }
  func.func @transform_2(%arg0: i32, %arg1: i32, %arg2: i32) -> (i32, i32, i32) {
    %c0_i32 = arith.constant 0 : i32
    %c0_i32_0 = arith.constant 0 : i32
    return %arg0, %arg2, %c0_i32 : i32, i32, i32
  }
  func.func @transform_3(%arg0: i32, %arg1: i32, %arg2: i32) -> (i32, i32, i32) {
    %c0_i32 = arith.constant 0 : i32
    %c0_i32_0 = arith.constant 0 : i32
    return %arg0, %arg2, %c0_i32 : i32, i32, i32
  }
  func.func @transform_4(%arg0: i32, %arg1: i32, %arg2: i32) -> (i32, i32) {
    %c0_i32 = arith.constant 0 : i32
    return %arg1, %arg2 : i32, i32
  }
  func.func @transform_5(%arg0: i32, %arg1: i32, %arg2: i32) -> (i32, i32) {
    %c0_i32 = arith.constant 0 : i32
    %c0_i32_0 = arith.constant 0 : i32
    %c0_i32_1 = arith.constant 0 : i32
    return %c0_i32, %c0_i32_0 : i32, i32
  }
  func.func @transform_6(%arg0: i32, %arg1: i32, %arg2: i32) -> (i32, i32) {
    %c0_i32 = arith.constant 0 : i32
    %c0_i32_0 = arith.constant 0 : i32
    %c0_i32_1 = arith.constant 0 : i32
    return %c0_i32, %c0_i32_0 : i32, i32
  }
  func.func @transform_7(%arg0: i32, %arg1: i32, %arg2: i32) -> (i32, i32) {
    %c0_i32 = arith.constant 0 : i32
    %c0_i32_0 = arith.constant 0 : i32
    %c0_i32_1 = arith.constant 0 : i32
    return %c0_i32, %c0_i32_0 : i32, i32
  }
  func.func @transform_8(%arg0: i32, %arg1: i32, %arg2: i32) -> (i32, i32) {
    %c0_i32 = arith.constant 0 : i32
    %c0_i32_0 = arith.constant 0 : i32
    %c0_i32_1 = arith.constant 0 : i32
    return %c0_i32, %c0_i32_0 : i32, i32
  }
  func.func @transform_9(%arg0: i32, %arg1: i32, %arg2: i32) -> (i32, i32) {
    %c0_i32 = arith.constant 0 : i32
    %c0_i32_0 = arith.constant 0 : i32
    %c0_i32_1 = arith.constant 0 : i32
    return %c0_i32, %c0_i32_0 : i32, i32
  }
  func.func @transform_10(%arg0: i32, %arg1: i32, %arg2: i32) -> (i32, i32) {
    %c0_i32 = arith.constant 0 : i32
    %c0_i32_0 = arith.constant 0 : i32
    %c0_i32_1 = arith.constant 0 : i32
    return %c0_i32, %c0_i32_0 : i32, i32
  }
  func.func @transform_11(%arg0: i32, %arg1: i32, %arg2: i32) -> (i32, i32) {
    %c0_i32 = arith.constant 0 : i32
    %c0_i32_0 = arith.constant 0 : i32
    %c0_i32_1 = arith.constant 0 : i32
    return %c0_i32, %c0_i32_0 : i32, i32
  }
  func.func @transform_12(%arg0: i32, %arg1: i32, %arg2: i32) -> (i32, i32) {
    %c0_i32 = arith.constant 0 : i32
    %c0_i32_0 = arith.constant 0 : i32
    %c0_i32_1 = arith.constant 0 : i32
    return %c0_i32, %c0_i32_0 : i32, i32
  }
  func.func @transform_13(%arg0: i32, %arg1: i32, %arg2: i32) -> (i32, i32) {
    %c0_i32 = arith.constant 0 : i32
    %c0_i32_0 = arith.constant 0 : i32
    %c0_i32_1 = arith.constant 0 : i32
    return %c0_i32, %c0_i32_0 : i32, i32
  }
  func.func @transform_14(%arg0: i32, %arg1: i32, %arg2: i32) -> (i32, i32) {
    %c0_i32 = arith.constant 0 : i32
    %c0_i32_0 = arith.constant 0 : i32
    %c0_i32_1 = arith.constant 0 : i32
    return %c0_i32, %c0_i32_0 : i32, i32
  }
  func.func @transform_15(%arg0: i32, %arg1: i32, %arg2: i32) -> (i32, i32) {
    %c0_i32 = arith.constant 0 : i32
    %c0_i32_0 = arith.constant 0 : i32
    %c0_i32_1 = arith.constant 0 : i32
    return %c0_i32, %c0_i32_0 : i32, i32
  }
  func.func @transform_16(%arg0: i32, %arg1: i32, %arg2: i32) -> (i32, i32) {
    %c0_i32 = arith.constant 0 : i32
    %c0_i32_0 = arith.constant 0 : i32
    %c0_i32_1 = arith.constant 0 : i32
    return %c0_i32, %c0_i32_0 : i32, i32
  }
  func.func @transform_17(%arg0: i32, %arg1: i32, %arg2: i32) -> (i32, i32) {
    %c0_i32 = arith.constant 0 : i32
    %c0_i32_0 = arith.constant 0 : i32
    %c0_i32_1 = arith.constant 0 : i32
    return %c0_i32, %c0_i32_0 : i32, i32
  }
  func.func @transform_18(%arg0: i32, %arg1: i32, %arg2: i32) -> (i32, i32) {
    %c0_i32 = arith.constant 0 : i32
    %c0_i32_0 = arith.constant 0 : i32
    %c0_i32_1 = arith.constant 0 : i32
    return %c0_i32, %c0_i32_0 : i32, i32
  }
  func.func @transform_19(%arg0: i32, %arg1: i32, %arg2: i32) -> (i32, i32) {
    %c0_i32 = arith.constant 0 : i32
    %c0_i32_0 = arith.constant 0 : i32
    %c0_i32_1 = arith.constant 0 : i32
    return %c0_i32, %c0_i32_0 : i32, i32
  }
  func.func @transform_20(%arg0: i32, %arg1: i32, %arg2: i32) -> (i32, i32) {
    %c0_i32 = arith.constant 0 : i32
    %c0_i32_0 = arith.constant 0 : i32
    %c0_i32_1 = arith.constant 0 : i32
    return %c0_i32, %c0_i32_0 : i32, i32
  }
  func.func @transform_21(%arg0: i32, %arg1: i32, %arg2: i32) -> (i32, i32) {
    %c0_i32 = arith.constant 0 : i32
    %c0_i32_0 = arith.constant 0 : i32
    %c0_i32_1 = arith.constant 0 : i32
    return %c0_i32, %c0_i32_0 : i32, i32
  }
  func.func @transform_22(%arg0: i32, %arg1: i32, %arg2: i32) -> (i32, i32) {
    %c0_i32 = arith.constant 0 : i32
    %c0_i32_0 = arith.constant 0 : i32
    %c0_i32_1 = arith.constant 0 : i32
    return %c0_i32, %c0_i32_0 : i32, i32
  }
  func.func @transform_23(%arg0: i32, %arg1: i32, %arg2: i32) -> (i32, i32) {
    %c0_i32 = arith.constant 0 : i32
    %c0_i32_0 = arith.constant 0 : i32
    %c0_i32_1 = arith.constant 0 : i32
    return %c0_i32, %c0_i32_0 : i32, i32
  }
  func.func @transform_24(%arg0: i32, %arg1: i32, %arg2: i32) -> (i32, i32) {
    %c0_i32 = arith.constant 0 : i32
    %c0_i32_0 = arith.constant 0 : i32
    %c0_i32_1 = arith.constant 0 : i32
    return %c0_i32, %c0_i32_0 : i32, i32
  }
  func.func @transform_25(%arg0: i32, %arg1: i32, %arg2: i32) -> (i32, i32) {
    %c0_i32 = arith.constant 0 : i32
    %c0_i32_0 = arith.constant 0 : i32
    %c0_i32_1 = arith.constant 0 : i32
    return %c0_i32, %c0_i32_0 : i32, i32
  }
  func.func @transform_26(%arg0: i32, %arg1: i32, %arg2: i32) -> (i32, i32) {
    %c0_i32 = arith.constant 0 : i32
    %c0_i32_0 = arith.constant 0 : i32
    %c0_i32_1 = arith.constant 0 : i32
    return %c0_i32, %c0_i32_0 : i32, i32
  }
  func.func @transform_27(%arg0: i32, %arg1: i32, %arg2: i32) -> (i32, i32) {
    %c0_i32 = arith.constant 0 : i32
    %c0_i32_0 = arith.constant 0 : i32
    %c0_i32_1 = arith.constant 0 : i32
    return %c0_i32, %c0_i32_0 : i32, i32
  }
  func.func @transform_28(%arg0: i32, %arg1: i32, %arg2: i32) -> (i32, i32) {
    %c0_i32 = arith.constant 0 : i32
    %c0_i32_0 = arith.constant 0 : i32
    %c0_i32_1 = arith.constant 0 : i32
    return %c0_i32, %c0_i32_0 : i32, i32
  }
  func.func @transform_29(%arg0: i32, %arg1: i32, %arg2: i32) -> (i32, i32) {
    %c0_i32 = arith.constant 0 : i32
    %c0_i32_0 = arith.constant 0 : i32
    %c0_i32_1 = arith.constant 0 : i32
    return %c0_i32, %c0_i32_0 : i32, i32
  }
  func.func @transform_30(%arg0: i32, %arg1: i32, %arg2: i32) -> (i32, i32, i32) {
    %c0_i32 = arith.constant 0 : i32
    %c0_i32_0 = arith.constant 0 : i32
    return %arg0, %arg1, %c0_i32 : i32, i32, i32
  }
}

</mosaic_0001>

<bundles_post_ra>
// kernel: reverse.5
= control target key start
LH: loop header
LB: loop body
LE: loop exit
PB: predicated region body
PF: predicated region fallthrough
CT: control target
= control target key end

     0   :  { %v56_v3 = vlaneseq  ;;  %v62_v5 = vld [vmem:[#allocation0 + $0x7] ss:$-1 sm:$0xff]  ;;  %v90_v6 = vld [vmem:[#allocation0 + $0x1f] ss:$-1 sm:$0xff]  ;;  %s202_s0 = inlined_call_operand.vmem [shape: f32[2,32,15], index: 0, kind: input, shape index: {}]   ;;  %s203_s1 = inlined_call_operand.vmem [shape: f32[2,32,15], index: 1, kind: output, shape index: {}]  }
   0x1   :  { %v36_v0 = vld [vmem:[%s202_s0] sm:$0xff]  ;;  %v38_v1 = vld [vmem:[%s202_s0 + $0x8] sm:$0xff]  ;;  %v40_v2 = vld [vmem:[%s202_s0 + $0x10] sm:$0xff]  ;;  %v63_v7 = vrot.slane %v62_v5, 1  ;;  %v91_v8 = vrot.slane %v90_v6, 1 }
   0x2   :  { %37 = vst [vmem:[#allocation0 + $0x8] sm:$0xff] %v36_v0  ;;  %39 = vst [vmem:[#allocation0 + $0x10] sm:$0xff] %v38_v1  ;;  %v42_v4 = vld [vmem:[%s202_s0 + $0x18] sm:$0xff]  ;;  %v57_v9 = vshrl.u32 %v56_v3, 7 }
   0x3   :  { %41 = vst [vmem:[#allocation0 + $0x20] sm:$0xff] %v40_v2  ;;  %43 = vst [vmem:[#allocation0 + $0x28] sm:$0xff] %v42_v4 }
   0x4   :  { %64 = vst [vmem:[#allocation1 + $0x8] sm:$0xff] %v63_v7  ;;  %92 = vst [vmem:[#allocation1 + $0x18] sm:$0xff] %v91_v8  ;;  %vm58_vm0 = vcmp.lt.s32.totalorder %v57_v9, 7 }
   0x9   :  { %v49_v10 = vld [vmem:[#allocation0 + $0xf] ss:$-1 sm:$0xff]  ;;  %v54_v11 = vld [vmem:[#allocation0 + $0x17] ss:$-1 sm:$0xff] }
   0xa   :  { %v67_v12 = vld [vmem:[#allocation0 + $0xf] ss:$-1 sm:$0xff]  ;;  %v50_v13 = vrot.slane %v49_v10, 1  ;;  %v55_v14 = vrot.slane %v54_v11, 1  ;;  %v77_v16 = vld [vmem:[#allocation0 + $0x27] ss:$-1 sm:$0xff] }
   0xb   :  { %v68_v15 = vrot.slane %v67_v12, 1  ;;  %v78_v17 = vrot.slane %v77_v16, 1  ;;  %v82_v18 = vld [vmem:[#allocation0 + $0x2f] ss:$-1 sm:$0xff]  ;;  %v95_v19 = vld [vmem:[#allocation0 + $0x27] ss:$-1 sm:$0xff] }
   0xc   :  { %51 = vst [vmem:[#allocation1] sm:$0xff] %v50_v13  ;;  %v83_v20 = vrot.slane %v82_v18, 1  ;;  %v96_v21 = vrot.slane %v95_v19, 1 }
   0xd   :  { %72 = vst.msk [vmem:[#allocation1 + $0x8] sm:$0xff] %vm58_vm0, %v68_v15  ;;  %59 = vst.msk [vmem:[#allocation1] sm:$0xff] %vm58_vm0, %v55_v14 }
   0xe   :  { %79 = vst [vmem:[#allocation1 + $0x10] sm:$0xff] %v78_v17  ;;  %100 = vst.msk [vmem:[#allocation1 + $0x18] sm:$0xff] %vm58_vm0, %v96_v21 }
   0xf   :  { %87 = vst.msk [vmem:[#allocation1 + $0x10] sm:$0xff] %vm58_vm0, %v83_v20 }
  0x14   :  { %v136_v22 = vld [vmem:[#allocation1 + $0x8] sm:$0xff]  ;;  %v134_v23 = vld [vmem:[#allocation1] sm:$0xff] }
  0x15   :  { %137 = vst [vmem:[%s203_s1 + $0x8] sm:$0xff] %v136_v22  ;;  %135 = vst [vmem:[%s203_s1] sm:$0xff] %v134_v23  ;;  %v140_v25 = vld [vmem:[#allocation1 + $0x18] sm:$0xff] }
  0x16   :  { %v138_v24 = vld [vmem:[#allocation1 + $0x10] sm:$0xff]  ;;  %141 = vst [vmem:[%s203_s1 + $0x18] sm:$0xff] %v140_v25 }
  0x17   :  { %139 = vst [vmem:[%s203_s1 + $0x10] sm:$0xff] %v138_v24 }

// kernel: mega_scraw_encoder_forward.2
= control target key start
LH: loop header
LB: loop body
LE: loop exit
PB: predicated region body
PF: predicated region fallthrough
CT: control target
= control target key end

     0   :  { %s4595_s6 = smov 1   ;;  %s4596_s10 = smov 2   ;;  %s5592_s0 = inlined_call_operand.smem [shape: u32[31], index: -1, kind: input, shape index: {}] }
   0x1   :  { %s4670_s5 = sld [smem:[%s5592_s0]]   ;;  %s4597_s14 = smov 3  }
   0x2   :  { %s4675_s9 = sld [smem:[%s5592_s0 + %s4595_s6]]   ;;  %s4598_s18 = smov 4  }
   0x3   :  { %s4680_s13 = sld [smem:[%s5592_s0 + %s4596_s10]]   ;;  %s4599_s22 = smov 5  }
   0x4   :  { %s4685_s17 = sld [smem:[%s5592_s0 + %s4597_s14]]   ;;  %s4600_s26 = smov 6  }
   0x5   :  { %s4690_s21 = sld [smem:[%s5592_s0 + %s4598_s18]]   ;;  %s4601_s30 = smov 7  }
   0x6   :  { %s4695_s25 = sld [smem:[%s5592_s0 + %s4599_s22]]   ;;  %s4602_s4 = smov 8  }
   0x7   :  { %5650 = sst [smem:[#allocation72_spill]] %s4670_s5  ;;  %s4603_s10 = smov 9  }
   0x8   :  { %5651 = sst [smem:[#allocation73_spill]] %s4675_s9  ;;  %s4604_s15 = smov 10  }
   0x9   :  { %5652 = sst [smem:[#allocation74_spill]] %s4680_s13  ;;  %s4605_s20 = smov 11  }
   0xa   :  { %5653 = sst [smem:[#allocation75_spill]] %s4685_s17  ;;  %s4607_s1 = smov 13  }
   0xb   :  { %5654 = sst [smem:[#allocation76_spill]] %s4690_s21  ;;  %s4608_s7 = smov 14  }
   0xc   :  { %5655 = sst [smem:[#allocation77_spill]] %s4695_s25  ;;  %s4610_s22 = smov 16  }
   0xd   :  { %s4700_s29 = sld [smem:[%s5592_s0 + %s4600_s26]]   ;;  %s4606_s26 = smov 12  }
   0xe   :  { %s4705_s3 = sld [smem:[%s5592_s0 + %s4601_s30]]   ;;  %s4611_s28 = smov 17  }
   0xf   :  { %s4710_s8 = sld [smem:[%s5592_s0 + %s4602_s4]]  }
  0x10   :  { %s4715_s14 = sld [smem:[%s5592_s0 + %s4603_s10]]  }
  0x11   :  { %s4720_s19 = sld [smem:[%s5592_s0 + %s4604_s15]]   ;;  %s4609_s15 = smov 15  }
  0x12   :  { %s4725_s24 = sld [smem:[%s5592_s0 + %s4605_s20]]  }
  0x13   :  { %5656 = sst [smem:[#allocation78_spill]] %s4700_s29 }
  0x14   :  { %5657 = sst [smem:[#allocation79_spill]] %s4705_s3 }
  0x15   :  { %5658 = sst [smem:[#allocation80_spill]] %s4710_s8 }
  0x16   :  { %5659 = sst [smem:[#allocation81_spill]] %s4715_s14 }
  0x17   :  { %5660 = sst [smem:[#allocation82_spill]] %s4720_s19 }
  0x18   :  { %5661 = sst [smem:[#allocation83_spill]] %s4725_s24 }
  0x19   :  { %s4730_s30 = sld [smem:[%s5592_s0 + %s4606_s26]]  }
  0x1a   :  { %s4735_s6 = sld [smem:[%s5592_s0 + %s4607_s1]]  }
  0x1b   :  { %s4740_s12 = sld [smem:[%s5592_s0 + %s4608_s7]]   ;;  %s4612_s7 = smov 18  }
  0x1c   :  { %s4745_s20 = sld [smem:[%s5592_s0 + %s4609_s15]]   ;;  %s4613_s15 = smov 19  }
  0x1d   :  { %s4750_s27 = sld [smem:[%s5592_s0 + %s4610_s22]]   ;;  %s4614_s22 = smov 20  }
  0x1e   :  { %s4755_s4 = sld [smem:[%s5592_s0 + %s4611_s28]]   ;;  %s4615_s28 = smov 21  }
  0x1f   :  { %5662 = sst [smem:[#allocation84_spill]] %s4730_s30 }
  0x20   :  { %5663 = sst [smem:[#allocation85_spill]] %s4735_s6 }
  0x21   :  { %5664 = sst [smem:[#allocation86_spill]] %s4740_s12 }
  0x22   :  { %5665 = sst [smem:[#allocation87_spill]] %s4745_s20 }
  0x23   :  { %5666 = sst [smem:[#allocation88_spill]] %s4750_s27 }
  0x24   :  { %5667 = sst [smem:[#allocation89_spill]] %s4755_s4 }
  0x25   :  { %s4760_s17 = sld [smem:[%s5592_s0 + %s4612_s7]]   ;;  %s4616_s7 = smov 22  }
  0x26   :  { %s4765_s13 = sld [smem:[%s5592_s0 + %s4613_s15]]   ;;  %s4617_s15 = smov 23  }
  0x27   :  { %s4770_s5 = sld [smem:[%s5592_s0 + %s4614_s22]]   ;;  %s4618_s22 = smov 24  }
  0x28   :  { %s4775_s27 = sld [smem:[%s5592_s0 + %s4615_s28]]   ;;  %s4619_s28 = smov 25  }
  0x29   :  { %s4785_s12 = sld [smem:[%s5592_s0 + %s4617_s15]]   ;;  %s4621_s15 = smov 27  }
  0x2a   :  { %s4795_s30 = sld [smem:[%s5592_s0 + %s4619_s28]]   ;;  %s4623_s28 = smov 29  }
  0x2b   :  { %5668 = sst [smem:[#allocation90_spill]] %s4760_s17 }
  0x2c   :  { %5669 = sst [smem:[#allocation91_spill]] %s4765_s13 }
  0x2d   :  { %5670 = sst [smem:[#allocation92_spill]] %s4770_s5 }
  0x2e   :  { %5671 = sst [smem:[#allocation93_spill]] %s4775_s27 }
  0x2f   :  { %s4780_s17 = sld [smem:[%s5592_s0 + %s4616_s7]]   ;;  %s4620_s7 = smov 26  }
  0x30   :  { %5673 = sst [smem:[#allocation95_spill]] %s4785_s12 }
  0x31   :  { %s4790_s5 = sld [smem:[%s5592_s0 + %s4618_s22]]   ;;  %s4622_s22 = smov 28  }
  0x32   :  { %5675 = sst [smem:[#allocation97_spill]] %s4795_s30 }
  0x33   :  { %s4805_s19 = sld [smem:[%s5592_s0 + %s4621_s15]]  }
  0x34   :  { %s4815_s8 = sld [smem:[%s5592_s0 + %s4623_s28]]  }
  0x35   :  { %5672 = sst [smem:[#allocation94_spill]] %s4780_s17 }
  0x36   :  { %s4800_s17 = sld [smem:[%s5592_s0 + %s4620_s7]]   ;;  %s4624_s7 = smov 30  }
  0x37   :  { %5674 = sst [smem:[#allocation96_spill]] %s4790_s5 }
  0x38   :  { %s4810_s5 = sld [smem:[%s5592_s0 + %s4622_s22]]  }
  0x39   :  { %5677 = sst [smem:[#allocation99_spill]] %s4805_s19 }
  0x3c   :  { %5676 = sst [smem:[#allocation98_spill]] %s4800_s17 }
  0x3d   :  { %s4820_s17 = sld [smem:[%s5592_s0 + %s4624_s7]]  }
  0x43   :  { %5678 = sst [smem:[#allocation100_spill]] %s4820_s17 }
  0x44   :  { %66 = vsyncpa [#allocation7], 0 }
  0x45   :  { %68 = vsyncpa [#allocation7 + $0x1], 0 }
  0x46   :  { %69 = vsyncpa [#allocation10], 0 }
  0x47   :  { %71 = vsyncpa [#allocation10 + $0x1], 0 }
  0x48   :  { %72 = vsyncpa [#allocation13], 0 }
  0x49   :  { %74 = vsyncpa [#allocation13 + $0x1], 0 }
  0x4a   :  { %75 = vsyncpa [#allocation16], 0 }
  0x4b   :  { %76 = vsyncpa [#allocation19], 0 }
  0x4c   :  { %77 = vsyncpa [#allocation22], 0 }
  0x4d   :  { %78 = vsyncpa [#allocation25], 0 }
  0x4e   :  { %79 = vsyncpa [#allocation28], 0 }
  0x4f   :  { %80 = vsyncpa [#allocation31], 0 }
  0x50   :  { %81 = vsyncpa [#allocation34], 0 }
  0x51   :  { %82 = vsyncpa [#allocation37], 0 }
  0x52   :  { %83 = vsyncpa [#allocation40], 0 }
  0x53   :  { %84 = vsyncpa [#allocation43], 0 }
  0x54   :  { %85 = vsyncpa [#allocation46], 0 }
  0x55   :  { %86 = vsyncpa [#allocation49], 0 }
  0x56   :  { %87 = vsyncpa [#allocation52], 0 }
  0x57   :  { %88 = vsyncpa [#allocation8], 0 }
  0x58   :  { %90 = vsyncpa [#allocation8 + $0x1], 0  ;;  %s4822_s0 = smov 0   ;;  %s4824_s15 = smov 0  }
  0x59   :  { %s4826_s16 = smov 0   ;;  %s4828_s18 = smov 0  }
  0x5a   :  { %s4830_s22 = smov 0   ;;  %s4832_s23 = smov 0  }
  0x5b LB: > { %s5679_s29 = sld [smem:[#allocation78_spill]]  ;;  %s5680_s30 = sld [smem:[#allocation97_spill]]  ;;  %s4581_s16 = sphi %s4826_s16, %s5769_s16   ;;  %s4577_s15 = sphi %s4824_s15, %s5768_s15   ;;  %s4573_s0 = sphi %s4822_s0, %s5767_s0   ;;  %s4593_s23 = sphi %s4832_s23, %s96_s23   ;;  %s4589_s22 = sphi %s4830_s22, %s5771_s22   ;;  %s4585_s18 = sphi %s4828_s18, %s5770_s18  }
  0x5c   : > { %s5681_s9 = sld [smem:[#allocation73_spill]]  ;;  %s5682_s27 = sld [smem:[#allocation93_spill]] }
  0x5d   : > { %s5683_s24 = sld [smem:[#allocation83_spill]]  ;;  %s5684_s20 = sld [smem:[#allocation87_spill]] }
  0x5e   : > { %s5685_s19 = sld [smem:[#allocation99_spill]]  ;;  %s5686_s14 = sld [smem:[#allocation81_spill]] }
  0x5f   : > { %s5687_s13 = sld [smem:[#allocation91_spill]]  ;;  %s5688_s12 = sld [smem:[#allocation95_spill]] }
  0x60   : > { %s5689_s6 = sld [smem:[#allocation85_spill]]  ;;  %s5690_s4 = sld [smem:[#allocation89_spill]] }
  0x61   : > { %s5691_s3 = sld [smem:[#allocation79_spill]]  ;;  %s5692_s25 = sld [smem:[#allocation77_spill]] }
  0x62   : > { %s5693_s21 = sld [smem:[#allocation76_spill]]  ;;  %5694 = sst [smem:[#allocation101_spill]] %s4585_s18 }
  0x63   : > { %s4853_s26 = sadd.s32 4294967295, %s4593_s23   ;;  %p2883_p0 = scmp.ge.s32.totalorder %s4593_s23, 1 }
  0x64   : > { %p5608_p1 = scmp.eq.s32.totalorder %s4853_s26, 0  ;;  %p813_p2 = scmp.lt.s32.totalorder %s4593_s23, 3 }
  0x65   : > { %s4625_s1 = smov [#allocation14]   ;;  %s4626_s7 = smov [#allocation15]  }
  0x66   : > { %p4858_p3 = pnand %p2883_p0, %p813_p2  ;;  %s829_s2 = sshll.u32 %s4625_s1, 4  ;;  %s830_s2 = int_to_ptr.vmem [resolvable:$true] %s829_s2 }
  0x67   : > { %s840_s10 = sshll.u32 %s4626_s7, 4  ;;  %s4627_s17 = smov [#allocation18]   ;;  %s4871_s10 = int_to_ptr.vmem [resolvable:$true] %s840_s10 }
  0x68   : > { %s5695_s28 = scalar_select %p4858_p3, 1, 0 }
  0x69   : > { %p3265_p5 = pneg %p4858_p3  ;;  %s864_s18 = sshll.u32 %s4627_s17, 4  ;;  %s4873_s18 = int_to_ptr.vmem [resolvable:$true] %s864_s18 }
  0x6a   : > { %5696 = sst [smem:[#allocation102_spill]] %s5695_s28  ;;  %s3599_s1 = scalar_lea.hbm %s5693_s21, 128 }
  0x6b   : > { %p4867_p6 = pnand %p3265_p5, %p5608_p1  ;;  %p3600_p7 = scmp.ne.s32.totalorder %s5693_s21, %s3599_s1 }
  0x6c   : > { %p3606_p11 = scmp.lt.u32.totalorder %s3599_s1, %s5693_s21 }
  0x6d   : > { %s5697_s11 = scalar_select %p4867_p6, 1, 0 }
  0x6e   : > { %p4879_p8 = pneg %p4867_p6 }
  0x70   : > { %s5698_s28 = scalar_select %p4879_p8, 1, 0 }
  0x71   : > { %p3602_p9 = pnand %p4879_p8, %p3600_p7 }
  0x73   : > { %p3603_p10 = pneg %p3602_p9 }
  0x75   : > { %p3608_p12 = pnand %p3606_p11, %p3603_p10 }
  0x77   : > { %3611 = shalt.err (!%p3608_p12)
}
  0x78   : > { %s3612_s7 = scalar_lea.vmem %s830_s2, 128  ;;  %p3620_p5 = scmp.lt.s32.totalorder %s830_s2, %s830_s2 }
  0x79   : > { %p3613_p13 = scmp.ne.s32.totalorder %s830_s2, %s3612_s7  ;;  %p3621_p4 = scmp.lt.s32.totalorder %s3612_s7, %s3612_s7 }
  0x7b   : > { %p3615_p0 = pnand %p3613_p13, %p4879_p8  ;;  %p3622_p1 = por %p3621_p4, %p3620_p5 }
  0x7d   : > { %p3616_p2 = pneg %p3615_p0 }
  0x7f   : > { %p3623_p3 = pnand %p3622_p1, %p3616_p2 }
  0x81   : > { %3626 = shalt.err (!%p3623_p3)
}
  0x82   : > { %3268 = dma.hbm_to_vmem [thread:$0]  (!%p4867_p6), %s5693_s21, 128, %s830_s2, [#allocation13]  }
  0x83   : > { %s3627_s17 = scalar_lea.hbm %s5692_s25, 16 }
  0x84   : > { %p3628_p7 = scmp.ne.s32.totalorder %s5692_s25, %s3627_s17  ;;  %p3634_p11 = scmp.lt.u32.totalorder %s3627_s17, %s5692_s25 }
  0x86   : > { %p3630_p9 = pnand %p3628_p7, %p4879_p8 }
  0x88   : > { %p3631_p10 = pneg %p3630_p9 }
  0x8a   : > { %p3636_p12 = pnand %p3634_p11, %p3631_p10 }
  0x8c   : > { %3639 = shalt.err (!%p3636_p12)
}
  0x8d   : > { %s3640_s1 = scalar_lea.vmem %s4871_s10, 16  ;;  %s3647_s7 = scalar_lea.vmem %s4871_s10, 32 }
  0x8e   : > { %p3641_p1 = scmp.ne.s32.totalorder %s4871_s10, %s3640_s1  ;;  %p3648_p13 = scmp.lt.s32.totalorder %s4871_s10, %s4871_s10 }
  0x8f   : > { %p3649_p0 = scmp.lt.s32.totalorder %s3647_s7, %s3640_s1 }
  0x90   : > { %p3643_p3 = pnand %p3641_p1, %p4879_p8 }
  0x91   : > { %p3650_p2 = por %p3649_p0, %p3648_p13 }
  0x92   : > { %p3644_p4 = pneg %p3643_p3 }
  0x94   : > { %p3651_p5 = pnand %p3650_p2, %p3644_p4 }
  0x96   : > { %3654 = shalt.err (!%p3651_p5)
}
  0x97   : > { %3271 = dma.hbm_to_vmem [thread:$0]  (!%p4867_p6), %s5692_s25, 16, %s4871_s10, [#allocation16]  }
  0x98   : > { %s3655_s2 = scalar_lea.hbm %s5691_s3, 16 }
  0x99   : > { %p3656_p7 = scmp.ne.s32.totalorder %s5691_s3, %s3655_s2  ;;  %p3662_p11 = scmp.lt.u32.totalorder %s3655_s2, %s5691_s3 }
  0x9b   : > { %p3658_p9 = pnand %p3656_p7, %p4879_p8 }
  0x9d   : > { %p3659_p10 = pneg %p3658_p9 }
  0x9f   : > { %p3664_p12 = pnand %p3662_p11, %p3659_p10 }
  0xa1   : > { %3667 = shalt.err (!%p3664_p12)
}
  0xa2   : > { %s3668_s17 = scalar_lea.vmem %s4873_s18, 16  ;;  %s3675_s1 = scalar_lea.vmem %s4873_s18, 32 }
  0xa3   : > { %p3669_p1 = scmp.ne.s32.totalorder %s4873_s18, %s3668_s17  ;;  %p3676_p13 = scmp.lt.s32.totalorder %s4873_s18, %s4873_s18 }
  0xa4   : > { %p3677_p0 = scmp.lt.s32.totalorder %s3675_s1, %s3668_s17 }
  0xa5   : > { %p3671_p3 = pnand %p3669_p1, %p4879_p8 }
  0xa6   : > { %p3678_p2 = por %p3677_p0, %p3676_p13 }
  0xa7   : > { %p3672_p4 = pneg %p3671_p3 }
  0xa9   : > { %p3679_p5 = pnand %p3678_p2, %p3672_p4 }
  0xab   : > { %3682 = shalt.err (!%p3679_p5)
}
  0xac   : > { %3277 = dma.hbm_to_vmem [thread:$0]  (!%p4867_p6), %s5691_s3, 16, %s4873_s18, [#allocation19]  }
  0xad   : > { %s4628_s10 = smov [#allocation21]   ;;  %s4629_s2 = smov [#allocation24]  }
  0xae   : > { %s888_s7 = sshll.u32 %s4628_s10, 4  ;;  %s912_s21 = sshll.u32 %s4629_s2, 4  ;;  %s889_s7 = int_to_ptr.vmem [resolvable:$true] %s888_s7  ;;  %s913_s21 = int_to_ptr.vmem [resolvable:$true] %s912_s21 }
  0xaf   : > { %s3683_s25 = scalar_lea.hbm %s5686_s14, 16 }
  0xb0   : > { %p3684_p7 = scmp.ne.s32.totalorder %s5686_s14, %s3683_s25  ;;  %p3690_p11 = scmp.lt.u32.totalorder %s3683_s25, %s5686_s14 }
  0xb2   : > { %p3686_p9 = pnand %p3684_p7, %p4879_p8 }
  0xb4   : > { %p3687_p10 = pneg %p3686_p9 }
  0xb6   : > { %p3692_p12 = pnand %p3690_p11, %p3687_p10 }
  0xb8   : > { %3695 = shalt.err (!%p3692_p12)
}
  0xb9   : > { %s3696_s17 = scalar_lea.vmem %s889_s7, 16  ;;  %s3703_s18 = scalar_lea.vmem %s889_s7, 32 }
  0xba   : > { %p3697_p1 = scmp.ne.s32.totalorder %s889_s7, %s3696_s17  ;;  %p3704_p13 = scmp.lt.s32.totalorder %s889_s7, %s889_s7 }
  0xbb   : > { %p3705_p0 = scmp.lt.s32.totalorder %s3703_s18, %s3696_s17 }
  0xbc   : > { %p3699_p3 = pnand %p3697_p1, %p4879_p8 }
  0xbd   : > { %p3706_p2 = por %p3705_p0, %p3704_p13 }
  0xbe   : > { %p3700_p4 = pneg %p3699_p3 }
  0xc0   : > { %p3707_p5 = pnand %p3706_p2, %p3700_p4 }
  0xc2   : > { %3710 = shalt.err (!%p3707_p5)
}
  0xc3   : > { %3283 = dma.hbm_to_vmem [thread:$0]  (!%p4867_p6), %s5686_s14, 16, %s889_s7, [#allocation22]  }
  0xc4   : > { %s3711_s25 = scalar_lea.hbm %s5683_s24, 16 }
  0xc5   : > { %p3712_p7 = scmp.ne.s32.totalorder %s5683_s24, %s3711_s25  ;;  %p3718_p11 = scmp.lt.u32.totalorder %s3711_s25, %s5683_s24 }
  0xc7   : > { %p3714_p9 = pnand %p3712_p7, %p4879_p8 }
  0xc9   : > { %p3715_p10 = pneg %p3714_p9 }
  0xcb   : > { %p3720_p12 = pnand %p3718_p11, %p3715_p10 }
  0xcd   : > { %3723 = shalt.err (!%p3720_p12)
}
  0xce   : > { %s3724_s1 = scalar_lea.vmem %s913_s21, 16  ;;  %s3731_s10 = scalar_lea.vmem %s913_s21, 32 }
  0xcf   : > { %p3725_p1 = scmp.ne.s32.totalorder %s913_s21, %s3724_s1  ;;  %p3732_p13 = scmp.lt.s32.totalorder %s913_s21, %s913_s21 }
  0xd0   : > { %p3733_p0 = scmp.lt.s32.totalorder %s3731_s10, %s3724_s1 }
  0xd1   : > { %p3727_p3 = pnand %p3725_p1, %p4879_p8 }
  0xd2   : > { %p3734_p2 = por %p3733_p0, %p3732_p13 }
  0xd3   : > { %p3728_p4 = pneg %p3727_p3 }
  0xd5   : > { %p3735_p5 = pnand %p3734_p2, %p3728_p4 }
  0xd7   : > { %3738 = shalt.err (!%p3735_p5)
}
  0xd8   : > { %3289 = dma.hbm_to_vmem [thread:$0]  (!%p4867_p6), %s5683_s24, 16, %s913_s21, [#allocation25]  }
  0xd9   : > { %s4630_s7 = smov [#allocation27]   ;;  %s4631_s17 = smov [#allocation30]  }
  0xda   : > { %s936_s2 = sshll.u32 %s4630_s7, 4  ;;  %s960_s18 = sshll.u32 %s4631_s17, 4  ;;  %s937_s2 = int_to_ptr.vmem [resolvable:$true] %s936_s2  ;;  %s961_s18 = int_to_ptr.vmem [resolvable:$true] %s960_s18 }
  0xdb   : > { %s3739_s25 = scalar_lea.hbm %s5689_s6, 16 }
  0xdc   : > { %p3740_p7 = scmp.ne.s32.totalorder %s5689_s6, %s3739_s25  ;;  %p3746_p11 = scmp.lt.u32.totalorder %s3739_s25, %s5689_s6 }
  0xde   : > { %p3742_p9 = pnand %p3740_p7, %p4879_p8 }
  0xe0   : > { %p3743_p10 = pneg %p3742_p9 }
  0xe2   : > { %p3748_p12 = pnand %p3746_p11, %p3743_p10 }
  0xe4   : > { %3751 = shalt.err (!%p3748_p12)
}
  0xe5   : > { %s3752_s1 = scalar_lea.vmem %s937_s2, 16  ;;  %s3759_s21 = scalar_lea.vmem %s937_s2, 32 }
  0xe6   : > { %p3753_p1 = scmp.ne.s32.totalorder %s937_s2, %s3752_s1  ;;  %p3760_p13 = scmp.lt.s32.totalorder %s937_s2, %s937_s2 }
  0xe7   : > { %p3761_p0 = scmp.lt.s32.totalorder %s3759_s21, %s3752_s1 }
  0xe8   : > { %p3755_p3 = pnand %p3753_p1, %p4879_p8 }
  0xe9   : > { %p3762_p2 = por %p3761_p0, %p3760_p13 }
  0xea   : > { %p3756_p4 = pneg %p3755_p3 }
  0xec   : > { %p3763_p5 = pnand %p3762_p2, %p3756_p4 }
  0xee   : > { %3766 = shalt.err (!%p3763_p5)
}
  0xef   : > { %3295 = dma.hbm_to_vmem [thread:$0]  (!%p4867_p6), %s5689_s6, 16, %s937_s2, [#allocation28]  }
  0xf0   : > { %s3767_s10 = scalar_lea.hbm %s5684_s20, 16 }
  0xf1   : > { %p3768_p7 = scmp.ne.s32.totalorder %s5684_s20, %s3767_s10  ;;  %p3774_p11 = scmp.lt.u32.totalorder %s3767_s10, %s5684_s20 }
  0xf3   : > { %p3770_p9 = pnand %p3768_p7, %p4879_p8 }
  0xf5   : > { %p3771_p10 = pneg %p3770_p9 }
  0xf7   : > { %p3776_p12 = pnand %p3774_p11, %p3771_p10 }
  0xf9   : > { %3779 = shalt.err (!%p3776_p12)
}
  0xfa   : > { %s3780_s7 = scalar_lea.vmem %s961_s18, 16  ;;  %s3787_s17 = scalar_lea.vmem %s961_s18, 32 }
  0xfb   : > { %p3781_p1 = scmp.ne.s32.totalorder %s961_s18, %s3780_s7  ;;  %p3788_p13 = scmp.lt.s32.totalorder %s961_s18, %s961_s18 }
  0xfc   : > { %p3789_p0 = scmp.lt.s32.totalorder %s3787_s17, %s3780_s7 }
  0xfd   : > { %p3783_p3 = pnand %p3781_p1, %p4879_p8 }
  0xfe   : > { %p3790_p2 = por %p3789_p0, %p3788_p13 }
  0xff   : > { %p3784_p4 = pneg %p3783_p3 }
 0x101   : > { %p3791_p5 = pnand %p3790_p2, %p3784_p4 }
 0x103   : > { %3794 = shalt.err (!%p3791_p5)
}
 0x104   : > { %3301 = dma.hbm_to_vmem [thread:$0]  (!%p4867_p6), %s5684_s20, 16, %s961_s18, [#allocation31]  }
 0x105   : > { %s4632_s2 = smov [#allocation33]   ;;  %s4633_s1 = smov [#allocation36]  }
 0x106   : > { %s982_s25 = sshll.u32 %s4632_s2, 4  ;;  %s1004_s21 = sshll.u32 %s4633_s1, 4  ;;  %s983_s25 = int_to_ptr.vmem [resolvable:$true] %s982_s25  ;;  %s1005_s21 = int_to_ptr.vmem [resolvable:$true] %s1004_s21 }
 0x107   : > { %s3795_s10 = scalar_lea.hbm %s5690_s4, 16 }
 0x108   : > { %p3796_p7 = scmp.ne.s32.totalorder %s5690_s4, %s3795_s10  ;;  %p3802_p11 = scmp.lt.u32.totalorder %s3795_s10, %s5690_s4 }
 0x10a   : > { %p3798_p9 = pnand %p3796_p7, %p4879_p8 }
 0x10c   : > { %p3799_p10 = pneg %p3798_p9 }
 0x10e   : > { %p3804_p12 = pnand %p3802_p11, %p3799_p10 }
 0x110   : > { %3807 = shalt.err (!%p3804_p12)
}
 0x111   : > { %s3808_s7 = scalar_lea.vmem %s983_s25, 16  ;;  %s3815_s18 = scalar_lea.vmem %s983_s25, 32 }
 0x112   : > { %p3809_p1 = scmp.ne.s32.totalorder %s983_s25, %s3808_s7  ;;  %p3816_p13 = scmp.lt.s32.totalorder %s983_s25, %s983_s25 }
 0x113   : > { %p3817_p0 = scmp.lt.s32.totalorder %s3815_s18, %s3808_s7 }
 0x114   : > { %p3811_p3 = pnand %p3809_p1, %p4879_p8 }
 0x115   : > { %p3818_p2 = por %p3817_p0, %p3816_p13 }
 0x116   : > { %p3812_p4 = pneg %p3811_p3 }
 0x118   : > { %p3819_p5 = pnand %p3818_p2, %p3812_p4 }
 0x11a   : > { %3822 = shalt.err (!%p3819_p5)
}
 0x11b   : > { %3307 = dma.hbm_to_vmem [thread:$0]  (!%p4867_p6), %s5690_s4, 16, %s983_s25, [#allocation34]  }
 0x11c   : > { %s3823_s17 = scalar_lea.hbm %s5687_s13, 16 }
 0x11d   : > { %p3824_p7 = scmp.ne.s32.totalorder %s5687_s13, %s3823_s17  ;;  %p3830_p11 = scmp.lt.u32.totalorder %s3823_s17, %s5687_s13 }
 0x11f   : > { %p3826_p9 = pnand %p3824_p7, %p4879_p8 }
 0x121   : > { %p3827_p10 = pneg %p3826_p9 }
 0x123   : > { %p3832_p12 = pnand %p3830_p11, %p3827_p10 }
 0x125   : > { %3835 = shalt.err (!%p3832_p12)
}
 0x126   : > { %s3836_s2 = scalar_lea.vmem %s1005_s21, 16  ;;  %s3843_s1 = scalar_lea.vmem %s1005_s21, 32 }
 0x127   : > { %p3837_p1 = scmp.ne.s32.totalorder %s1005_s21, %s3836_s2  ;;  %p3844_p13 = scmp.lt.s32.totalorder %s1005_s21, %s1005_s21 }
 0x128   : > { %p3845_p0 = scmp.lt.s32.totalorder %s3843_s1, %s3836_s2 }
 0x129   : > { %p3839_p3 = pnand %p3837_p1, %p4879_p8 }
 0x12a   : > { %p3846_p2 = por %p3845_p0, %p3844_p13 }
 0x12b   : > { %p3840_p4 = pneg %p3839_p3 }
 0x12d   : > { %p3847_p5 = pnand %p3846_p2, %p3840_p4 }
 0x12f   : > { %3850 = shalt.err (!%p3847_p5)
}
 0x130   : > { %3313 = dma.hbm_to_vmem [thread:$0]  (!%p4867_p6), %s5687_s13, 16, %s1005_s21, [#allocation37]  }
 0x131   : > { %s4634_s25 = smov [#allocation39]   ;;  %s4635_s7 = smov [#allocation42]  }
 0x132   : > { %s1028_s10 = sshll.u32 %s4634_s25, 4  ;;  %s1050_s18 = sshll.u32 %s4635_s7, 4  ;;  %s1029_s10 = int_to_ptr.vmem [resolvable:$true] %s1028_s10  ;;  %s1051_s18 = int_to_ptr.vmem [resolvable:$true] %s1050_s18 }
 0x133   : > { %s3851_s17 = scalar_lea.hbm %s5682_s27, 16 }
 0x134   : > { %p3852_p7 = scmp.ne.s32.totalorder %s5682_s27, %s3851_s17  ;;  %p3858_p11 = scmp.lt.u32.totalorder %s3851_s17, %s5682_s27 }
 0x136   : > { %p3854_p9 = pnand %p3852_p7, %p4879_p8 }
 0x138   : > { %p3855_p10 = pneg %p3854_p9 }
 0x13a   : > { %p3860_p12 = pnand %p3858_p11, %p3855_p10 }
 0x13c   : > { %3863 = shalt.err (!%p3860_p12)
}
 0x13d   : > { %s3864_s2 = scalar_lea.vmem %s1029_s10, 16  ;;  %s3871_s21 = scalar_lea.vmem %s1029_s10, 32 }
 0x13e   : > { %p3865_p1 = scmp.ne.s32.totalorder %s1029_s10, %s3864_s2  ;;  %p3872_p13 = scmp.lt.s32.totalorder %s1029_s10, %s1029_s10 }
 0x13f   : > { %p3873_p0 = scmp.lt.s32.totalorder %s3871_s21, %s3864_s2 }
 0x140   : > { %p3867_p3 = pnand %p3865_p1, %p4879_p8 }
 0x141   : > { %p3874_p2 = por %p3873_p0, %p3872_p13 }
 0x142   : > { %p3868_p4 = pneg %p3867_p3 }
 0x144   : > { %p3875_p5 = pnand %p3874_p2, %p3868_p4 }
 0x146   : > { %3878 = shalt.err (!%p3875_p5)
}
 0x147   : > { %3319 = dma.hbm_to_vmem [thread:$0]  (!%p4867_p6), %s5682_s27, 16, %s1029_s10, [#allocation40]  }
 0x148   : > { %s3879_s1 = scalar_lea.hbm %s5688_s12, 16 }
 0x149   : > { %p3880_p7 = scmp.ne.s32.totalorder %s5688_s12, %s3879_s1  ;;  %p3886_p11 = scmp.lt.u32.totalorder %s3879_s1, %s5688_s12 }
 0x14b   : > { %p3882_p9 = pnand %p3880_p7, %p4879_p8 }
 0x14d   : > { %p3883_p10 = pneg %p3882_p9 }
 0x14f   : > { %p3888_p12 = pnand %p3886_p11, %p3883_p10 }
 0x151   : > { %3891 = shalt.err (!%p3888_p12)
}
 0x152   : > { %s3892_s25 = scalar_lea.vmem %s1051_s18, 16  ;;  %s3899_s7 = scalar_lea.vmem %s1051_s18, 32 }
 0x153   : > { %p3893_p1 = scmp.ne.s32.totalorder %s1051_s18, %s3892_s25  ;;  %p3900_p13 = scmp.lt.s32.totalorder %s1051_s18, %s1051_s18 }
 0x154   : > { %p3901_p0 = scmp.lt.s32.totalorder %s3899_s7, %s3892_s25 }
 0x155   : > { %p3895_p3 = pnand %p3893_p1, %p4879_p8 }
 0x156   : > { %p3902_p2 = por %p3901_p0, %p3900_p13 }
 0x157   : > { %p3896_p4 = pneg %p3895_p3 }
 0x159   : > { %p3903_p5 = pnand %p3902_p2, %p3896_p4 }
 0x15b   : > { %3906 = shalt.err (!%p3903_p5)
}
 0x15c   : > { %3325 = dma.hbm_to_vmem [thread:$0]  (!%p4867_p6), %s5688_s12, 16, %s1051_s18, [#allocation43]  }
 0x15d   : > { %s4636_s10 = smov [#allocation45]   ;;  %s4637_s2 = smov [#allocation48]  }
 0x15e   : > { %s1074_s17 = sshll.u32 %s4636_s10, 4  ;;  %s1098_s21 = sshll.u32 %s4637_s2, 4  ;;  %s1075_s17 = int_to_ptr.vmem [resolvable:$true] %s1074_s17  ;;  %s1099_s21 = int_to_ptr.vmem [resolvable:$true] %s1098_s21 }
 0x15f   : > { %s3907_s1 = scalar_lea.hbm %s5680_s30, 16 }
 0x160   : > { %p3908_p7 = scmp.ne.s32.totalorder %s5680_s30, %s3907_s1  ;;  %p3914_p11 = scmp.lt.u32.totalorder %s3907_s1, %s5680_s30 }
 0x162   : > { %p3910_p9 = pnand %p3908_p7, %p4879_p8 }
 0x164   : > { %p3911_p10 = pneg %p3910_p9 }
 0x166   : > { %p3916_p12 = pnand %p3914_p11, %p3911_p10 }
 0x168   : > { %3919 = shalt.err (!%p3916_p12)
}
 0x169   : > { %s3920_s25 = scalar_lea.vmem %s1075_s17, 16  ;;  %s3927_s18 = scalar_lea.vmem %s1075_s17, 32 }
 0x16a   : > { %p3921_p1 = scmp.ne.s32.totalorder %s1075_s17, %s3920_s25  ;;  %p3928_p13 = scmp.lt.s32.totalorder %s1075_s17, %s1075_s17 }
 0x16b   : > { %p3929_p0 = scmp.lt.s32.totalorder %s3927_s18, %s3920_s25 }
 0x16c   : > { %p3923_p3 = pnand %p3921_p1, %p4879_p8 }
 0x16d   : > { %p3930_p2 = por %p3929_p0, %p3928_p13 }
 0x16e   : > { %p3924_p4 = pneg %p3923_p3 }
 0x170   : > { %p3931_p5 = pnand %p3930_p2, %p3924_p4 }
 0x172   : > { %3934 = shalt.err (!%p3931_p5)
}
 0x173   : > { %3331 = dma.hbm_to_vmem [thread:$0]  (!%p4867_p6), %s5680_s30, 16, %s1075_s17, [#allocation46]  }
 0x174   : > { %s3935_s7 = scalar_lea.hbm %s5685_s19, 16 }
 0x175   : > { %p3936_p7 = scmp.ne.s32.totalorder %s5685_s19, %s3935_s7  ;;  %p3942_p11 = scmp.lt.u32.totalorder %s3935_s7, %s5685_s19 }
 0x177   : > { %p3938_p9 = pnand %p3936_p7, %p4879_p8 }
 0x179   : > { %p3939_p10 = pneg %p3938_p9 }
 0x17b   : > { %p3944_p12 = pnand %p3942_p11, %p3939_p10 }
 0x17d   : > { %3947 = shalt.err (!%p3944_p12)
}
 0x17e   : > { %s3948_s10 = scalar_lea.vmem %s1099_s21, 16  ;;  %s3955_s2 = scalar_lea.vmem %s1099_s21, 32 }
 0x17f   : > { %p3949_p1 = scmp.ne.s32.totalorder %s1099_s21, %s3948_s10  ;;  %p3956_p13 = scmp.lt.s32.totalorder %s1099_s21, %s1099_s21 }
 0x180   : > { %p3957_p0 = scmp.lt.s32.totalorder %s3955_s2, %s3948_s10 }
 0x181   : > { %p3951_p3 = pnand %p3949_p1, %p4879_p8 }
 0x182   : > { %p3958_p2 = por %p3957_p0, %p3956_p13 }
 0x183   : > { %p3952_p4 = pneg %p3951_p3 }
 0x185   : > { %p3959_p5 = pnand %p3958_p2, %p3952_p4 }
 0x187   : > { %3962 = shalt.err (!%p3959_p5)
}
 0x188   : > { %3337 = dma.hbm_to_vmem [thread:$0]  (!%p4867_p6), %s5685_s19, 16, %s1099_s21, [#allocation49]  }
 0x189   : > { %s2882_s17 = sadd.s32 4294967294, %s4593_s23   ;;  %s115_s1 = sadd.s32 1, %s4589_s22 }
 0x18a   : > { %s124_s25 = sadd.s32 1, %s4581_s16  ;;  %p117_p7 = scmp.ge.s32.totalorder %s115_s1, 2 }
 0x18b   : > { %p131_p9 = scmp.ne.s32.totalorder %s4581_s16, %s4577_s15  ;;  %p132_p10 = scmp.eq.s32.totalorder %s4593_s23, 0 }
 0x18c   : > { %p137_p11 = scmp.ne.s32.totalorder %s4577_s15, %s4573_s0  ;;  %s5773_s1 = smov (%p117_p7, %s115_s1), 0 }
 0x18d   : > { %p5033_p12 = por %p132_p10, %p131_p9  ;;  %p5700_p1 = scmp.eq.s32.totalorder %s4853_s26, 0 }
 0x18e   : > { %s119_s7 = ssub.s32 %s4589_s22, %s5773_s1  ;;  %p800_p4 = scmp.eq.s32.totalorder %s4853_s26, 1 }
 0x18f   : > { %p5039_p3 = por %p5700_p1, %p137_p11  ;;  %p122_p13 = scmp.eq.s32.totalorder %s119_s7, 0 }
 0x190   : > { %p806_p0 = scmp.eq.s32.totalorder %s2882_s17, 1  ;;  %p5046_p2 = por %p800_p4, %p131_p9 }
 0x191   : > { %s5701_s21 = scalar_select %p5039_p3, 1, 0 }
 0x192   : > { %s5702_s10 = scalar_select %p5046_p2, 1, 0 }
 0x193   : > { %p3387_p5 = scmp.lt.s32.totalorder %s4593_s23, 2  ;;  %p5054_p7 = por %p806_p0, %p137_p11 }
 0x194   : > { %s5052_s2 = scalar_select %p122_p13, %s4581_s16, %s124_s25  }
 0x195   : > { %s5703_s3 = scalar_select %p5054_p7, 1, 0 }
 0x196   : > { %s5617_s4 = sand.u32 1, %s4581_s16   ;;  %s5064_s7 = sshll.u32 %s4589_s22, 6 }
 0x197   : > { %s5061_s6 = sshll.u32 %s5617_s4, 2  ;;  %p5068_p9 = pnand %p3387_p5, %p5033_p12 }
 0x198   : > { %s5627_s25 = sand.u32 1, %s4593_s23   ;;  %s5075_s12 = scalar_lea.hbm %s5681_s9, %s5064_s7 }
 0x199   : > { %s5704_s17 = scalar_select %p5068_p9, 1, 0 }
 0x19a   : > { %s1154_s13 = scalar_lea.vmem [#allocation9], %s5061_s6  ;;  %s5082_s14 = scalar_lea.sflag [#allocation10], %s5627_s25 }
 0x19b   : > { %s1162_s4 = sshll.u32 %s1154_s13, 4  ;;  %s3963_s18 = scalar_lea.hbm %s5075_s12, 64  ;;  %s5078_s4 = int_to_ptr.vmem [resolvable:$true] %s1162_s4 }
 0x19c   : > { %p3964_p10 = scmp.ne.s32.totalorder %s5075_s12, %s3963_s18  ;;  %p5088_p11 = pneg %p5068_p9 }
 0x19d   : > { %s3968_s20 = scalar_lea.hbm %s5681_s9, 128  ;;  %p3969_p4 = scmp.lt.u32.totalorder %s5075_s12, %s5681_s9 }
 0x19e   : > { %s5705_s19 = scalar_select %p5088_p11, 1, 0 }
 0x19f   : > { %p3966_p12 = pnand %p5088_p11, %p3964_p10  ;;  %p3970_p13 = scmp.lt.u32.totalorder %s3968_s20, %s3963_s18 }
 0x1a0   : > { %p3972_p5 = scmp.lt.u32.totalorder %s3963_s18, %s5075_s12 }
 0x1a1   : > { %p3967_p1 = pneg %p3966_p12  ;;  %p3971_p0 = por %p3970_p13, %p3969_p4 }
 0x1a3   : > { %p3973_p7 = por %p3972_p5, %p3971_p0 }
 0x1a5   : > { %p3974_p2 = pnand %p3973_p7, %p3967_p1 }
 0x1a7   : > { %3977 = shalt.err (!%p3974_p2)
}
 0x1a8   : > { %s3978_s13 = scalar_lea.vmem %s5078_s4, 64  ;;  %s4638_s25 = smov [#allocation9]  }
 0x1a9   : > { %p3979_p3 = scmp.ne.s32.totalorder %s5078_s4, %s3978_s13  ;;  %s3983_s24 = sshll.u32 %s4638_s25, 4  ;;  %s3984_s24 = int_to_ptr.vmem [resolvable:$false] %s3983_s24 }
 0x1aa   : > { %s3985_s27 = scalar_lea.vmem %s3984_s24, 128  ;;  %p3986_p10 = scmp.lt.s32.totalorder %s5078_s4, %s3984_s24 }
 0x1ab   : > { %p3981_p6 = pnand %p3979_p3, %p5088_p11  ;;  %p3987_p12 = scmp.lt.s32.totalorder %s3985_s27, %s3978_s13 }
 0x1ad   : > { %p3982_p8 = pneg %p3981_p6  ;;  %p3988_p4 = por %p3987_p12, %p3986_p10 }
 0x1af   : > { %p3989_p13 = pnand %p3988_p4, %p3982_p8 }
 0x1b1   : > { %3992 = shalt.err (!%p3989_p13)
}
 0x1b2   : > { %3350 = dma.hbm_to_vmem [thread:$0]  (!%p5068_p9), %s5075_s12, 64, %s5078_s4, %s5082_s14  }
 0x1b3   : > { %s4639_s20 = smov [#allocation17]   ;;  %s3993_s25 = scalar_lea.hbm %s5679_s29, 256 }
 0x1b4   : > { %s850_s18 = sshll.u32 %s4639_s20, 4  ;;  %p3994_p6 = scmp.ne.s32.totalorder %s5679_s29, %s3993_s25  ;;  %s851_s18 = int_to_ptr.vmem [resolvable:$true] %s850_s18 }
 0x1b5   : > { %p5706_p3 = scmp.ne.s32.totalorder %s5698_s28, 0  ;;  %p4000_p8 = scmp.lt.u32.totalorder %s3993_s25, %s5679_s29 }
 0x1b7   : > { %p3996_p2 = pnand %p3994_p6, %p5706_p3 }
 0x1b9   : > { %p3997_p7 = pneg %p3996_p2 }
 0x1bb   : > { %p4002_p1 = pnand %p4000_p8, %p3997_p7 }
 0x1bd   : > { %4005 = shalt.err (!%p4002_p1)
}
 0x1be   : > { %s4006_s24 = scalar_lea.vmem %s851_s18, 256  ;;  %p4014_p12 = scmp.lt.s32.totalorder %s851_s18, %s851_s18 }
 0x1bf   : > { %p4007_p0 = scmp.ne.s32.totalorder %s851_s18, %s4006_s24  ;;  %p4015_p4 = scmp.lt.s32.totalorder %s4006_s24, %s4006_s24 }
 0x1c1   : > { %p4009_p5 = pnand %p4007_p0, %p5706_p3  ;;  %p4016_p13 = por %p4015_p4, %p4014_p12 }
 0x1c3   : > { %p4010_p10 = pneg %p4009_p5 }
 0x1c5   : > { %p4017_p9 = pnand %p4016_p13, %p4010_p10 }
 0x1c7   : > { %4020 = shalt.err (!%p4017_p9)
}
 0x1c8   : > { %s5640_s12 = smov 64   ;;  %s5707_s27 = sld [smem:[#allocation80_spill]] }
 0x1c9   : > { %s5642_s4 = smov 4   ;;  %p5708_p6 = scmp.ne.s32.totalorder %s5697_s11, 0 }
 0x1ca   : > { %s4642_s13 = smov [#allocation20]   ;;  %s4643_s25 = smov [#allocation23]  }
 0x1cb   : > { %3274 = dma.hbm_to_vmem [thread:$0]  (!%p5708_p6), %s5679_s29, 256, %s851_s18, [#allocation16], %s5640_s12, %s5640_s12, %s5642_s4  }
 0x1cc   : > { %s874_s20 = sshll.u32 %s4642_s13, 4  ;;  %s898_s24 = sshll.u32 %s4643_s25, 4  ;;  %s875_s20 = int_to_ptr.vmem [resolvable:$true] %s874_s20  ;;  %s5121_s24 = int_to_ptr.vmem [resolvable:$true] %s898_s24 }
 0x1ce   : > { %s4021_s9 = scalar_lea.hbm %s5707_s27, 256 }
 0x1cf   : > { %p4022_p9 = scmp.ne.s32.totalorder %s5707_s27, %s4021_s9  ;;  %p4028_p8 = scmp.lt.u32.totalorder %s4021_s9, %s5707_s27 }
 0x1d1   : > { %p4024_p2 = pnand %p4022_p9, %p5706_p3 }
 0x1d3   : > { %p4025_p7 = pneg %p4024_p2 }
 0x1d5   : > { %p4030_p1 = pnand %p4028_p8, %p4025_p7 }
 0x1d7   : > { %4033 = shalt.err (!%p4030_p1)
}
 0x1d8   : > { %s4034_s30 = scalar_lea.vmem %s875_s20, 256  ;;  %p4042_p12 = scmp.lt.s32.totalorder %s875_s20, %s875_s20 }
 0x1d9   : > { %p4035_p0 = scmp.ne.s32.totalorder %s875_s20, %s4034_s30  ;;  %p4043_p4 = scmp.lt.s32.totalorder %s4034_s30, %s4034_s30 }
 0x1db   : > { %p4037_p5 = pnand %p4035_p0, %p5706_p3  ;;  %p4044_p13 = por %p4043_p4, %p4042_p12 }
 0x1dd   : > { %p4038_p10 = pneg %p4037_p5 }
 0x1df   : > { %p4045_p11 = pnand %p4044_p13, %p4038_p10 }
 0x1e1   : > { %4048 = shalt.err (!%p4045_p11)
}
 0x1e2   : > { %s5709_s9 = sld [smem:[#allocation82_spill]] }
 0x1e3   : > { %3280 = dma.hbm_to_vmem [thread:$0]  (!%p5708_p6), %s5707_s27, 256, %s875_s20, [#allocation19], %s5640_s12, %s5640_s12, %s5642_s4  }
 0x1e8   : > { %s4049_s18 = scalar_lea.hbm %s5709_s9, 256 }
 0x1e9   : > { %p4050_p9 = scmp.ne.s32.totalorder %s5709_s9, %s4049_s18  ;;  %p4056_p8 = scmp.lt.u32.totalorder %s4049_s18, %s5709_s9 }
 0x1eb   : > { %p4052_p2 = pnand %p4050_p9, %p5706_p3 }
 0x1ed   : > { %p4053_p7 = pneg %p4052_p2 }
 0x1ef   : > { %p4058_p1 = pnand %p4056_p8, %p4053_p7 }
 0x1f1   : > { %4061 = shalt.err (!%p4058_p1)
}
 0x1f2   : > { %s4062_s30 = scalar_lea.vmem %s5121_s24, 256  ;;  %p4070_p10 = scmp.lt.s32.totalorder %s5121_s24, %s5121_s24 }
 0x1f3   : > { %p4063_p11 = scmp.ne.s32.totalorder %s5121_s24, %s4062_s30  ;;  %p4071_p12 = scmp.lt.s32.totalorder %s4062_s30, %s4062_s30 }
 0x1f5   : > { %p4065_p0 = pnand %p4063_p11, %p5706_p3  ;;  %p4072_p4 = por %p4071_p12, %p4070_p10 }
 0x1f7   : > { %p4066_p5 = pneg %p4065_p0 }
 0x1f9   : > { %p4073_p13 = pnand %p4072_p4, %p4066_p5 }
 0x1fb   : > { %4076 = shalt.err (!%p4073_p13)
}
 0x1fc   : > { %s5710_s13 = sld [smem:[#allocation84_spill]]  ;;  %s4644_s20 = smov [#allocation26]  }
 0x1fd   : > { %3286 = dma.hbm_to_vmem [thread:$0]  (!%p5708_p6), %s5709_s9, 256, %s5121_s24, [#allocation22], %s5640_s12, %s5640_s12, %s5642_s4  }
 0x1fe   : > { %s922_s25 = sshll.u32 %s4644_s20, 4  ;;  %s4645_s18 = smov [#allocation29]   ;;  %s923_s25 = int_to_ptr.vmem [resolvable:$true] %s922_s25 }
 0x1ff   : > { %s946_s27 = sshll.u32 %s4645_s18, 4  ;;  %s5154_s27 = int_to_ptr.vmem [resolvable:$true] %s946_s27 }
 0x202   : > { %s4077_s30 = scalar_lea.hbm %s5710_s13, 256 }
 0x203   : > { %p4078_p9 = scmp.ne.s32.totalorder %s5710_s13, %s4077_s30  ;;  %p4084_p8 = scmp.lt.u32.totalorder %s4077_s30, %s5710_s13 }
 0x205   : > { %p4080_p2 = pnand %p4078_p9, %p5706_p3 }
 0x207   : > { %p4081_p7 = pneg %p4080_p2 }
 0x209   : > { %p4086_p1 = pnand %p4084_p8, %p4081_p7 }
 0x20b   : > { %4089 = shalt.err (!%p4086_p1)
}
 0x20c   : > { %s4090_s29 = scalar_lea.vmem %s923_s25, 256  ;;  %p4098_p10 = scmp.lt.s32.totalorder %s923_s25, %s923_s25 }
 0x20d   : > { %p4091_p11 = scmp.ne.s32.totalorder %s923_s25, %s4090_s29  ;;  %p4099_p12 = scmp.lt.s32.totalorder %s4090_s29, %s4090_s29 }
 0x20f   : > { %p4093_p0 = pnand %p4091_p11, %p5706_p3  ;;  %p4100_p4 = por %p4099_p12, %p4098_p10 }
 0x211   : > { %p4094_p5 = pneg %p4093_p0 }
 0x213   : > { %p4101_p13 = pnand %p4100_p4, %p4094_p5 }
 0x215   : > { %4104 = shalt.err (!%p4101_p13)
}
 0x216   : > { %s5711_s24 = sld [smem:[#allocation86_spill]] }
 0x217   : > { %3292 = dma.hbm_to_vmem [thread:$0]  (!%p5708_p6), %s5710_s13, 256, %s923_s25, [#allocation25], %s5640_s12, %s5640_s12, %s5642_s4  }
 0x21c   : > { %s4105_s20 = scalar_lea.hbm %s5711_s24, 256 }
 0x21d   : > { %p4106_p9 = scmp.ne.s32.totalorder %s5711_s24, %s4105_s20  ;;  %p4112_p8 = scmp.lt.u32.totalorder %s4105_s20, %s5711_s24 }
 0x21f   : > { %p4108_p2 = pnand %p4106_p9, %p5706_p3 }
 0x221   : > { %p4109_p7 = pneg %p4108_p2 }
 0x223   : > { %p4114_p1 = pnand %p4112_p8, %p4109_p7 }
 0x225   : > { %4117 = shalt.err (!%p4114_p1)
}
 0x226   : > { %s4118_s29 = scalar_lea.vmem %s5154_s27, 256  ;;  %p4126_p10 = scmp.lt.s32.totalorder %s5154_s27, %s5154_s27 }
 0x227   : > { %p4119_p11 = scmp.ne.s32.totalorder %s5154_s27, %s4118_s29  ;;  %p4127_p12 = scmp.lt.s32.totalorder %s4118_s29, %s4118_s29 }
 0x229   : > { %p4121_p0 = pnand %p4119_p11, %p5706_p3  ;;  %p4128_p4 = por %p4127_p12, %p4126_p10 }
 0x22b   : > { %p4122_p5 = pneg %p4121_p0 }
 0x22d   : > { %p4129_p13 = pnand %p4128_p4, %p4122_p5 }
 0x22f   : > { %4132 = shalt.err (!%p4129_p13)
}
 0x230   : > { %s5712_s25 = sld [smem:[#allocation88_spill]]  ;;  %s4646_s18 = smov [#allocation32]  }
 0x231   : > { %3298 = dma.hbm_to_vmem [thread:$0]  (!%p5708_p6), %s5711_s24, 256, %s5154_s27, [#allocation28], %s5640_s12, %s5640_s12, %s5642_s4  }
 0x232   : > { %s971_s30 = sshll.u32 %s4646_s18, 4  ;;  %s4647_s20 = smov [#allocation35]   ;;  %s972_s30 = int_to_ptr.vmem [resolvable:$true] %s971_s30 }
 0x233   : > { %s993_s9 = sshll.u32 %s4647_s20, 4  ;;  %s5187_s9 = int_to_ptr.vmem [resolvable:$true] %s993_s9 }
 0x236   : > { %s4133_s29 = scalar_lea.hbm %s5712_s25, 16 }
 0x237   : > { %p4134_p9 = scmp.ne.s32.totalorder %s5712_s25, %s4133_s29  ;;  %p4140_p8 = scmp.lt.u32.totalorder %s4133_s29, %s5712_s25 }
 0x239   : > { %p4136_p2 = pnand %p4134_p9, %p5706_p3 }
 0x23b   : > { %p4137_p7 = pneg %p4136_p2 }
 0x23d   : > { %p4142_p1 = pnand %p4140_p8, %p4137_p7 }
 0x23f   : > { %4145 = shalt.err (!%p4142_p1)
}
 0x240   : > { %s4146_s13 = scalar_lea.vmem %s972_s30, 16  ;;  %s4153_s27 = scalar_lea.vmem %s972_s30, 32 }
 0x241   : > { %p4147_p11 = scmp.ne.s32.totalorder %s972_s30, %s4146_s13  ;;  %p4154_p10 = scmp.lt.s32.totalorder %s972_s30, %s972_s30 }
 0x242   : > { %p4155_p12 = scmp.lt.s32.totalorder %s4153_s27, %s4146_s13 }
 0x243   : > { %p4149_p0 = pnand %p4147_p11, %p5706_p3 }
 0x244   : > { %p4156_p4 = por %p4155_p12, %p4154_p10 }
 0x245   : > { %p4150_p5 = pneg %p4149_p0 }
 0x247   : > { %p4157_p13 = pnand %p4156_p4, %p4150_p5 }
 0x249   : > { %4160 = shalt.err (!%p4157_p13)
}
 0x24a   : > { %s5713_s18 = sld [smem:[#allocation90_spill]] }
 0x24b   : > { %3304 = dma.hbm_to_vmem [thread:$0]  (!%p5708_p6), %s5712_s25, 16, %s972_s30, [#allocation31]  }
 0x250   : > { %s5714_s20 = smov %s5713_s18  ;;  %s4161_s29 = scalar_lea.hbm %s5713_s18, 16 }
 0x251   : > { %p4162_p9 = scmp.ne.s32.totalorder %s5714_s20, %s4161_s29  ;;  %p4168_p8 = scmp.lt.u32.totalorder %s4161_s29, %s5714_s20 }
 0x253   : > { %p4164_p2 = pnand %p4162_p9, %p5706_p3 }
 0x255   : > { %p4165_p7 = pneg %p4164_p2 }
 0x257   : > { %p4170_p1 = pnand %p4168_p8, %p4165_p7 }
 0x259   : > { %4173 = shalt.err (!%p4170_p1)
}
 0x25a   : > { %s4174_s13 = scalar_lea.vmem %s5187_s9, 16  ;;  %s4181_s27 = scalar_lea.vmem %s5187_s9, 32 }
 0x25b   : > { %p4175_p11 = scmp.ne.s32.totalorder %s5187_s9, %s4174_s13  ;;  %p4182_p10 = scmp.lt.s32.totalorder %s5187_s9, %s5187_s9 }
 0x25c   : > { %p4183_p12 = scmp.lt.s32.totalorder %s4181_s27, %s4174_s13 }
 0x25d   : > { %p4177_p0 = pnand %p4175_p11, %p5706_p3 }
 0x25e   : > { %p4184_p4 = por %p4183_p12, %p4182_p10 }
 0x25f   : > { %p4178_p5 = pneg %p4177_p0 }
 0x261   : > { %p4185_p13 = pnand %p4184_p4, %p4178_p5 }
 0x263   : > { %4188 = shalt.err (!%p4185_p13)
}
 0x264   : > { %s5715_s30 = sld [smem:[#allocation92_spill]]  ;;  %s4648_s18 = smov [#allocation38]  }
 0x265   : > { %3310 = dma.hbm_to_vmem [thread:$0]  (!%p5708_p6), %s5714_s20, 16, %s5187_s9, [#allocation34]  }
 0x266   : > { %s1014_s29 = sshll.u32 %s4648_s18, 4  ;;  %s4649_s12 = smov [#allocation41]   ;;  %s1015_s29 = int_to_ptr.vmem [resolvable:$true] %s1014_s29 }
 0x267   : > { %s1039_s4 = sshll.u32 %s4649_s12, 4  ;;  %s5215_s4 = int_to_ptr.vmem [resolvable:$true] %s1039_s4 }
 0x26a   : > { %s4189_s13 = scalar_lea.hbm %s5715_s30, 512 }
 0x26b   : > { %p4190_p9 = scmp.ne.s32.totalorder %s5715_s30, %s4189_s13  ;;  %p4196_p8 = scmp.lt.u32.totalorder %s4189_s13, %s5715_s30 }
 0x26d   : > { %p4192_p2 = pnand %p4190_p9, %p5706_p3 }
 0x26f   : > { %p4193_p7 = pneg %p4192_p2 }
 0x271   : > { %p4198_p1 = pnand %p4196_p8, %p4193_p7 }
 0x273   : > { %4201 = shalt.err (!%p4198_p1)
}
 0x274   : > { %s4202_s27 = scalar_lea.vmem %s1015_s29, 512  ;;  %p4210_p10 = scmp.lt.s32.totalorder %s1015_s29, %s1015_s29 }
 0x275   : > { %p4203_p11 = scmp.ne.s32.totalorder %s1015_s29, %s4202_s27  ;;  %p4211_p12 = scmp.lt.s32.totalorder %s4202_s27, %s4202_s27 }
 0x277   : > { %p4205_p0 = pnand %p4203_p11, %p5706_p3  ;;  %p4212_p4 = por %p4211_p12, %p4210_p10 }
 0x279   : > { %p4206_p5 = pneg %p4205_p0 }
 0x27b   : > { %p4213_p13 = pnand %p4212_p4, %p4206_p5 }
 0x27d   : > { %4216 = shalt.err (!%p4213_p13)
}
 0x27e   : > { %s5716_s12 = smov 4   ;;  %s5717_s9 = smov 64  }
 0x27f   : > { %s5718_s18 = sld [smem:[#allocation94_spill]] }
 0x280   : > { %3316 = dma.hbm_to_vmem [thread:$0]  (!%p5708_p6), %s5715_s30, 512, %s1015_s29, [#allocation37], %s5717_s9, %s5717_s9, %s5716_s12  }
 0x285   : > { %s5719_s13 = smov %s5718_s18  ;;  %s4217_s20 = scalar_lea.hbm %s5718_s18, 16 }
 0x286   : > { %p4218_p9 = scmp.ne.s32.totalorder %s5719_s13, %s4217_s20  ;;  %p4224_p8 = scmp.lt.u32.totalorder %s4217_s20, %s5719_s13 }
 0x288   : > { %p4220_p2 = pnand %p4218_p9, %p5706_p3 }
 0x28a   : > { %p4221_p7 = pneg %p4220_p2 }
 0x28c   : > { %p4226_p1 = pnand %p4224_p8, %p4221_p7 }
 0x28e   : > { %4229 = shalt.err (!%p4226_p1)
}
 0x28f   : > { %s4230_s27 = scalar_lea.vmem %s5215_s4, 16  ;;  %s4237_s24 = scalar_lea.vmem %s5215_s4, 32 }
 0x290   : > { %p4231_p11 = scmp.ne.s32.totalorder %s5215_s4, %s4230_s27  ;;  %p4238_p10 = scmp.lt.s32.totalorder %s5215_s4, %s5215_s4 }
 0x291   : > { %p4239_p12 = scmp.lt.s32.totalorder %s4237_s24, %s4230_s27 }
 0x292   : > { %p4233_p0 = pnand %p4231_p11, %p5706_p3 }
 0x293   : > { %p4240_p4 = por %p4239_p12, %p4238_p10 }
 0x294   : > { %p4234_p5 = pneg %p4233_p0 }
 0x296   : > { %p4241_p13 = pnand %p4240_p4, %p4234_p5 }
 0x298   : > { %4244 = shalt.err (!%p4241_p13)
}
 0x299   : > { %s5720_s20 = sld [smem:[#allocation96_spill]]  ;;  %s4650_s29 = smov [#allocation44]  }
 0x29a   : > { %3322 = dma.hbm_to_vmem [thread:$0]  (!%p5708_p6), %s5719_s13, 16, %s5215_s4, [#allocation40]  }
 0x29b   : > { %s1060_s18 = sshll.u32 %s4650_s29, 4  ;;  %s4651_s25 = smov [#allocation47]   ;;  %s1061_s18 = int_to_ptr.vmem [resolvable:$true] %s1060_s18 }
 0x29c   : > { %s1084_s30 = sshll.u32 %s4651_s25, 4  ;;  %s5246_s30 = int_to_ptr.vmem [resolvable:$true] %s1084_s30 }
 0x29f   : > { %s4245_s24 = scalar_lea.hbm %s5720_s20, 256 }
 0x2a0   : > { %p4246_p9 = scmp.ne.s32.totalorder %s5720_s20, %s4245_s24  ;;  %p4252_p8 = scmp.lt.u32.totalorder %s4245_s24, %s5720_s20 }
 0x2a2   : > { %p4248_p2 = pnand %p4246_p9, %p5706_p3 }
 0x2a4   : > { %p4249_p7 = pneg %p4248_p2 }
 0x2a6   : > { %p4254_p1 = pnand %p4252_p8, %p4249_p7 }
 0x2a8   : > { %4257 = shalt.err (!%p4254_p1)
}
 0x2a9   : > { %s4258_s27 = scalar_lea.vmem %s1061_s18, 256  ;;  %p4266_p10 = scmp.lt.s32.totalorder %s1061_s18, %s1061_s18 }
 0x2aa   : > { %p4259_p11 = scmp.ne.s32.totalorder %s1061_s18, %s4258_s27  ;;  %p4267_p12 = scmp.lt.s32.totalorder %s4258_s27, %s4258_s27 }
 0x2ac   : > { %p4261_p0 = pnand %p4259_p11, %p5706_p3  ;;  %p4268_p4 = por %p4267_p12, %p4266_p10 }
 0x2ae   : > { %p4262_p5 = pneg %p4261_p0 }
 0x2b0   : > { %p4269_p13 = pnand %p4268_p4, %p4262_p5 }
 0x2b2   : > { %4272 = shalt.err (!%p4269_p13)
}
 0x2b3   : > { %s5721_s4 = sld [smem:[#allocation98_spill]] }
 0x2b4   : > { %3328 = dma.hbm_to_vmem [thread:$0]  (!%p5708_p6), %s5720_s20, 256, %s1061_s18, [#allocation43], %s5717_s9, %s5717_s9, %s5716_s12  }
 0x2b9   : > { %s4273_s25 = scalar_lea.hbm %s5721_s4, 512 }
 0x2ba   : > { %p4274_p9 = scmp.ne.s32.totalorder %s5721_s4, %s4273_s25  ;;  %p4280_p8 = scmp.lt.u32.totalorder %s4273_s25, %s5721_s4 }
 0x2bc   : > { %p4276_p2 = pnand %p4274_p9, %p5706_p3 }
 0x2be   : > { %p4277_p7 = pneg %p4276_p2 }
 0x2c0   : > { %p4282_p1 = pnand %p4280_p8, %p4277_p7 }
 0x2c2   : > { %4285 = shalt.err (!%p4282_p1)
}
 0x2c3   : > { %s4286_s29 = scalar_lea.vmem %s5246_s30, 512  ;;  %p4294_p10 = scmp.lt.s32.totalorder %s5246_s30, %s5246_s30 }
 0x2c4   : > { %p4287_p11 = scmp.ne.s32.totalorder %s5246_s30, %s4286_s29  ;;  %p4295_p12 = scmp.lt.s32.totalorder %s4286_s29, %s4286_s29 }
 0x2c6   : > { %p4289_p0 = pnand %p4287_p11, %p5706_p3  ;;  %p4296_p4 = por %p4295_p12, %p4294_p10 }
 0x2c8   : > { %p4290_p5 = pneg %p4289_p0 }
 0x2ca   : > { %p4297_p13 = pnand %p4296_p4, %p4290_p5 }
 0x2cc   : > { %4300 = shalt.err (!%p4297_p13)
}
 0x2cd   : > { %3334 = dma.hbm_to_vmem [thread:$0]  (!%p5708_p6), %s5721_s4, 512, %s5246_s30, [#allocation46], %s5717_s9, %s5717_s9, %s5716_s12  }
 0x2ce   : > { %s4652_s18 = smov [#allocation50]   ;;  %s4653_s27 = smov [#allocation51]  }
 0x2cf   : > { %s1109_s24 = sshll.u32 %s4652_s18, 4  ;;  %s1120_s25 = sshll.u32 %s4653_s27, 4  ;;  %s1110_s24 = int_to_ptr.vmem [resolvable:$true] %s1109_s24  ;;  %s5279_s25 = int_to_ptr.vmem [resolvable:$true] %s1120_s25 }
 0x2d0   : > { %s4301_s29 = scalar_lea.hbm %s4810_s5, 16 }
 0x2d1   : > { %p4302_p9 = scmp.ne.s32.totalorder %s4810_s5, %s4301_s29  ;;  %p4308_p8 = scmp.lt.u32.totalorder %s4301_s29, %s4810_s5 }
 0x2d3   : > { %p4304_p2 = pnand %p4302_p9, %p5706_p3 }
 0x2d5   : > { %p4305_p7 = pneg %p4304_p2 }
 0x2d7   : > { %p4310_p1 = pnand %p4308_p8, %p4305_p7 }
 0x2d9   : > { %4313 = shalt.err (!%p4310_p1)
}
 0x2da   : > { %s4314_s13 = scalar_lea.vmem %s1110_s24, 16  ;;  %s4321_s30 = scalar_lea.vmem %s1110_s24, 32 }
 0x2db   : > { %p4315_p11 = scmp.ne.s32.totalorder %s1110_s24, %s4314_s13  ;;  %p4322_p10 = scmp.lt.s32.totalorder %s1110_s24, %s1110_s24 }
 0x2dc   : > { %p4323_p12 = scmp.lt.s32.totalorder %s4321_s30, %s4314_s13 }
 0x2dd   : > { %p4317_p0 = pnand %p4315_p11, %p5706_p3 }
 0x2de   : > { %p4324_p4 = por %p4323_p12, %p4322_p10 }
 0x2df   : > { %p4318_p5 = pneg %p4317_p0 }
 0x2e1   : > { %p4325_p13 = pnand %p4324_p4, %p4318_p5 }
 0x2e3   : > { %4328 = shalt.err (!%p4325_p13)
}
 0x2e4   : > { %3340 = dma.hbm_to_vmem [thread:$0]  (!%p5708_p6), %s4810_s5, 16, %s1110_s24, [#allocation49]  }
 0x2e5   : > { %s4329_s12 = scalar_lea.hbm %s4815_s8, 16 }
 0x2e6   : > { %p4330_p9 = scmp.ne.s32.totalorder %s4815_s8, %s4329_s12  ;;  %p4336_p8 = scmp.lt.u32.totalorder %s4329_s12, %s4815_s8 }
 0x2e8   : > { %p4332_p2 = pnand %p4330_p9, %p5706_p3 }
 0x2ea   : > { %p4333_p7 = pneg %p4332_p2 }
 0x2ec   : > { %p4338_p1 = pnand %p4336_p8, %p4333_p7 }
 0x2ee   : > { %4341 = shalt.err (!%p4338_p1)
}
 0x2ef   : > { %s4342_s9 = scalar_lea.vmem %s5279_s25, 16  ;;  %s4349_s13 = scalar_lea.vmem %s5279_s25, 32 }
 0x2f0   : > { %p4343_p11 = scmp.ne.s32.totalorder %s5279_s25, %s4342_s9  ;;  %p4350_p10 = scmp.lt.s32.totalorder %s5279_s25, %s5279_s25 }
 0x2f1   : > { %p4351_p12 = scmp.lt.s32.totalorder %s4349_s13, %s4342_s9 }
 0x2f2   : > { %p4345_p0 = pnand %p4343_p11, %p5706_p3 }
 0x2f3   : > { %p4352_p4 = por %p4351_p12, %p4350_p10 }
 0x2f4   : > { %p4346_p5 = pneg %p4345_p0 }
 0x2f6   : > { %p4353_p13 = pnand %p4352_p4, %p4346_p5 }
 0x2f8   : > { %4356 = shalt.err (!%p4353_p13)
}
 0x2f9   : > { %s5722_s18 = sld [smem:[#allocation72_spill]]  ;;  %s1135_s27 = scalar_lea.vmem [#allocation6], %s5061_s6 }
 0x2fa   : > { %3343 = dma.hbm_to_vmem [thread:$0]  (!%p5708_p6), %s4815_s8, 16, %s5279_s25, [#allocation52]  }
 0x2fb   : > { %s1143_s29 = sshll.u32 %s1135_s27, 4  ;;  %s5724_s11 = sand.u32 1, %s4581_s16   ;;  %s1144_s29 = int_to_ptr.vmem [resolvable:$true] %s1143_s29 }
 0x2fc   : > { %s1132_s30 = scalar_lea.sflag [#allocation7], %s5724_s11  ;;  %p5725_p9 = scmp.ne.s32.totalorder %s5705_s19, 0 }
 0x2ff   : > { %s5723_s24 = smov %s5722_s18  ;;  %s5309_s28 = scalar_lea.hbm %s5722_s18, %s5064_s7 }
 0x300   : > { %s4357_s12 = scalar_lea.hbm %s5309_s28, 64  ;;  %s4362_s9 = scalar_lea.hbm %s5723_s24, 128 }
 0x301   : > { %p4358_p3 = scmp.ne.s32.totalorder %s5309_s28, %s4357_s12  ;;  %p4363_p8 = scmp.lt.u32.totalorder %s5309_s28, %s5723_s24 }
 0x302   : > { %p4364_p1 = scmp.lt.u32.totalorder %s4362_s9, %s4357_s12  ;;  %p4366_p11 = scmp.lt.u32.totalorder %s4357_s12, %s5309_s28 }
 0x303   : > { %p4360_p2 = pnand %p4358_p3, %p5725_p9 }
 0x304   : > { %p4365_p6 = por %p4364_p1, %p4363_p8 }
 0x305   : > { %p4361_p7 = pneg %p4360_p2 }
 0x306   : > { %p4367_p0 = por %p4366_p11, %p4365_p6 }
 0x308   : > { %p4368_p5 = pnand %p4367_p0, %p4361_p7 }
 0x30a   : > { %4371 = shalt.err (!%p4368_p5)
}
 0x30b   : > { %s4372_s25 = scalar_lea.vmem %s1144_s29, 64  ;;  %s4654_s13 = smov [#allocation6]  }
 0x30c   : > { %p4373_p10 = scmp.ne.s32.totalorder %s1144_s29, %s4372_s25  ;;  %s4377_s18 = sshll.u32 %s4654_s13, 4  ;;  %s4378_s18 = int_to_ptr.vmem [resolvable:$false] %s4377_s18 }
 0x30d   : > { %s4379_s27 = scalar_lea.vmem %s4378_s18, 128  ;;  %p4380_p13 = scmp.lt.s32.totalorder %s1144_s29, %s4378_s18 }
 0x30e   : > { %p4375_p12 = pnand %p4373_p10, %p5725_p9  ;;  %p4381_p3 = scmp.lt.s32.totalorder %s4379_s27, %s4372_s25 }
 0x310   : > { %p4376_p4 = pneg %p4375_p12  ;;  %p4382_p2 = por %p4381_p3, %p4380_p13 }
 0x312   : > { %p4383_p1 = pnand %p4382_p2, %p4376_p4 }
 0x314   : > { %4386 = shalt.err (!%p4383_p1)
}
 0x315   : > { %p5726_p8 = scmp.ne.s32.totalorder %s5704_s17, 0  ;;  %s5727_s11 = sld [smem:[#allocation74_spill]] }
 0x316   : > { %s1173_s9 = scalar_lea.vmem [#allocation11], %s5061_s6 }
 0x317   : > { %3347 = dma.hbm_to_vmem [thread:$0]  (!%p5726_p8), %s5309_s28, 64, %s1144_s29, %s1132_s30  }
 0x318   : > { %s1181_s25 = sshll.u32 %s1173_s9, 4  ;;  %s1182_s25 = int_to_ptr.vmem [resolvable:$true] %s1181_s25 }
 0x31b   : > { %s5329_s12 = scalar_lea.hbm %s5727_s11, %s5064_s7  ;;  %s4392_s18 = scalar_lea.hbm %s5727_s11, 128 }
 0x31c   : > { %s4387_s13 = scalar_lea.hbm %s5329_s12, 64  ;;  %p4393_p0 = scmp.lt.u32.totalorder %s5329_s12, %s5727_s11 }
 0x31d   : > { %p4388_p7 = scmp.ne.s32.totalorder %s5329_s12, %s4387_s13  ;;  %p4394_p5 = scmp.lt.u32.totalorder %s4392_s18, %s4387_s13 }
 0x31e   : > { %p4396_p12 = scmp.lt.u32.totalorder %s4387_s13, %s5329_s12 }
 0x31f   : > { %p4390_p6 = pnand %p4388_p7, %p5725_p9  ;;  %p4395_p10 = por %p4394_p5, %p4393_p0 }
 0x321   : > { %p4391_p11 = pneg %p4390_p6  ;;  %p4397_p4 = por %p4396_p12, %p4395_p10 }
 0x323   : > { %p4398_p13 = pnand %p4397_p4, %p4391_p11 }
 0x325   : > { %4401 = shalt.err (!%p4398_p13)
}
 0x326   : > { %s4402_s28 = scalar_lea.vmem %s1182_s25, 64  ;;  %s4655_s29 = smov [#allocation11]  }
 0x327   : > { %p4403_p3 = scmp.ne.s32.totalorder %s1182_s25, %s4402_s28  ;;  %s4407_s30 = sshll.u32 %s4655_s29, 4  ;;  %s4408_s30 = int_to_ptr.vmem [resolvable:$false] %s4407_s30 }
 0x328   : > { %s4409_s27 = scalar_lea.vmem %s4408_s30, 128  ;;  %p4410_p7 = scmp.lt.s32.totalorder %s1182_s25, %s4408_s30 }
 0x329   : > { %p4405_p2 = pnand %p4403_p3, %p5725_p9  ;;  %p4411_p6 = scmp.lt.s32.totalorder %s4409_s27, %s4402_s28 }
 0x32b   : > { %p4406_p1 = pneg %p4405_p2  ;;  %p4412_p8 = por %p4411_p6, %p4410_p7 }
 0x32d   : > { %p4413_p0 = pnand %p4412_p8, %p4406_p1 }
 0x32f   : > { %4416 = shalt.err (!%p4413_p0)
}
 0x330   : > { %p5728_p5 = scmp.ne.s32.totalorder %s5704_s17, 0  ;;  %s5729_s9 = sld [smem:[#allocation75_spill]] }
 0x331   : > { %s1192_s18 = scalar_lea.vmem [#allocation12], %s5061_s6  ;;  %s5730_s29 = sand.u32 1, %s4593_s23  }
 0x332   : > { %3353 = dma.hbm_to_vmem [thread:$0]  (!%p5728_p5), %s5329_s12, 64, %s1182_s25, %s5082_s14  }
 0x333   : > { %s1200_s28 = sshll.u32 %s1192_s18, 4  ;;  %s1189_s30 = scalar_lea.sflag [#allocation13], %s5730_s29  ;;  %s1201_s28 = int_to_ptr.vmem [resolvable:$true] %s1200_s28 }
 0x336   : > { %s5348_s13 = scalar_lea.hbm %s5729_s9, %s5064_s7  ;;  %s4422_s4 = scalar_lea.hbm %s5729_s9, 128 }
 0x337   : > { %s4417_s27 = scalar_lea.hbm %s5348_s13, 64  ;;  %p4423_p12 = scmp.lt.u32.totalorder %s5348_s13, %s5729_s9 }
 0x338   : > { %p4418_p8 = scmp.ne.s32.totalorder %s5348_s13, %s4417_s27  ;;  %p4424_p4 = scmp.lt.u32.totalorder %s4422_s4, %s4417_s27 }
 0x339   : > { %p4426_p3 = scmp.lt.u32.totalorder %s4417_s27, %s5348_s13 }
 0x33a   : > { %p4420_p11 = pnand %p4418_p8, %p5725_p9  ;;  %p4425_p13 = por %p4424_p4, %p4423_p12 }
 0x33c   : > { %p4421_p10 = pneg %p4420_p11  ;;  %p4427_p2 = por %p4426_p3, %p4425_p13 }
 0x33e   : > { %p4428_p1 = pnand %p4427_p2, %p4421_p10 }
 0x340   : > { %4431 = shalt.err (!%p4428_p1)
}
 0x341   : > { %s4432_s14 = scalar_lea.vmem %s1201_s28, 64  ;;  %s4656_s6 = smov [#allocation12]  }
 0x342   : > { %p4433_p7 = scmp.ne.s32.totalorder %s1201_s28, %s4432_s14  ;;  %s4437_s7 = sshll.u32 %s4656_s6, 4  ;;  %s4438_s7 = int_to_ptr.vmem [resolvable:$false] %s4437_s7 }
 0x343   : > { %s4439_s12 = scalar_lea.vmem %s4438_s7, 128  ;;  %p4440_p8 = scmp.lt.s32.totalorder %s1201_s28, %s4438_s7 }
 0x344   : > { %p4435_p6 = pnand %p4433_p7, %p5725_p9  ;;  %p4441_p11 = scmp.lt.s32.totalorder %s4439_s12, %s4432_s14 }
 0x346   : > { %p4436_p0 = pneg %p4435_p6  ;;  %p4442_p5 = por %p4441_p11, %p4440_p8 }
 0x348   : > { %p4443_p4 = pnand %p4442_p5, %p4436_p0 }
 0x34a   : > { %4446 = shalt.err (!%p4443_p4)
}
 0x34b   : > { %p5731_p12 = scmp.ne.s32.totalorder %s5704_s17, 0  ;;  %s5732_s4 = sld [smem:[#allocation102_spill]] }
 0x34d   : > { %3356 = dma.hbm_to_vmem [thread:$0]  (!%p5731_p12), %s5348_s13, 64, %s1201_s28, %s1189_s30  }
 0x351   : > { %p5733_p10 = scmp.ne.s32.totalorder %s5732_s4, 0 }
 0x352   : > { %s5369_s19 = sand.u32 (!%p5733_p10), 1, %s4577_s15   ;;  %p5734_p9 = scmp.ne.s32.totalorder (!%p5733_p10), %s5701_s21, 0 }
 0x353   : > { %1209 = sbr.rel (%p5733_p10) target bundleno = 3356 (0xd1c), region = 140  ;;  %s5372_s25 = sshll.u32 (!%p5733_p10), %s5369_s19, 2 }
 0x354   : > { %s1212_s18 = scalar_lea.sflag (!%p5733_p10), [#allocation7], %s5369_s19  ;;  %s1215_s29 = scalar_lea.vmem (!%p5733_p10), [#allocation6], %s5372_s25 }
 0x35a   : > { %4500 = dma.done.wait (%p5734_p9), %s1212_s18, 64  }
 0x35b   : > { %4502 = vsyncadd (%p5734_p9), %s1212_s18, 4294967232  ;;  %s1220_s17 = sand.u32 1, %s4853_s26   ;;  %s1224_s28 = scalar_lea.vmem [#allocation9], %s5372_s25 }
 0x35c   : > { %s1221_s13 = scalar_lea.sflag [#allocation10], %s1220_s17 }
 0x35d   : > { %4504 = dma.done.wait (%p5734_p9), %s1221_s13, 128  }
 0x35e   : > { %4506 = vsyncadd (%p5734_p9), %s1221_s13, 4294967168  ;;  %s1233_s30 = scalar_lea.vmem [#allocation11], %s5372_s25  ;;  %s1239_s27 = scalar_lea.sflag [#allocation13], %s1220_s17 }
 0x35f   : > { %s1242_s14 = scalar_lea.vmem [#allocation12], %s5372_s25 }
 0x360   : > { %4508 = dma.done.wait (%p5734_p9), %s1239_s27, 64  }
 0x361   : > { %4510 = vsyncadd (%p5734_p9), %s1239_s27, 4294967232  ;;  %p5735_p5 = scmp.eq.s32.totalorder %s4853_s26, 0 }
 0x363   : > { %4512 = dma.done.wait (%p5735_p5), [#allocation13], 128   ;;  %p5736_p13 = pmov %p5735_p5 }
 0x364   : > { %p5737_p3 = pmov %p5735_p5 }
 0x365   : > { %4514 = vsyncadd (%p5736_p13), [#allocation13], 4294967168 }
 0x366   : > { %4516 = dma.done.wait (%p5737_p3), [#allocation16], 272   ;;  %p5738_p2 = pmov %p5737_p3 }
 0x368   : > { %4518 = vsyncadd (%p5738_p2), [#allocation16], 4294967024  ;;  %p5739_p1 = pmov %p5738_p2 }
 0x36a   : > { %4520 = dma.done.wait (%p5739_p1), [#allocation19], 272   ;;  %p5740_p7 = pmov %p5739_p1 }
 0x36b   : > { %p5741_p6 = pmov %p5739_p1 }
 0x36c   : > { %4522 = vsyncadd (%p5740_p7), [#allocation19], 4294967024 }
 0x36d   : > { %4524 = dma.done.wait (%p5741_p6), [#allocation22], 272   ;;  %p5742_p0 = pmov %p5739_p1 }
 0x36f   : > { %4526 = vsyncadd (%p5742_p0), [#allocation22], 4294967024  ;;  %p5743_p8 = pmov %p5742_p0 }
 0x370   : > { %p5744_p11 = pmov %p5742_p0 }
 0x371   : > { %4528 = dma.done.wait (%p5743_p8), [#allocation25], 272  }
 0x372   : > { %4530 = vsyncadd (%p5744_p11), [#allocation25], 4294967024  ;;  %p5745_p4 = pmov %p5742_p0 }
 0x373   : > { %p5746_p12 = pmov %p5742_p0 }
 0x374   : > { %4532 = dma.done.wait (%p5745_p4), [#allocation28], 272  }
 0x375   : > { %4534 = vsyncadd (%p5746_p12), [#allocation28], 4294967024  ;;  %p5747_p10 = pmov %p5742_p0 }
 0x376   : > { %p5748_p9 = pmov %p5742_p0 }
 0x377   : > { %4536 = dma.done.wait (%p5747_p10), [#allocation31], 32  }
 0x378   : > { %4538 = vsyncadd (%p5748_p9), [#allocation31], 4294967264  ;;  %p5749_p5 = pmov %p5742_p0 }
 0x379   : > { %p5750_p13 = pmov %p5742_p0 }
 0x37a   : > { %4540 = dma.done.wait (%p5749_p5), [#allocation34], 32  }
 0x37b   : > { %4542 = vsyncadd (%p5750_p13), [#allocation34], 4294967264  ;;  %p5751_p3 = pmov %p5742_p0 }
 0x37c   : > { %p5752_p2 = pmov %p5742_p0 }
 0x37d   : > { %4544 = dma.done.wait (%p5751_p3), [#allocation37], 528  }
 0x37e   : > { %4546 = vsyncadd (%p5752_p2), [#allocation37], 4294966768  ;;  %p5753_p1 = pmov %p5742_p0 }
 0x37f   : > { %p5754_p7 = pmov %p5742_p0 }
 0x380   : > { %4548 = dma.done.wait (%p5753_p1), [#allocation40], 32  }
 0x381   : > { %4550 = vsyncadd (%p5754_p7), [#allocation40], 4294967264  ;;  %p5755_p6 = pmov %p5742_p0 }
 0x383   : > { %4552 = dma.done.wait (%p5755_p6), [#allocation43], 272  }
 0x384   : > { %4554 = vsyncadd (%p5742_p0), [#allocation43], 4294967024  ;;  %p5756_p8 = pmov %p5742_p0 }
 0x385   : > { %p5757_p11 = pmov %p5742_p0 }
 0x386   : > { %4556 = dma.done.wait (%p5756_p8), [#allocation46], 528  }
 0x387   : > { %4558 = vsyncadd (%p5757_p11), [#allocation46], 4294966768  ;;  %p5758_p4 = pmov %p5742_p0 }
 0x388   : > { %p5759_p12 = pmov %p5742_p0 }
 0x389   : > { %4560 = dma.done.wait (%p5758_p4), [#allocation49], 32  }
 0x38a   : > { %4562 = vsyncadd (%p5759_p12), [#allocation49], 4294967264  ;;  %p5760_p10 = pmov %p5742_p0 }
 0x38b   : > { %p5761_p9 = pmov %p5742_p0 }
 0x38c   : > { %4564 = dma.done.wait (%p5760_p10), [#allocation52], 16  }
 0x38d   : > { %4566 = vsyncadd (%p5761_p9), [#allocation52], 4294967280  ;;  %v4657_v0 = vmov 0.0   ;;  %vm4658_vm0 = vmmov 0   ;;  %v3527_v1 = vld [vmem:[#allocation23] sm:$0xff]   ;;  %v3529_v3 = vld [vmem:[#allocation23 + $0x8] sm:$0xff]  }
 0x38e   : > { %3053 = vmatprep.subr.bf16.mxu0 %v4657_v0  ;;  %3061 = vmatprep.subr.bf16.mxu1 %v4657_v0  ;;  %v3528_v2 = vld [vmem:[#allocation23] sm:$0xff]   ;;  %v3530_v4 = vld [vmem:[#allocation23 + $0x8] sm:$0xff]   ;;  %v1443_v5 = vld [vmem:[%s1215_s29] sm:$0xf]  ;;  %vm1487_vm1 = vcmask 261120   ;;  %vm1554_vm2 = vcmask 130048  }
 0x38f   : > { %3057 = vmatprep.mubr.msk.bf16.mxu0 %vm4658_vm0, %v4657_v0  ;;  %3065 = vmatprep.mubr.msk.bf16.mxu1 %vm4658_vm0, %v4657_v0  ;;  %v1445_v6 = vld [vmem:[%s1224_s28] sm:$0xf]  ;;  %v1444_v8 = vunpack.c.l.bf16 %v1443_v5  ;;  %v5464_v10 = vld [vmem:[%s1233_s30] sm:$0xf]  ;;  %v1563_v11 = vld [vmem:[%s1242_s14] sm:$0xf] }
 0x390   : > { %3054 = vmatpush3.bf16.msra.mxu0 %v3527_v1  ;;  %3062 = vmatpush3.bf16.msra.mxu1 %v3528_v2  ;;  %v5460_v7 = vld [vmem:[#allocation15] ss:$0 sm:$0xff]  ;;  %v1446_v9 = vunpack.c.l.bf16 %v1445_v6  ;;  %v1562_v12 = vunpack.c.l.bf16 %v5464_v10  ;;  %v1564_v13 = vunpack.c.l.bf16 %v1563_v11  ;;  %v2953_v30 = vld [vmem:[#allocation24] ss:$0 sm:$0xff]  ;;  %v2958_v48 = vld [vmem:[#allocation32] ss:$0 sm:$0xff] }
 0x391   : > { %3055 = vmatprep.subr.bf16.mxu0 %v4657_v0  ;;  %3063 = vmatprep.subr.bf16.mxu1 %v4657_v0  ;;  %v1454_v14 = vmul.f32 %v5460_v7, %v1444_v8  ;;  %v2967_v51 = vld [vmem:[#allocation35] ss:$0 sm:$0xff]  ;;  %v2959_v52 = vld [vmem:[#allocation33] ss:$0 sm:$0xff]  ;;  %v2968_v55 = vld [vmem:[#allocation36] ss:$0 sm:$0xff] }
 0x392   : > { %v1572_v15 = vmul.f32 %v5460_v7, %v1562_v12  ;;  %v3531_v63 = vld [vmem:[#allocation17] sm:$0xff]   ;;  %vm1556_vm3 = vcmask 7168   ;;  %v4659_v1 = vmov -inf   ;;  %v3532_v2 = vld [vmem:[#allocation17 + $0x8] sm:$0xff]   ;;  %vm1797_vm4 = vcmask 64512   ;;  %s5762_s26 = sld [smem:[#allocation101_spill]] }
 0x393   : > { %v1455_v16 = vadd.f32 %v1454_v14, %v1446_v9  ;;  %1557 = vst.msk [vmem:[#allocation3] sm:$0xff] %vm1556_vm3, %v4659_v1  ;;  %1558 = vst.msk [vmem:[#allocation4] sm:$0xff] %vm1556_vm3, %v4657_v0  ;;  %v4660_v12 = vmov 0   ;;  %vm1833_vm5 = vcmask 1043456   ;;  %vm1559_vm6 = vcmask 523264   ;;  %s5763_s21 = sld [smem:[#allocation100_spill]] }
 0x394   : > { %3056 = vmatpush3.bf16.msra.mxu0 %v3529_v3  ;;  %3064 = vmatpush3.bf16.msra.mxu1 %v3530_v4  ;;  %v1573_v17 = vadd.f32 %v1572_v15, %v1564_v13  ;;  %v1748_v3 = vld [vmem:[#allocation14] sm:$0xff]  ;;  %1560 = vst.msk [vmem:[#allocation5] sm:$0xff] %vm1559_vm6, %v4657_v0  ;;  %s1437_s7 = scalar_lea.vmem [#allocation53], %s5372_s25  ;;  %vm2432_vm7 = vcmask 257024   ;;  %s2435_s18 = scalar_lea.sflag [#allocation8], %s5369_s19 }
 0x395   : > { %3069 = vmatprep.subr.bf16.mxu0 %v4657_v0  ;;  %3077 = vmatprep.subr.bf16.mxu1 %v4657_v0  ;;  %v2952_v18 = vmul.f32 -1.442695, %v1455_v16  ;;  %s2449_s12 = sshll.u32 %s1437_s7, 4  ;;  %p5764_p13 = scmp.ne.s32.totalorder %s5702_s10, 0  ;;  %s5549_s12 = int_to_ptr.vmem [resolvable:$true] %s2449_s12 }
 0x396   : > { %v2961_v19 = vmul.f32 -1.442695, %v1573_v17  ;;  %3525 = vset.pattern.permute.xlu0 %v4660_v12  ;;  %3526 = vset.pattern.permute.xlu1 %v4660_v12  ;;  %s4661_s17 = smov [#allocation53]  }
 0x397   : > { %3549 = vpow2.f32 %v2952_v18  ;;  %s4451_s25 = sshll.u32 %s4661_s17, 4  ;;  %s4452_s25 = int_to_ptr.vmem [resolvable:$false] %s4451_s25 }
 0x398   : > { %3551 = vpow2.f32 %v2961_v19  ;;  %s3015_s6 = sshll.u32 %s5762_s26, 6  ;;  %s4453_s13 = scalar_lea.vmem %s4452_s25, 128 }
 0x399   : > { %s5547_s4 = scalar_lea.hbm %s5763_s21, %s3015_s6  ;;  %p4454_p1 = scmp.lt.s32.totalorder %s5549_s12, %s4452_s25 }
 0x39b   : > { %v1821_v1 = vld [vmem:[#allocation5] sm:$0xff] }
 0x3a1   : > { %v3550_v20 = vpop.eup %3549 }
 0x3a2   : > { %v3552_v21 = vpop.eup %3551  ;;  %v1459_v22 = vadd.f32 1.0, %v3550_v20 }
 0x3a3   : > { %v1577_v23 = vadd.f32 1.0, %v3552_v21 }
 0x3a4   : > { %3553 = vrcp.f32 %v1459_v22  ;;  %v1796_v22 = vld [vmem:[#allocation3] sm:$0xff] }
 0x3a5   : > { %3555 = vrcp.f32 %v1577_v23 }
 0x3ae   : > { %v3554_v24 = vpop.eup %3553 }
 0x3af   : > { %v3556_v25 = vpop.eup %3555  ;;  %v1462_v26 = vmul.f32 %v3554_v24, %v1455_v16  ;;  %v2969_v16 = vld [vmem:[#allocation18] ss:$0 sm:$0xff] }
 0x3b0   : > { %v1580_v27 = vmul.f32 %v3556_v25, %v1573_v17 }
 0x3b1   : > { %v1467_v28 = vpack.c.bf16 %v1462_v26, %v1462_v26 }
 0x3b2   : > { %v1585_v29 = vpack.c.bf16 %v1580_v27, %v1580_v27 }
 0x3b3   : > { %3058 = vmatmul.mubr.msk.bf16.vlgmr.msra.gmra.mrb[0].mxu0 %vm1487_vm1, %v1467_v28 }
 0x3b4   : > { %3066 = vmatmul.mubr.msk.bf16.vlgmr.msra.gmra.mrb[0].mxu1 %vm1487_vm1, %v1585_v29  ;;  %3073 = vmatprep.mubr.msk.bf16.mxu0 %vm4658_vm0, %v4657_v0  ;;  %v1884_v29 = vld [vmem:[%s1215_s29] sm:$0xf]  ;;  %s4447_s29 = scalar_lea.vmem %s5549_s12, 64 }
 0x3b5   : > { %3079 = vmatprep.mubr.msk.bf16.mxu1 %vm4658_vm0, %v4657_v0  ;;  %3070 = vmatpush3.bf16.msra.mxu0 %v3531_v63  ;;  %v3542_v63 = vld [vmem:[#allocation38 + $0x18] sm:$0xff]   ;;  %p4448_p5 = scmp.ne.s32.totalorder %s5549_s12, %s4447_s29  ;;  %p4455_p7 = scmp.lt.s32.totalorder %s4453_s13, %s4447_s29 }
 0x3b6   : > { %3071 = vmatprep.subr.bf16.mxu0 %v4657_v0 }
 0x3b7   : > { %p4449_p3 = pnand %p4448_p5, %p5764_p13  ;;  %p4456_p6 = por %p4455_p7, %p4454_p1 }
 0x3b9   : > { %3072 = vmatpush3.bf16.msra.mxu0 %v3532_v2  ;;  %p4450_p2 = pneg %p4449_p3 }
 0x3ba   : > { %3083 = vmatprep.subr.bf16.mxu0 %v4657_v0 }
 0x3bb   : > { %p4457_p0 = pnand %p4456_p6, %p4450_p2 }
 0x3bc   : > { %3074 = vmatmul.mubr.msk.bf16.vlgmr.msra.gmra.mrb[4].mxu0 %vm1487_vm1, %v5464_v10 }
 0x3bd   : > { %3085 = vmatprep.mubr.msk.bf16.mxu0 %vm4658_vm0, %v4657_v0 }
 0x486   : > { %v1525_v31 = vpop.f32.mrb[0].mxu0 }
 0x487   : > { %v1526_v32 = vadd.f32 %v2953_v30, %v1525_v31  ;;  %v1643_v33 = vpop.f32.mrb[0].mxu1  ;;  %v3059_v34 = vpop.f32.mrb[1].mxu0  ;;  %v1886_v31 = vld [vmem:[%s1224_s28] sm:$0xf] }
 0x488   : > { %v1644_v35 = vadd.f32 %v2953_v30, %v1643_v33  ;;  %v3067_v36 = vpop.f32.mrb[1].mxu1  ;;  %v1528_v37 = vpop.f32.mrb[2].mxu0  ;;  %v5496_v30 = vunpack.c.l.bf16 %v1884_v29 }
 0x489   : > { %v2957_v38 = vmul.f32 -1.442695, %v1526_v32  ;;  %v1646_v39 = vpop.f32.mrb[2].mxu1  ;;  %v3060_v40 = vpop.f32.mrb[3].mxu0 }
 0x48a   : > { %v2966_v41 = vmul.f32 -1.442695, %v1644_v35  ;;  %v3068_v42 = vpop.f32.mrb[3].mxu1  ;;  %v1895_v33 = vmul.f32 %v5460_v7, %v5496_v30 }
 0x48b   : > { %3557 = vpow2.f32 %v2957_v38 }
 0x48c   : > { %3559 = vpow2.f32 %v2966_v41 }
 0x48f   : > { %v1732_v13 = vpop.f32.mrb[4].mxu0 }
 0x490   : > { %v3075_v14 = vpop.f32.mrb[5].mxu0  ;;  %v1733_v17 = vadd.f32 %v2969_v16, %v1732_v13 }
 0x491   : > { %v1735_v15 = vpop.f32.mrb[6].mxu0 }
 0x492   : > { %v3076_v10 = vpop.f32.mrb[7].mxu0  ;;  %v2973_v18 = vmul.f32 -1.442695, %v1733_v17  ;;  %v2983_v15 = vld [vmem:[#allocation27] ss:$0 sm:$0xff] }
 0x495   : > { %v3558_v43 = vpop.eup %3557 }
 0x496   : > { %v3560_v44 = vpop.eup %3559  ;;  %v1534_v45 = vadd.f32 1.0, %v3558_v43  ;;  %v3533_v43 = vld [vmem:[#allocation26] sm:$0xff]  }
 0x497   : > { %v1652_v46 = vadd.f32 1.0, %v3560_v44 }
 0x498   : > { %3561 = vrcp.f32 %v1534_v45 }
 0x499   : > { %3563 = vrcp.f32 %v1652_v46 }
 0x49a   : > { %3565 = vpow2.f32 %v2973_v18 }
 0x4a2   : > { %v3562_v47 = vpop.eup %3561 }
 0x4a3   : > { %v3564_v49 = vpop.eup %3563  ;;  %v1537_v50 = vmul.f32 %v3562_v47, %v1526_v32  ;;  %v1887_v32 = vunpack.c.l.bf16 %v1886_v31  ;;  %v3534_v47 = vld [vmem:[#allocation26 + $0x8] sm:$0xff]  }
 0x4a4   : > { %v1655_v53 = vmul.f32 %v3564_v49, %v1644_v35  ;;  %v3566_v19 = vpop.eup %3565  ;;  %v2978_v31 = vld [vmem:[#allocation21] ss:$0 sm:$0xff] }
 0x4a5   : > { %v1545_v54 = vmul.f32 %v2958_v48, %v1537_v50  ;;  %v1741_v20 = vadd.f32 1.0, %v3566_v19  ;;  %v1896_v34 = vadd.f32 %v1895_v33, %v1887_v32  ;;  %v3535_v50 = vld [vmem:[#allocation20] sm:$0xff]   ;;  %v2992_v33 = vld [vmem:[#allocation39] ss:$0 sm:$0xff] }
 0x4a6   : > { %v1663_v56 = vmul.f32 %v2967_v51, %v1655_v53  ;;  %v3536_v51 = vld [vmem:[#allocation20 + $0x8] sm:$0xff]   ;;  %v3538_v53 = vld [vmem:[#allocation29 + $0x8] sm:$0xff]   ;;  %v2988_v32 = vld [vmem:[#allocation30] ss:$0 sm:$0xff] }
 0x4a7   : > { %v1553_v57 = vadd.f32 %v2959_v52, %v1545_v54  ;;  %3567 = vrcp.f32 %v1741_v20  ;;  %v2977_v35 = vmul.f32 -1.442695, %v1896_v34  ;;  %v3537_v52 = vld [vmem:[#allocation29] sm:$0xff]  }
 0x4a8   : > { %v1671_v58 = vadd.f32 %v2968_v55, %v1663_v56  ;;  %v3539_v54 = vld [vmem:[#allocation38] sm:$0xff]   ;;  %v3540_v56 = vld [vmem:[#allocation38 + $0x8] sm:$0xff]  }
 0x4a9   : > { %1555 = vst.msk [vmem:[#allocation2] sm:$0xff] %vm1554_vm2, %v1553_v57  ;;  %3569 = vpow2.f32 %v2977_v35  ;;  %v1813_v55 = vld [vmem:[#allocation4] sm:$0xff]  ;;  %v3145_v35 = vadd.f32 %v2992_v33, %v2988_v32 }
 0x4aa   : > { %v1747_v59 = vpack.c.bf16 %v1671_v58, %v1671_v58 }
 0x4ac   : > { %v1754_v60 = vsel %vm1554_vm2, %v1747_v59, 0 }
 0x4ad   : > { %3078 = vmatpush3.bf16.xpose.msra.mxu1 %v1754_v60  ;;  %v3541_v60 = vld [vmem:[#allocation38 + $0x10] sm:$0xff]  }
 0x4ae   : > { %3089 = vmatprep.subr.bf16.mxu1 %v4657_v0 }
 0x4b0   : > { %v1745_v61 = vld [vmem:[#allocation2] sm:$0xff] }
 0x4b1   : > { %v1746_v62 = vpack.c.bf16 %v1745_v61, %v1745_v61  ;;  %v3568_v21 = vpop.eup %3567 }
 0x4b2   : > { %v1744_v24 = vmul.f32 %v3568_v21, %v1733_v17 }
 0x4b3   : > { %v3570_v36 = vpop.eup %3569 }
 0x4b4   : > { %3080 = vmatmul.mubr.msk.bf16.vlgmr.msra.gmra.mrb[4].mxu1 %vm1554_vm2, %v1746_v62  ;;  %v1829_v27 = vpack.c.bf16 %v1744_v24, %v1744_v24  ;;  %v1900_v38 = vadd.f32 1.0, %v3570_v36 }
 0x4b5   : > { %3093 = vmatprep.mubr.msk.bf16.mxu1 %vm4658_vm0, %v4657_v0  ;;  %3090 = vmatpush3.bf16.msra.mxu1 %v3535_v50 }
 0x4b6   : > { %v1835_v28 = vsel %vm1833_vm5, %v1829_v27, 0  ;;  %3571 = vrcp.f32 %v1900_v38  ;;  %3091 = vmatprep.subr.bf16.mxu1 %v4657_v0 }
 0x4b7   : > { %3084 = vmatpush3.bf16.msra.mxu0 %v1835_v28 }
 0x4b8   : > { %3097 = vmatprep.subr.bf16.mxu0 %v4657_v0 }
 0x4b9   : > { %3092 = vmatpush3.bf16.msra.mxu1 %v3536_v51 }
 0x4ba   : > { %3105 = vmatprep.subr.bf16.mxu1 %v4657_v0 }
 0x4c0   : > { %v3572_v41 = vpop.eup %3571 }
 0x4c1   : > { %v1903_v7 = vmul.f32 %v3572_v41, %v1896_v34 }
 0x4c3   : > { %v1908_v48 = vpack.c.bf16 %v1903_v7, %v1903_v7 }
 0x4c5   : > { %3094 = vmatmul.mubr.msk.bf16.vlgmr.msra.gmra.mrb[8].mxu1 %vm1487_vm1, %v1908_v48 }
 0x4c6   : > { %3106 = vmatpush3.bf16.msra.mxu1 %v3537_v52  ;;  %3109 = vmatprep.mubr.msk.bf16.mxu1 %vm4658_vm0, %v4657_v0 }
 0x4c7   : > { %3107 = vmatprep.subr.bf16.mxu1 %v4657_v0 }
 0x4ca   : > { %3108 = vmatpush3.bf16.msra.mxu1 %v3538_v53 }
 0x4cb   : > { %3113 = vmatprep.subr.bf16.mxu1 %v4657_v0 }
 0x4cd   : > { %3110 = vmatmul.mubr.msk.bf16.vlgmr.msra.gmra.mrb[12].mxu1 %vm1487_vm1, %v1908_v48 }
 0x4ce   : > { %3114 = vmatpush3.bf16.msra.mxu1 %v3539_v54  ;;  %3121 = vmatprep.mubr.msk.bf16.mxu1 %vm4658_vm0, %v4657_v0 }
 0x4cf   : > { %3115 = vmatprep.subr.bf16.mxu1 %v4657_v0 }
 0x4d2   : > { %3116 = vmatpush3.bf16.msra.mxu1 %v3540_v56 }
 0x4d3   : > { %3117 = vmatprep.subr.bf16.mxu1 %v4657_v0 }
 0x4d6   : > { %3118 = vmatpush3.bf16.msra.mxu1 %v3541_v60 }
 0x4d7   : > { %3119 = vmatprep.subr.bf16.mxu1 %v4657_v0 }
 0x4da   : > { %3120 = vmatpush3.bf16.msra.mxu1 %v3542_v63  ;;  %v2999_v63 = vld [vmem:[#allocation41] ss:$0 sm:$0xff] }
 0x587   : > { %v1790_v4 = vpop.f32.mrb[4].mxu1 }
 0x588   : > { %v1791_v5 = vadd.f32 %v1790_v4, %v1748_v3  ;;  %v3081_v6 = vpop.f32.mrb[5].mxu1 }
 0x589   : > { %v1793_v8 = vpop.f32.mrb[6].mxu1 }
 0x58a   : > { %v3082_v9 = vpop.f32.mrb[7].mxu1  ;;  %v1798_v11 = vsel %vm1797_vm4, %v1791_v5, -inf }
 0x58b   : > { %1799 = vmax.xlane.f32.xlu0 %v1798_v11 }
 0x618   : > { %v1800_v23 = vpop.xlane.xlu0 %1799 }
 0x619   : > { %v1801_v25 = vmax.f32 %v1796_v22, %v1800_v23 }
 0x61b   : > { %v1802_v26 = vsub.f32 %v1796_v22, %v1801_v25  ;;  %1880 = vst.msk [vmem:[#allocation3] sm:$0xff] %vm1556_vm3, %v1801_v25  ;;  %1807 = vperm.xlu0 %3525, %v1801_v25  }
 0x61d   : > { %v1803_v46 = vmul.f32 1.442695, %v1802_v26  ;;  %v1965_v26 = vpop.f32.mrb[8].mxu1 }
 0x61e   : > { %v3095_v27 = vpop.f32.mrb[9].mxu1  ;;  %v1966_v34 = vadd.f32 %v2978_v31, %v1965_v26 }
 0x61f   : > { %v1968_v28 = vpop.f32.mrb[10].mxu1 }
 0x620   : > { %v3096_v29 = vpop.f32.mrb[11].mxu1  ;;  %v2982_v36 = vmul.f32 -1.442695, %v1966_v34 }
 0x69a   : > { %v1808_v37 = vpop.permute.xlu0 %1807 }
 0x69b   : > { %v1810_v39 = vsub.f32 %v1791_v5, %v1808_v37 }
 0x69d   : > { %v1811_v40 = vmul.f32 1.442695, %v1810_v39 }
 0x69f   : > { %3573 = vpow2.f32 %v1811_v40 }
 0x6a0   : > { %3575 = vpow2.f32 %v1803_v46 }
 0x6a9   : > { %v3574_v42 = vpop.eup %3573 }
 0x6aa   : > { %v1815_v44 = vsel %vm1797_vm4, %v3574_v42, 0.0  ;;  %v1828_v45 = vpack.c.bf16 %v3574_v42, %v3574_v42  ;;  %v3576_v49 = vpop.eup %3575 }
 0x6ab   : > { %1816 = vadd.xlane.f32.xlu1 %v1815_v44  ;;  %v1814_v57 = vmul.f32 %v3576_v49, %v1813_v55 }
 0x6ac   : > { %3086 = vmatmul.mubr.msk.bf16.vlgmr.msra.gmra.mrb[8].mxu0 %vm1797_vm4, %v1828_v45 }
 0x6ad   : > { %3098 = vmatpush3.bf16.msra.mxu0 %v3533_v43  ;;  %3101 = vmatprep.mubr.msk.bf16.mxu0 %vm4658_vm0, %v4657_v0 }
 0x6ae   : > { %3099 = vmatprep.subr.bf16.mxu0 %v4657_v0 }
 0x6b1   : > { %3100 = vmatpush3.bf16.msra.mxu0 %v3534_v47 }
 0x6b2   : > { %3125 = vmatprep.subr.bf16.mxu0 %v4657_v0 }
 0x6b4   : > { %3102 = vmatmul.mubr.msk.bf16.vlgmr.msra.gmra.mrb[12].mxu0 %vm1487_vm1, %v1908_v48 }
 0x6b5   : > { %3129 = vmatprep.mubr.msk.bf16.mxu0 %vm4658_vm0, %v4657_v0 }
 0x6bc   : > { %1824 = vperm.xlu1 %3526, %v3576_v49  }
 0x738   : > { %v1817_v58 = vpop.xlane.xlu1 %1816 }
 0x739   : > { %v1818_v59 = vadd.f32 %v1817_v58, %v1814_v57  ;;  %v3543_v58 = vld [vmem:[#allocation44] sm:$0xff]  }
 0x73a   : > { %3126 = vmatpush3.bf16.msra.mxu0 %v3543_v58 }
 0x73b   : > { %1820 = vst.msk [vmem:[#allocation4] sm:$0xff] %vm1556_vm3, %v1818_v59  ;;  %3127 = vmatprep.subr.bf16.mxu0 %v4657_v0  ;;  %v3544_v59 = vld [vmem:[#allocation44 + $0x8] sm:$0xff]  }
 0x73c   : > { %v1825_v2 = vpop.permute.xlu1 %1824 }
 0x73d   : > { %v1827_v3 = vmul.f32 %v1825_v2, %v1821_v1  ;;  %v3000_v2 = vld [vmem:[#allocation42] ss:$0 sm:$0xff] }
 0x73e   : > { %3128 = vmatpush3.bf16.msra.mxu0 %v3544_v59 }
 0x73f   : > { %3133 = vmatprep.subr.bf16.mxu0 %v4657_v0 }
 0x742   : > { %v2111_v61 = vld [vmem:[#allocation4] sm:$0xff] }
 0x743   : > { %3577 = vrcp.f32 %v2111_v61 }
 0x74d   : > { %v3578_v62 = vpop.eup %3577 }
 0x74e   : > { %2115 = vperm.xlu1 %3526, %v3578_v62  }
 0x77f   : > { %v1871_v4 = vpop.f32.mrb[8].mxu0 }
 0x780   : > { %v1877_v5 = vadd.f32 %v1871_v4, %v1827_v3  ;;  %v3087_v6 = vpop.f32.mrb[9].mxu0 }
 0x781   : > { %v1874_v8 = vpop.f32.mrb[10].mxu0  ;;  %v3545_v6 = vld [vmem:[#allocation47] sm:$0xff]  }
 0x782   : > { %1879 = vst.msk [vmem:[#allocation5] sm:$0xff] %vm1559_vm6, %v1877_v5  ;;  %v3088_v9 = vpop.f32.mrb[11].mxu0  ;;  %v3546_v8 = vld [vmem:[#allocation47 + $0x8] sm:$0xff]  }
 0x783   : > { %v3547_v9 = vld [vmem:[#allocation47 + $0x10] sm:$0xff]  }
 0x787   : > { %v2034_v11 = vpop.f32.mrb[12].mxu0 }
 0x788   : > { %v3103_v12 = vpop.f32.mrb[13].mxu0  ;;  %v2035_v10 = vadd.f32 %v2983_v15, %v2034_v11  ;;  %v3548_v11 = vld [vmem:[#allocation47 + $0x18] sm:$0xff]  }
 0x789   : > { %v2037_v13 = vpop.f32.mrb[14].mxu0  ;;  %v2110_v21 = vld [vmem:[#allocation5] sm:$0xff]  ;;  %v3001_v12 = vld [vmem:[#allocation45] ss:$0 sm:$0xff] }
 0x78a   : > { %v3104_v14 = vpop.f32.mrb[15].mxu0  ;;  %v2987_v16 = vmul.f32 -1.442695, %v2035_v10 }
 0x78c   : > { %3579 = vpow2.f32 %v2987_v16 }
 0x796   : > { %v3580_v17 = vpop.eup %3579 }
 0x797   : > { %v2043_v18 = vadd.f32 1.0, %v3580_v17 }
 0x799   : > { %3581 = vrcp.f32 %v2043_v18 }
 0x79a   : > { %3583 = vpow2.f32 %v2982_v36 }
 0x7a3   : > { %v3582_v19 = vpop.eup %3581 }
 0x7a4   : > { %v2046_v22 = vmul.f32 %v3582_v19, %v2035_v10  ;;  %v3584_v43 = vpop.eup %3583 }
 0x7a5   : > { %v1974_v7 = vadd.f32 1.0, %v3584_v43 }
 0x7cd   : > { %v2116_v20 = vpop.permute.xlu1 %2115 }
 0x7ce   : > { %v2118_v23 = vmul.f32 %v2116_v20, %v2110_v21 }
 0x7d0   : > { %v2119_v24 = vmul.f32 %v2118_v23, %v2046_v22  ;;  %v3006_v23 = vld [vmem:[#allocation48] ss:$0 sm:$0xff] }
 0x7d2   : > { %v2128_v25 = vpack.c.bf16 %v2119_v24, %v2119_v24 }
 0x7d4   : > { %3122 = vmatmul.mubr.msk.bf16.vlgmr.msra.gmra.mrb[12].mxu1 %vm1559_vm6, %v2128_v25 }
 0x8a7   : > { %v2197_v37 = vpop.f32.mrb[12].mxu1 }
 0x8a8   : > { %v3146_v38 = vadd.f32 %v3145_v35, %v2197_v37  ;;  %v3123_v39 = vpop.f32.mrb[13].mxu1 }
 0x8a9   : > { %v2200_v40 = vpop.f32.mrb[14].mxu1 }
 0x8aa   : > { %v2998_v41 = vmul.f32 -1.442695, %v3146_v38  ;;  %v3124_v42 = vpop.f32.mrb[15].mxu1  ;;  %v3012_v40 = vld [vmem:[#allocation50] ss:$0 sm:$0xff] }
 0x8ab   : > { %v3013_v42 = vld [vmem:[#allocation51] ss:$0 sm:$0xff] }
 0x8ac   : > { %3585 = vpow2.f32 %v2998_v41 }
 0x8b6   : > { %v3586_v44 = vpop.eup %3585 }
 0x8b7   : > { %v2207_v45 = vadd.f32 1.0, %v3586_v44 }
 0x8b9   : > { %3587 = vrcp.f32 %v2207_v45 }
 0x8ba   : > { %3589 = vrcp.f32 %v1974_v7 }
 0x8c3   : > { %v3588_v46 = vpop.eup %3587 }
 0x8c4   : > { %v2210_v47 = vmul.f32 %v3588_v46, %v3146_v38  ;;  %v3590_v49 = vpop.eup %3589 }
 0x8c6   : > { %v2211_v48 = vsub.f32 %v2210_v47, %v5496_v30 }
 0x8c8   : > { %v2212_v50 = vmul.f32 %v3590_v49, %v2211_v48 }
 0x8ca   : > { %v2213_v51 = vadd.f32 %v2212_v50, %v5496_v30 }
 0x8cc   : > { %v2216_v52 = vsel %vm1487_vm1, %v2213_v51, 0.0 }
 0x8cd   : > { %2217 = vadd.xlane.f32.xlu1 %v2216_v52 }
 0x95a   : > { %v2218_v53 = vpop.xlane.xlu1 %2217 }
 0x95b   : > { %v2220_v54 = vmul.f32 0.03125, %v2218_v53 }
 0x95d   : > { %v2221_v55 = vsub.f32 %v2213_v51, %v2220_v54 }
 0x95f   : > { %v2222_v56 = vmul.f32 %v2221_v55, %v2221_v55 }
 0x961   : > { %v2223_v57 = vsel %vm1487_vm1, %v2222_v56, 0.0 }
 0x962   : > { %2224 = vadd.xlane.f32.xlu0 %v2223_v57 }
 0x9ef   : > { %v2225_v60 = vpop.xlane.xlu0 %2224 }
 0x9f0   : > { %v2226_v30 = vmul.f32 0.03125, %v2225_v60 }
 0x9f2   : > { %v2227_v61 = vadd.f32 1e-05, %v2226_v30 }
 0x9f4   : > { %3591 = vrsqrt.f32 %v2227_v61 }
 0x9fe   : > { %v3592_v62 = vpop.eup %3591 }
 0x9ff   : > { %v2229_v1 = vmul.f32 %v3592_v62, %v2221_v55 }
 0xa01   : > { %v2236_v3 = vmul.f32 %v2999_v63, %v2229_v1 }
 0xa03   : > { %v2243_v4 = vadd.f32 %v3000_v2, %v2236_v3 }
 0xa05   : > { %v2248_v5 = vpack.c.bf16 %v2243_v4, %v2243_v4 }
 0xa07   : > { %3130 = vmatmul.mubr.msk.bf16.vlgmr.msra.gmra.mrb[16].mxu0 %vm1487_vm1, %v2248_v5 }
 0xa08   : > { %3141 = vmatprep.mubr.msk.bf16.mxu0 %vm4658_vm0, %v4657_v0  ;;  %3134 = vmatpush3.bf16.msra.mxu0 %v3545_v6 }
 0xa09   : > { %3135 = vmatprep.subr.bf16.mxu0 %v4657_v0 }
 0xa0c   : > { %3136 = vmatpush3.bf16.msra.mxu0 %v3546_v8 }
 0xa0d   : > { %3137 = vmatprep.subr.bf16.mxu0 %v4657_v0 }
 0xa10   : > { %3138 = vmatpush3.bf16.msra.mxu0 %v3547_v9 }
 0xa11   : > { %3139 = vmatprep.subr.bf16.mxu0 %v4657_v0 }
 0xa14   : > { %3140 = vmatpush3.bf16.msra.mxu0 %v3548_v11 }
 0xada   : > { %v2305_v13 = vpop.f32.mrb[16].mxu0 }
 0xadb   : > { %v2306_v14 = vadd.f32 %v3001_v12, %v2305_v13  ;;  %v3131_v15 = vpop.f32.mrb[17].mxu0 }
 0xadc   : > { %v2308_v10 = vpop.f32.mrb[18].mxu0 }
 0xadd   : > { %v3005_v16 = vmul.f32 -1.442695, %v2306_v14  ;;  %v3132_v17 = vpop.f32.mrb[19].mxu0 }
 0xadf   : > { %3593 = vpow2.f32 %v3005_v16 }
 0xae9   : > { %v3594_v18 = vpop.eup %3593 }
 0xaea   : > { %v2314_v19 = vadd.f32 1.0, %v3594_v18 }
 0xaec   : > { %3595 = vrcp.f32 %v2314_v19 }
 0xaf6   : > { %v3596_v20 = vpop.eup %3595 }
 0xaf7   : > { %v2317_v21 = vmul.f32 %v3596_v20, %v2306_v14 }
 0xaf9   : > { %v2326_v22 = vpack.c.bf16 %v2317_v21, %v2317_v21 }
 0xafb   : > { %3142 = vmatmul.mubr.msk.bf16.vlgmr.msra.gmra.mrb[20].mxu0 %vm1559_vm6, %v2326_v22 }
 0xbce   : > { %v2395_v0 = vpop.f32.mrb[20].mxu0 }
 0xbcf   : > { %v2396_v24 = vadd.f32 %v3006_v23, %v2395_v0  ;;  %v3143_v25 = vpop.f32.mrb[21].mxu0 }
 0xbd0   : > { %v2398_v26 = vpop.f32.mrb[22].mxu0 }
 0xbd1   : > { %v3144_v27 = vpop.f32.mrb[23].mxu0  ;;  %v2401_v28 = vadd.f32 %v2396_v24, %v2243_v4 }
 0xbd3   : > { %v2404_v29 = vsel %vm1487_vm1, %v2401_v28, 0.0 }
 0xbd4   : > { %2405 = vadd.xlane.f32.xlu1 %v2404_v29 }
 0xc61   : > { %v2406_v31 = vpop.xlane.xlu1 %2405 }
 0xc62   : > { %v2407_v32 = vmul.f32 0.03125, %v2406_v31 }
 0xc64   : > { %v2408_v33 = vsub.f32 %v2401_v28, %v2407_v32 }
 0xc66   : > { %v2409_v34 = vmul.f32 %v2408_v33, %v2408_v33 }
 0xc68   : > { %v2410_v35 = vsel %vm1487_vm1, %v2409_v34, 0.0 }
 0xc69   : > { %2411 = vadd.xlane.f32.xlu1 %v2410_v35 }
 0xcf6   : > { %v2412_v36 = vpop.xlane.xlu1 %2411 }
 0xcf7   : > { %v2413_v37 = vmul.f32 0.03125, %v2412_v36 }
 0xcf9   : > { %v2414_v38 = vadd.f32 1e-05, %v2413_v37 }
 0xcfb   : > { %3597 = vrsqrt.f32 %v2414_v38 }
 0xd05   : > { %v3598_v39 = vpop.eup %3597 }
 0xd06   : > { %v2416_v41 = vmul.f32 %v3598_v39, %v2408_v33 }
 0xd08   : > { %v2423_v43 = vmul.f32 %v3012_v40, %v2416_v41 }
 0xd0a   : > { %v2430_v44 = vadd.f32 %v3013_v42, %v2423_v43 }
 0xd0c   : > { %v2431_v45 = vpack.c.bf16 %v2430_v44, %v2430_v44 }
 0xd0e   : > { %2433 = vst.msk [vmem:[%s1437_s7] sm:$0xf] %vm2432_vm7, %v2431_v45 }
 0xd0f   : > { %4460 = shalt.err (!%p4457_p0)
}
 0xd10   : > { %s4461_s19 = scalar_lea.hbm %s5547_s4, 64  ;;  %s4465_s28 = scalar_lea.hbm %s5763_s21, 128 }
 0xd11   : > { %p4462_p8 = scmp.ne.s32.totalorder %s5547_s4, %s4461_s19  ;;  %p4466_p12 = scmp.lt.u32.totalorder %s5547_s4, %s5763_s21 }
 0xd12   : > { %p4467_p10 = scmp.lt.u32.totalorder %s4465_s28, %s4461_s19  ;;  %p4469_p5 = scmp.lt.u32.totalorder %s4461_s19, %s5547_s4 }
 0xd13   : > { %p4463_p11 = pnand %p4462_p8, %p5764_p13 }
 0xd14   : > { %p4468_p9 = por %p4467_p10, %p4466_p12 }
 0xd15   : > { %p4464_p4 = pneg %p4463_p11 }
 0xd16   : > { %p4470_p3 = por %p4469_p5, %p4468_p9 }
 0xd18   : > { %p4471_p2 = pnand %p4470_p3, %p4464_p4 }
 0xd1a   : > { %4474 = shalt.err (!%p4471_p2)
}
 0xd1b   : > { %3263 = dma.vmem_to_hbm [thread:$0]  (%p5764_p13), %s5549_s12, 64, %s5547_s4, %s2435_s18  }
 0xd1c PF: > { %s2461_s30 = sand.u32 1, %s4573_s0   ;;  %p5765_p1 = scmp.ne.s32.totalorder %s5703_s3, 0 }
 0xd1d   : > { %p5766_p7 = scmp.ge.s32.totalorder %s4593_s23, 2  ;;  %s2462_s27 = scalar_lea.sflag [#allocation8], %s2461_s30 }
 0xd1f   : > { %p3358_p6 = pnand %p5766_p7, %p5765_p1 }
 0xd21   : > { %4568 = dma.done.wait (!%p3358_p6), %s2462_s27, 64  }
 0xd22   : > { %4570 = vsyncadd (!%p3358_p6), %s2462_s27, 4294967232  ;;  %s96_s23 = sadd.s32 1, %s4593_s23   ;;  %s5767_s0 = smov %s4577_s15 }
 0xd23   : > { %p93_p0 = scmp.ge.s32.totalorder %s96_s23, 4   ;;  %s5768_s15 = smov %s4581_s16 }
 0xd24   : > { %s5769_s16 = smov %s5052_s2  ;;  %s5770_s18 = smov %s4589_s22 }
 0xd25   : > { %s5771_s22 = smov %s5773_s1  ;;  %95 = sbr.rel (!%p93_p0) target bundleno = 91 (0x5b), region = 365 }
 0xd2c   :  { %2467 = vsyncpa [#allocation7], 1 }
 0xd2d   :  { %2469 = vsyncpa [#allocation7 + $0x1], 1 }
 0xd2e   :  { %2470 = vsyncpa [#allocation10], 1 }
 0xd2f   :  { %2472 = vsyncpa [#allocation10 + $0x1], 1 }
 0xd30   :  { %2473 = vsyncpa [#allocation13], 1 }
 0xd31   :  { %2475 = vsyncpa [#allocation13 + $0x1], 1 }
 0xd32   :  { %2476 = vsyncpa [#allocation16], 1 }
 0xd33   :  { %2477 = vsyncpa [#allocation19], 1 }
 0xd34   :  { %2478 = vsyncpa [#allocation22], 1 }
 0xd35   :  { %2479 = vsyncpa [#allocation25], 1 }
 0xd36   :  { %2480 = vsyncpa [#allocation28], 1 }
 0xd37   :  { %2481 = vsyncpa [#allocation31], 1 }
 0xd38   :  { %2482 = vsyncpa [#allocation34], 1 }
 0xd39   :  { %2483 = vsyncpa [#allocation37], 1 }
 0xd3a   :  { %2484 = vsyncpa [#allocation40], 1 }
 0xd3b   :  { %2485 = vsyncpa [#allocation43], 1 }
 0xd3c   :  { %2486 = vsyncpa [#allocation46], 1 }
 0xd3d   :  { %2487 = vsyncpa [#allocation49], 1 }
 0xd3e   :  { %2488 = vsyncpa [#allocation52], 1 }
 0xd3f   :  { %2489 = vsyncpa [#allocation8], 1 }
 0xd40   :  { %2491 = vsyncpa [#allocation8 + $0x1], 1 }

</bundles_post_ra>
